<compile_context>
chip_gen: v5e
topology: v5e:2x2
jax: 0.10.0
libtpu: 0.0.40
codegen_flags: <defaults>
</compile_context>

<pallas_src>
import functools

import jax
import jax.numpy as jnp
import numpy as np
from jax.experimental import pallas as pl
from jax.experimental.pallas import tpu as pltpu


# --------------------------------------------------------------------------
# Fused kernel: one grid step = `TR` output rows of one batch element.
# --------------------------------------------------------------------------
def _bottleneck_fused_kernel(xT_ref, xM_ref, xB_ref, w1_ref, b1_ref, w2_ref,
                             b2_ref, w3_ref, b3_ref, o_ref, h1p_ref,
                             *, TR, W, d, CR):
    # xT_ref: (1, 2d, W, C)  rows [i*TR-2d, i*TR)   (clamped; ignored for i==0)
    # xM_ref: (1, TR, W, C)  rows [i*TR, i*TR+TR)   (also the residual source)
    # xB_ref: (1, 2d, W, C)  rows [i*TR+TR, +2d)    (clamped; ignored for last i)
    # w1_ref: (C, P)   w2_ref: (3, 3, P, P) HWIO    w3_ref: (P, C)   (BN folded)
    # b*_ref: (1, P) / (1, P) / (1, C) float32
    # o_ref : (1, TR, W, C)
    # h1p_ref: VMEM scratch (TR+4d, W+2d, P), compute dtype.
    #   h1p row j   <-> input row  i*TR - 2d + j
    #   h1p col d+w <-> input col  w             (cols [0,d) and [d+W,..) = 0)
    i = pl.program_id(1)
    last = pl.num_programs(1) - 1
    C = xM_ref.shape[-1]
    P = w1_ref.shape[-1]
    halo = 2 * d
    cdt = h1p_ref.dtype
    nchunks = TR // CR

    def conv1_flat(x2d):                                 # (M, C) -> (M, P) f32
        h = jnp.dot(x2d, w1_ref[...], preferred_element_type=jnp.float32)
        return jnp.maximum(h + b1_ref[...], 0.0)

    # ---- width zero-pad strips of h1p (conv2 left/right padding) ----------
    # Zeroed every step (cheap) because scratch is per-core under megacore.
    zpad = jnp.zeros((TR + 4 * d, d, P), cdt)
    h1p_ref[:, 0:d, :] = zpad
    h1p_ref[:, d + W:d + W + d, :] = zpad

    # ---- conv1 on the 2d-row halo blocks -----------------------------------
    # Rows outside the image must be zero in conv2's input -> scale by 0/1.
    top_ok = (i > 0).astype(jnp.float32)
    ht = conv1_flat(xT_ref[0].reshape(halo * W, C)) * top_ok
    h1p_ref[0:halo, d:d + W, :] = ht.astype(cdt).reshape(halo, W, P)

    bot_ok = (i < last).astype(jnp.float32)
    hb = conv1_flat(xB_ref[0].reshape(halo * W, C)) * bot_ok
    h1p_ref[halo + TR:, d:d + W, :] = hb.astype(cdt).reshape(halo, W, P)

    # ---- conv1 on the main TR rows, in CR-row chunks (bounded temporaries) -
    def c1_body(c, carry):
        r0 = pl.multiple_of(c * CR, CR)
        xa = xM_ref[0, pl.ds(r0, CR)].reshape(CR * W, C)
        h = conv1_flat(xa)
        h1p_ref[pl.ds(halo + r0, CR), d:d + W, :] = (
            h.astype(cdt).reshape(CR, W, P))
        return carry

    jax.lax.fori_loop(0, nchunks, c1_body, 0)

    # ---- conv2 (3x3, dilation d) + bn2 + ReLU + conv3 + bn3 + res + ReLU ---
    # Per CR-row chunk: 9 taps accumulate in a traced f32 value (no VMEM RMW),
    # epilogue fused, single store per chunk.
    def c2_body(c, carry):
        r0 = pl.multiple_of(c * CR, CR)
        acc = None
        for ky in range(3):
            for kx in range(3):
                patch = h1p_ref[pl.ds(r0 + d + ky * d, CR),
                                kx * d:kx * d + W, :]
                t = jnp.dot(patch.reshape(CR * W, P), w2_ref[ky, kx],
                            preferred_element_type=jnp.float32)
                acc = t if acc is None else acc + t
        h2 = jnp.maximum(acc + b2_ref[...], 0.0).astype(w3_ref.dtype)
        y = jnp.dot(h2, w3_ref[...], preferred_element_type=jnp.float32)
        res = xM_ref[0, pl.ds(r0, CR)].astype(jnp.float32).reshape(CR * W, C)
        y = jnp.maximum(y + b3_ref[...] + res, 0.0)
        o_ref[0, pl.ds(r0, CR)] = y.reshape(CR, W, C).astype(o_ref.dtype)
        return carry

    jax.lax.fori_loop(0, nchunks, c2_body, 0)


# --------------------------------------------------------------------------
# VMEM budget / tile sizing (generation aware)
# --------------------------------------------------------------------------
def _vmem_capacity_bytes():
    try:
        info = pltpu.get_tpu_info()
        cap = int(getattr(info, "vmem_capacity_bytes", 0))
        if cap > 0:
            return cap
    except Exception:
        pass
    return 64 * 1024 * 1024          # conservative default (v7x per-TensorCore)


def _vmem_estimate_bytes(TR, W, C, P, d, x_bytes, w_bytes, cr_cap):
    """Conservative per-step VMEM footprint (double-buffered I/O, scratch, temps)."""
    halo = 2 * d
    io = 2 * ((TR + 2 * halo) * W * C + TR * W * C) * x_bytes       # in + out
    # assume double-buffered weights so the non-Buffered fallback also fits
    weights = 2 * ((C * P + 9 * P * P + P * C) * w_bytes + (2 * P + C) * 4)
    scratch = (TR + 4 * d) * (W + 2 * d) * P * w_bytes              # h1p
    temps = cr_cap * W * (6 * P + 4 * C) * 4                        # chunk temps
    return int(1.15 * (io + weights + scratch + temps)) + (2 << 20)


def _pick_tile_rows(N, H, W, C, P, d, x_bytes, w_bytes, cr_cap, budget):
    """Largest row tile that divides H, is a multiple of 2d, fits the budget.
    Prefers an even total grid (megacore load balance on v7x)."""
    halo = 2 * d
    if H % halo != 0:
        # TODO(synk): ragged H (not a multiple of 2*dilation) unsupported.
        raise ValueError(f"H={H} must be a multiple of 2*dilation={halo}")
    fits = []
    tr = halo
    while tr <= H:
        if H % tr == 0 and _vmem_estimate_bytes(
                tr, W, C, P, d, x_bytes, w_bytes, cr_cap) <= budget:
            fits.append(tr)
        tr += halo
    if not fits:
        # TODO(synk): width-tiling fallback for very large W*C not implemented.
        raise ValueError("no row tile fits the VMEM budget; "
                         "width tiling is not implemented")
    best = fits[-1]
    if (N * (H // best)) % 2 == 1:
        even = [t for t in fits if (N * (H // t)) % 2 == 0 and 2 * t >= best]
        if even:
            best = even[-1]
    return best


def _pick_chunk_rows(TR, W, target_m=512):
    """Rows per inner chunk so the flattened M dim is ~register sized."""
    cap = max(1, target_m // max(W, 1))
    return max(c for c in range(1, min(TR, cap) + 1) if TR % c == 0)


# --------------------------------------------------------------------------
# pallas_call builder (+ single-buffered-weights probe with fallback)
# --------------------------------------------------------------------------
_WEIGHT_SINGLE_BUFFER = []     # [] = unresolved, [True]/[False] once probed


def _weight_spec(shape, single_buffer):
    ndim = len(shape)
    index_map = lambda n, i: (0,) * ndim
    if single_buffer:
        # Constant-index weights are never re-fetched; one buffer halves their
        # VMEM footprint (matters most on v7x's 64 MiB).
        return pl.BlockSpec(shape, index_map, pipeline_mode=pl.Buffered(1))
    return pl.BlockSpec(shape, index_map)


def _run_fused(x, params, *, TR, CR, d, vmem_limit, single_buffer_weights):
    N, H, W, C = x.shape
    P = params["w1f"].shape[1]
    halo = 2 * d
    nblk = TR // halo                 # row-tile size in 2d-row halo blocks
    Hb = H // halo                    # number of 2d-row blocks in H
    kern = functools.partial(_bottleneck_fused_kernel, TR=TR, W=W, d=d, CR=CR)

    in_specs = [
        # top halo: 2d rows just above the tile (clamped to block 0 for i==0)
        pl.BlockSpec((1, halo, W, C),
                     lambda n, i: (n, jnp.maximum(i * nblk - 1, 0), 0, 0)),
        # main tile (also the residual)
        pl.BlockSpec((1, TR, W, C), lambda n, i: (n, i, 0, 0)),
        # bottom halo: 2d rows just below the tile (clamped for the last tile)
        pl.BlockSpec((1, halo, W, C),
                     lambda n, i: (n, jnp.minimum((i + 1) * nblk, Hb - 1), 0, 0)),
        _weight_spec((C, P), single_buffer_weights),
        _weight_spec((1, P), single_buffer_weights),
        _weight_spec((3, 3, P, P), single_buffer_weights),
        _weight_spec((1, P), single_buffer_weights),
        _weight_spec((P, C), single_buffer_weights),
        _weight_spec((1, C), single_buffer_weights),
    ]

    return pl.pallas_call(
        kern,
        out_shape=jax.ShapeDtypeStruct((N, H, W, C), x.dtype),
        grid=(N, H // TR),
        in_specs=in_specs,
        out_specs=pl.BlockSpec((1, TR, W, C), lambda n, i: (n, i, 0, 0)),
        scratch_shapes=[pltpu.VMEM((TR + 4 * d, W + 2 * d, P),
                                   params["w2f"].dtype)],
        compiler_params=pltpu.CompilerParams(
            dimension_semantics=("parallel", "parallel"),
            vmem_limit_bytes=int(vmem_limit)),
    )(x, x, x, params["w1f"], params["b1"], params["w2f"], params["b2"],
      params["w3f"], params["b3"])


# --------------------------------------------------------------------------
# Fused forward (NHWC core + NCHW drop-in wrapper)
# --------------------------------------------------------------------------
def bottleneck_forward_nhwc(x, params, *, stride=1, dilation=1, multi_grid=1,
                            tile_rows=None):
    """Fused Bottleneck forward, NHWC in / NHWC out (downsample=None path)."""
    N, H, W, C = x.shape
    P = params["w1f"].shape[1]
    assert C == 4 * P, "downsample is None -> inplanes must equal planes*4"
    assert stride == 1, "downsample is None -> stride must be 1"
    d = int(dilation * multi_grid)
    halo = 2 * d

    x_bytes = jnp.dtype(x.dtype).itemsize
    w_bytes = jnp.dtype(params["w2f"].dtype).itemsize
    cr_cap = max(1, 512 // max(W, 1))

    cap = _vmem_capacity_bytes()
    # ~48 MiB on v7x (64 MiB physical), ~96 MiB on v5e/v6e (128 MiB physical).
    vmem_limit = max(32 * 2**20, min(int(0.75 * cap), 100 * 2**20))

    if tile_rows is None:
        TR = _pick_tile_rows(N, H, W, C, P, d, x_bytes, w_bytes, cr_cap,
                             vmem_limit)
    else:
        TR = int(tile_rows)
    assert H % TR == 0, f"H={H} must be divisible by tile_rows={TR}"
    assert TR % halo == 0, f"tile_rows={TR} must be a multiple of 2*dilation={halo}"
    CR = _pick_chunk_rows(TR, W)

    kwargs = dict(TR=TR, CR=CR, d=d, vmem_limit=vmem_limit)
    if not _WEIGHT_SINGLE_BUFFER:
        try:
            out = _run_fused(x, params, single_buffer_weights=True, **kwargs)
            _WEIGHT_SINGLE_BUFFER.append(True)
            return out
        except Exception:
            _WEIGHT_SINGLE_BUFFER.append(False)
            return _run_fused(x, params, single_buffer_weights=False, **kwargs)
    return _run_fused(x, params,
                      single_buffer_weights=_WEIGHT_SINGLE_BUFFER[0], **kwargs)


def bottleneck_forward(x_nchw, params, **kw):
    """Drop-in NCHW interface matching the PyTorch module.  Prefer the NHWC
    entry point inside an NHWC end-to-end network to avoid these transposes."""
    x = jnp.transpose(x_nchw, (0, 2, 3, 1))
    out = bottleneck_forward_nhwc(x, params, **kw)
    return jnp.transpose(out, (0, 3, 1, 2))


# --------------------------------------------------------------------------
# Parameters: raw PyTorch-layout init + BN-folding prep
# --------------------------------------------------------------------------
def init_raw_params(key, inplanes, planes):
    """Deterministic params in the PyTorch module's layouts."""
    expansion = 4
    ks = jax.random.split(key, 15)
    p = {}
    p["conv1_w"] = 0.2 * jax.random.normal(ks[0], (planes, inplanes, 1, 1), jnp.float32)
    p["conv2_w"] = 0.2 * jax.random.normal(ks[1], (planes, planes, 3, 3), jnp.float32)
    p["conv3_w"] = 0.2 * jax.random.normal(ks[2], (planes * expansion, planes, 1, 1), jnp.float32)

    def bn(pfx, kg, kb, km, kv, Cn):
        p[pfx + "_g"] = 1.0 + 0.1 * jax.random.normal(kg, (Cn,), jnp.float32)
        p[pfx + "_b"] = 0.1 * jax.random.normal(kb, (Cn,), jnp.float32)
        p[pfx + "_m"] = 0.1 * jax.random.normal(km, (Cn,), jnp.float32)
        p[pfx + "_v"] = 1.0 + 0.5 * jax.random.uniform(kv, (Cn,), jnp.float32)

    bn("bn1", ks[3], ks[4], ks[5], ks[6], planes)
    bn("bn2", ks[7], ks[8], ks[9], ks[10], planes)
    bn("bn3", ks[11], ks[12], ks[13], ks[14], planes * expansion)
    return p


def prepare_params(raw, act_dtype=jnp.float32, eps=1e-5):
    """Fold eval-mode BN scale into the conv weights (kernel epilogue = bias+ReLU)."""
    def fold(pfx):
        s = raw[pfx + "_g"] / jnp.sqrt(raw[pfx + "_v"] + eps)
        return s, raw[pfx + "_b"] - raw[pfx + "_m"] * s

    s1, b1 = fold("bn1")
    s2, b2 = fold("bn2")
    s3, b3 = fold("bn3")
    w1 = jnp.transpose(raw["conv1_w"][:, :, 0, 0], (1, 0)) * s1[None, :]        # (C, P)
    w2 = jnp.transpose(raw["conv2_w"], (2, 3, 1, 0)) * s2[None, None, None, :]  # (3,3,P,P) HWIO
    w3 = jnp.transpose(raw["conv3_w"][:, :, 0, 0], (1, 0)) * s3[None, :]        # (P, C)
    return dict(
        w1f=w1.astype(act_dtype), b1=b1.reshape(1, -1).astype(jnp.float32),
        w2f=w2.astype(act_dtype), b2=b2.reshape(1, -1).astype(jnp.float32),
        w3f=w3.astype(act_dtype), b3=b3.reshape(1, -1).astype(jnp.float32),
    )


# --------------------------------------------------------------------------
# Pure-JAX reference (unfolded BN, NHWC) for correctness checking
# --------------------------------------------------------------------------
def ref_forward_nhwc(x, raw, *, stride=1, dilation=1, multi_grid=1, eps=1e-5):
    def bn(h, pfx):
        g, b = raw[pfx + "_g"], raw[pfx + "_b"]
        m, v = raw[pfx + "_m"], raw[pfx + "_v"]
        return (h - m) * (g / jnp.sqrt(v + eps)) + b

    w1 = jnp.transpose(raw["conv1_w"][:, :, 0, 0], (1, 0))
    h = jnp.einsum("nhwc,cp->nhwp", x, w1)
    h = jnp.maximum(bn(h, "bn1"), 0.0)

    d = dilation * multi_grid
    w2 = jnp.transpose(raw["conv2_w"], (2, 3, 1, 0))
    h = jax.lax.conv_general_dilated(
        h, w2, window_strides=(stride, stride), padding=[(d, d), (d, d)],
        rhs_dilation=(d, d), dimension_numbers=("NHWC", "HWIO", "NHWC"))
    h = jnp.maximum(bn(h, "bn2"), 0.0)

    w3 = jnp.transpose(raw["conv3_w"][:, :, 0, 0], (1, 0))
    h = jnp.einsum("nhwp,pc->nhwc", h, w3)
    h = bn(h, "bn3") + x
    return jnp.maximum(h, 0.0)


if __name__ == "__main__":
    key = jax.random.PRNGKey(0)
    kx, kp = jax.random.split(key)

    N, planes, H, W = 2, 4, 16, 16
    inplanes = planes * 4          # downsample=None requires inplanes == planes*4

    x_nchw = jax.random.normal(kx, (N, inplanes, H, W), jnp.float32)
    raw = init_raw_params(kp, inplanes, planes)
    x_nhwc = jnp.transpose(x_nchw, (0, 2, 3, 1))

    # f32, dilation=1, two row tiles (exercises halo fetch + boundary masks).
    params = prepare_params(raw, jnp.float32)
    out = jax.block_until_ready(
        bottleneck_forward_nhwc(x_nhwc, params, tile_rows=8))
    ref = ref_forward_nhwc(x_nhwc, raw)
    np.testing.assert_allclose(np.asarray(out), np.asarray(ref),
                               rtol=1e-4, atol=1e-4)

    # f32, dilation=2 (larger halo / different mask geometry).
    out_d2 = jax.block_until_ready(
        bottleneck_forward_nhwc(x_nhwc, params, dilation=2, tile_rows=8))
    ref_d2 = ref_forward_nhwc(x_nhwc, raw, dilation=2)
    np.testing.assert_allclose(np.asarray(out_d2), np.asarray(ref_d2),
                               rtol=1e-4, atol=1e-4)

    # NCHW drop-in wrapper + automatic tile picker.
    out_nchw = jax.block_until_ready(bottleneck_forward(x_nchw, params))
    np.testing.assert_allclose(np.asarray(out_nchw),
                               np.asarray(jnp.transpose(ref, (0, 3, 1, 2))),
                               rtol=1e-4, atol=1e-4)

    # bf16 activations/weights (f32 accumulation): relative-error check.
    params_bf16 = prepare_params(raw, jnp.bfloat16)
    out_bf16 = jax.block_until_ready(
        bottleneck_forward_nhwc(x_nhwc.astype(jnp.bfloat16), params_bf16,
                                tile_rows=8))
    out_bf16_f32 = np.asarray(jnp.asarray(out_bf16, jnp.float32))
    ref_np = np.asarray(ref)
    rel = np.max(np.abs(out_bf16_f32 - ref_np)) / (np.max(np.abs(ref_np)) + 1e-6)
    assert rel < 5e-2, f"bf16 relative error too large: {rel}"

    print("KERNEL_OK")
</pallas_src>

<mosaic_0001>
module attributes {stable_mosaic.version = 11 : i64} {
  func.func @_bottleneck_fused_kernel(%arg0: i32, %arg1: i32, %arg2: memref<1x2x16x16xf32, #tpu.memory_space<vmem>>, %arg3: memref<1x8x16x16xf32, #tpu.memory_space<vmem>>, %arg4: memref<1x2x16x16xf32, #tpu.memory_space<vmem>>, %arg5: memref<16x4xf32, #tpu.memory_space<vmem>>, %arg6: memref<1x4xf32, #tpu.memory_space<vmem>>, %arg7: memref<3x3x4x4xf32, #tpu.memory_space<vmem>>, %arg8: memref<1x4xf32, #tpu.memory_space<vmem>>, %arg9: memref<4x16xf32, #tpu.memory_space<vmem>>, %arg10: memref<1x16xf32, #tpu.memory_space<vmem>>, %arg11: memref<1x8x16x16xf32, #tpu.memory_space<vmem>>, %arg12: memref<12x18x4xf32, #tpu.memory_space<vmem>>) attributes {dimension_semantics = [#tpu.dimension_semantics<parallel>, #tpu.dimension_semantics<parallel>], iteration_bounds = array<i64: 2, 2>, scalar_prefetch = 0 : i64, scratch_operands = 1 : i64, tpu.core_type = #tpu.core_type<tc>, window_params = [{transform_indices = @transform_0, window_bounds = array<i64: 1, 2, 16, 16>}, {transform_indices = @transform_1, window_bounds = array<i64: 1, 8, 16, 16>}, {transform_indices = @transform_2, window_bounds = array<i64: 1, 2, 16, 16>}, {pipeline_mode = #tpu.pipeline_mode<synchronous>, transform_indices = @transform_3, window_bounds = array<i64: 16, 4>}, {pipeline_mode = #tpu.pipeline_mode<synchronous>, transform_indices = @transform_4, window_bounds = array<i64: 1, 4>}, {pipeline_mode = #tpu.pipeline_mode<synchronous>, transform_indices = @transform_5, window_bounds = array<i64: 3, 3, 4, 4>}, {pipeline_mode = #tpu.pipeline_mode<synchronous>, transform_indices = @transform_6, window_bounds = array<i64: 1, 4>}, {pipeline_mode = #tpu.pipeline_mode<synchronous>, transform_indices = @transform_7, window_bounds = array<i64: 4, 16>}, {pipeline_mode = #tpu.pipeline_mode<synchronous>, transform_indices = @transform_8, window_bounds = array<i64: 1, 16>}, {transform_indices = @transform_9, window_bounds = array<i64: 1, 8, 16, 16>}]} {
    %cst = arith.constant 0.000000e+00 : f32
    %0 = vector.broadcast %cst : f32 to vector<12x1x4xf32>
    %c0 = arith.constant 0 : index
    %c0_0 = arith.constant 0 : index
    %c0_1 = arith.constant 0 : index
    %1 = vector.load %arg12[%c0, %c0_0, %c0_1] : memref<12x18x4xf32, #tpu.memory_space<vmem>>, vector<12x1x4xf32>
    tpu.vector_store %arg12[%c0, %c0_0, %c0_1], %0 {strides = array<i32>} : memref<12x18x4xf32, #tpu.memory_space<vmem>>, vector<12x1x4xf32>,
    %c0_2 = arith.constant 0 : index
    %c17 = arith.constant 17 : index
    %c0_3 = arith.constant 0 : index
    %2 = vector.load %arg12[%c0_2, %c17, %c0_3] : memref<12x18x4xf32, #tpu.memory_space<vmem>>, vector<12x1x4xf32>
    tpu.vector_store %arg12[%c0_2, %c17, %c0_3], %0 {strides = array<i32>} : memref<12x18x4xf32, #tpu.memory_space<vmem>>, vector<12x1x4xf32>,
    %c0_i32 = arith.constant 0 : i32
    %3 = arith.cmpi sgt, %arg1, %c0_i32 : i32
    %4 = arith.extui %3 : i1 to i32
    %5 = arith.sitofp %4 : i32 to f32
    %c0_4 = arith.constant 0 : index
    %c0_5 = arith.constant 0 : index
    %c0_6 = arith.constant 0 : index
    %c0_7 = arith.constant 0 : index
    %6 = vector.load %arg2[%c0_4, %c0_5, %c0_6, %c0_7] : memref<1x2x16x16xf32, #tpu.memory_space<vmem>>, vector<1x2x16x16xf32>
    %7 = vector.shape_cast %6 : vector<1x2x16x16xf32> to vector<2x16x16xf32>
    %8 = vector.shape_cast %7 : vector<2x16x16xf32> to vector<32x16xf32>
    %c0_8 = arith.constant 0 : index
    %c0_9 = arith.constant 0 : index
    %9 = vector.load %arg5[%c0_8, %c0_9] : memref<16x4xf32, #tpu.memory_space<vmem>>, vector<16x4xf32>
    %cst_10 = arith.constant dense<0.000000e+00> : vector<32x4xf32>
    %10 = tpu.matmul %8, %9, %cst_10 {dimension_numbers = #tpu.dot_dimension_numbers<[1], [0], [0], [1], [0, 0, 1, 1], [], []>} : vector<32x16xf32>, vector<16x4xf32>, vector<32x4xf32> -> vector<32x4xf32>
    %c0_11 = arith.constant 0 : index
    %c0_12 = arith.constant 0 : index
    %11 = vector.load %arg6[%c0_11, %c0_12] : memref<1x4xf32, #tpu.memory_space<vmem>>, vector<1x4xf32>
    %12 = vector.broadcast %11 : vector<1x4xf32> to vector<32x4xf32>
    %13 = arith.addf %10, %12 : vector<32x4xf32>
    %cst_13 = arith.constant 0.000000e+00 : f32
    %14 = vector.broadcast %cst_13 : f32 to vector<32x4xf32>
    %15 = arith.maximumf %13, %14 : vector<32x4xf32>
    %16 = vector.broadcast %5 : f32 to vector<32x4xf32>
    %17 = arith.mulf %15, %16 : vector<32x4xf32>
    %18 = vector.shape_cast %17 : vector<32x4xf32> to vector<2x16x4xf32>
    %c0_14 = arith.constant 0 : index
    %c1 = arith.constant 1 : index
    %c0_15 = arith.constant 0 : index
    %19 = vector.load %arg12[%c0_14, %c1, %c0_15] : memref<12x18x4xf32, #tpu.memory_space<vmem>>, vector<2x16x4xf32>
    tpu.vector_store %arg12[%c0_14, %c1, %c0_15], %18 {strides = array<i32>} : memref<12x18x4xf32, #tpu.memory_space<vmem>>, vector<2x16x4xf32>,
    %c1_i32 = arith.constant 1 : i32
    %20 = arith.cmpi slt, %arg1, %c1_i32 : i32
    %21 = arith.extui %20 : i1 to i32
    %22 = arith.sitofp %21 : i32 to f32
    %c0_16 = arith.constant 0 : index
    %c0_17 = arith.constant 0 : index
    %c0_18 = arith.constant 0 : index
    %c0_19 = arith.constant 0 : index
    %23 = vector.load %arg4[%c0_16, %c0_17, %c0_18, %c0_19] : memref<1x2x16x16xf32, #tpu.memory_space<vmem>>, vector<1x2x16x16xf32>
    %24 = vector.shape_cast %23 : vector<1x2x16x16xf32> to vector<2x16x16xf32>
    %25 = vector.shape_cast %24 : vector<2x16x16xf32> to vector<32x16xf32>
    %c0_20 = arith.constant 0 : index
    %c0_21 = arith.constant 0 : index
    %26 = vector.load %arg5[%c0_20, %c0_21] : memref<16x4xf32, #tpu.memory_space<vmem>>, vector<16x4xf32>
    %cst_22 = arith.constant dense<0.000000e+00> : vector<32x4xf32>
    %27 = tpu.matmul %25, %26, %cst_22 {dimension_numbers = #tpu.dot_dimension_numbers<[1], [0], [0], [1], [0, 0, 1, 1], [], []>} : vector<32x16xf32>, vector<16x4xf32>, vector<32x4xf32> -> vector<32x4xf32>
    %c0_23 = arith.constant 0 : index
    %c0_24 = arith.constant 0 : index
    %28 = vector.load %arg6[%c0_23, %c0_24] : memref<1x4xf32, #tpu.memory_space<vmem>>, vector<1x4xf32>
    %29 = vector.broadcast %28 : vector<1x4xf32> to vector<32x4xf32>
    %30 = arith.addf %27, %29 : vector<32x4xf32>
    %cst_25 = arith.constant 0.000000e+00 : f32
    %31 = vector.broadcast %cst_25 : f32 to vector<32x4xf32>
    %32 = arith.maximumf %30, %31 : vector<32x4xf32>
    %33 = vector.broadcast %22 : f32 to vector<32x4xf32>
    %34 = arith.mulf %32, %33 : vector<32x4xf32>
    %35 = vector.shape_cast %34 : vector<32x4xf32> to vector<2x16x4xf32>
    %c10 = arith.constant 10 : index
    %c1_26 = arith.constant 1 : index
    %c0_27 = arith.constant 0 : index
    %36 = vector.load %arg12[%c10, %c1_26, %c0_27] : memref<12x18x4xf32, #tpu.memory_space<vmem>>, vector<2x16x4xf32>
    tpu.vector_store %arg12[%c10, %c1_26, %c0_27], %35 {strides = array<i32>} : memref<12x18x4xf32, #tpu.memory_space<vmem>>, vector<2x16x4xf32>,
    %c0_i32_28 = arith.constant 0 : i32
    %c8_i32 = arith.constant 8 : i32
    %37 = arith.muli %c0_i32_28, %c8_i32 : i32
    %38 = tpu.assume_multiple %37, 8 : i32
    %c0_29 = arith.constant 0 : index
    %39 = arith.index_cast %38 : i32 to index
    %c0_30 = arith.constant 0 : index
    %c0_31 = arith.constant 0 : index
    %40 = vector.load %arg3[%c0_29, %39, %c0_30, %c0_31] : memref<1x8x16x16xf32, #tpu.memory_space<vmem>>, vector<1x8x16x16xf32>
    %41 = vector.shape_cast %40 : vector<1x8x16x16xf32> to vector<8x16x16xf32>
    %42 = vector.shape_cast %41 : vector<8x16x16xf32> to vector<128x16xf32>
    %c0_32 = arith.constant 0 : index
    %c0_33 = arith.constant 0 : index
    %43 = vector.load %arg5[%c0_32, %c0_33] : memref<16x4xf32, #tpu.memory_space<vmem>>, vector<16x4xf32>
    %cst_34 = arith.constant dense<0.000000e+00> : vector<128x4xf32>
    %44 = tpu.matmul %42, %43, %cst_34 {dimension_numbers = #tpu.dot_dimension_numbers<[1], [0], [0], [1], [0, 0, 1, 1], [], []>} : vector<128x16xf32>, vector<16x4xf32>, vector<128x4xf32> -> vector<128x4xf32>
    %c0_35 = arith.constant 0 : index
    %c0_36 = arith.constant 0 : index
    %45 = vector.load %arg6[%c0_35, %c0_36] : memref<1x4xf32, #tpu.memory_space<vmem>>, vector<1x4xf32>
    %46 = vector.broadcast %45 : vector<1x4xf32> to vector<128x4xf32>
    %47 = arith.addf %44, %46 : vector<128x4xf32>
    %cst_37 = arith.constant 0.000000e+00 : f32
    %48 = vector.broadcast %cst_37 : f32 to vector<128x4xf32>
    %49 = arith.maximumf %47, %48 : vector<128x4xf32>
    %50 = vector.shape_cast %49 : vector<128x4xf32> to vector<8x16x4xf32>
    %c2_i32 = arith.constant 2 : i32
    %51 = arith.addi %c2_i32, %38 : i32
    %52 = arith.index_cast %51 : i32 to index
    %c1_38 = arith.constant 1 : index
    %c0_39 = arith.constant 0 : index
    %53 = vector.load %arg12[%52, %c1_38, %c0_39] : memref<12x18x4xf32, #tpu.memory_space<vmem>>, vector<8x16x4xf32>
    tpu.vector_store %arg12[%52, %c1_38, %c0_39], %50 {strides = array<i32>} : memref<12x18x4xf32, #tpu.memory_space<vmem>>, vector<8x16x4xf32>,
    %c1_i32_40 = arith.constant 1 : i32
    %c0_i32_41 = arith.constant 0 : i32
    %c8_i32_42 = arith.constant 8 : i32
    %54 = arith.muli %c0_i32_41, %c8_i32_42 : i32
    %55 = tpu.assume_multiple %54, 8 : i32
    %c1_i32_43 = arith.constant 1 : i32
    %56 = arith.addi %55, %c1_i32_43 : i32
    %c0_i32_44 = arith.constant 0 : i32
    %57 = arith.addi %56, %c0_i32_44 : i32
    %58 = arith.index_cast %57 : i32 to index
    %c0_45 = arith.constant 0 : index
    %c0_46 = arith.constant 0 : index
    %59 = vector.load %arg12[%58, %c0_45, %c0_46] : memref<12x18x4xf32, #tpu.memory_space<vmem>>, vector<8x16x4xf32>
    %60 = vector.shape_cast %59 : vector<8x16x4xf32> to vector<128x4xf32>
    %c0_47 = arith.constant 0 : index
    %c0_48 = arith.constant 0 : index
    %c0_49 = arith.constant 0 : index
    %c0_50 = arith.constant 0 : index
    %61 = vector.load %arg7[%c0_47, %c0_48, %c0_49, %c0_50] : memref<3x3x4x4xf32, #tpu.memory_space<vmem>>, vector<1x1x4x4xf32>
    %62 = vector.shape_cast %61 : vector<1x1x4x4xf32> to vector<4x4xf32>
    %cst_51 = arith.constant dense<0.000000e+00> : vector<128x4xf32>
    %63 = tpu.matmul %60, %62, %cst_51 {dimension_numbers = #tpu.dot_dimension_numbers<[1], [0], [0], [1], [0, 0, 1, 1], [], []>} : vector<128x4xf32>, vector<4x4xf32>, vector<128x4xf32> -> vector<128x4xf32>
    %c1_i32_52 = arith.constant 1 : i32
    %64 = arith.addi %55, %c1_i32_52 : i32
    %c0_i32_53 = arith.constant 0 : i32
    %65 = arith.addi %64, %c0_i32_53 : i32
    %66 = arith.index_cast %65 : i32 to index
    %c1_54 = arith.constant 1 : index
    %c0_55 = arith.constant 0 : index
    %67 = vector.load %arg12[%66, %c1_54, %c0_55] : memref<12x18x4xf32, #tpu.memory_space<vmem>>, vector<8x16x4xf32>
    %68 = vector.shape_cast %67 : vector<8x16x4xf32> to vector<128x4xf32>
    %c0_56 = arith.constant 0 : index
    %c1_57 = arith.constant 1 : index
    %c0_58 = arith.constant 0 : index
    %c0_59 = arith.constant 0 : index
    %69 = vector.load %arg7[%c0_56, %c1_57, %c0_58, %c0_59] : memref<3x3x4x4xf32, #tpu.memory_space<vmem>>, vector<1x1x4x4xf32>
    %70 = vector.shape_cast %69 : vector<1x1x4x4xf32> to vector<4x4xf32>
    %cst_60 = arith.constant dense<0.000000e+00> : vector<128x4xf32>
    %71 = tpu.matmul %68, %70, %cst_60 {dimension_numbers = #tpu.dot_dimension_numbers<[1], [0], [0], [1], [0, 0, 1, 1], [], []>} : vector<128x4xf32>, vector<4x4xf32>, vector<128x4xf32> -> vector<128x4xf32>
    %72 = arith.addf %63, %71 : vector<128x4xf32>
    %c1_i32_61 = arith.constant 1 : i32
    %73 = arith.addi %55, %c1_i32_61 : i32
    %c0_i32_62 = arith.constant 0 : i32
    %74 = arith.addi %73, %c0_i32_62 : i32
    %75 = arith.index_cast %74 : i32 to index
    %c2 = arith.constant 2 : index
    %c0_63 = arith.constant 0 : index
    %76 = vector.load %arg12[%75, %c2, %c0_63] : memref<12x18x4xf32, #tpu.memory_space<vmem>>, vector<8x16x4xf32>
    %77 = vector.shape_cast %76 : vector<8x16x4xf32> to vector<128x4xf32>
    %c0_64 = arith.constant 0 : index
    %c2_65 = arith.constant 2 : index
    %c0_66 = arith.constant 0 : index
    %c0_67 = arith.constant 0 : index
    %78 = vector.load %arg7[%c0_64, %c2_65, %c0_66, %c0_67] : memref<3x3x4x4xf32, #tpu.memory_space<vmem>>, vector<1x1x4x4xf32>
    %79 = vector.shape_cast %78 : vector<1x1x4x4xf32> to vector<4x4xf32>
    %cst_68 = arith.constant dense<0.000000e+00> : vector<128x4xf32>
    %80 = tpu.matmul %77, %79, %cst_68 {dimension_numbers = #tpu.dot_dimension_numbers<[1], [0], [0], [1], [0, 0, 1, 1], [], []>} : vector<128x4xf32>, vector<4x4xf32>, vector<128x4xf32> -> vector<128x4xf32>
    %81 = arith.addf %72, %80 : vector<128x4xf32>
    %c1_i32_69 = arith.constant 1 : i32
    %82 = arith.addi %55, %c1_i32_69 : i32
    %c1_i32_70 = arith.constant 1 : i32
    %83 = arith.addi %82, %c1_i32_70 : i32
    %84 = arith.index_cast %83 : i32 to index
    %c0_71 = arith.constant 0 : index
    %c0_72 = arith.constant 0 : index
    %85 = vector.load %arg12[%84, %c0_71, %c0_72] : memref<12x18x4xf32, #tpu.memory_space<vmem>>, vector<8x16x4xf32>
    %86 = vector.shape_cast %85 : vector<8x16x4xf32> to vector<128x4xf32>
    %c1_73 = arith.constant 1 : index
    %c0_74 = arith.constant 0 : index
    %c0_75 = arith.constant 0 : index
    %c0_76 = arith.constant 0 : index
    %87 = vector.load %arg7[%c1_73, %c0_74, %c0_75, %c0_76] : memref<3x3x4x4xf32, #tpu.memory_space<vmem>>, vector<1x1x4x4xf32>
    %88 = vector.shape_cast %87 : vector<1x1x4x4xf32> to vector<4x4xf32>
    %cst_77 = arith.constant dense<0.000000e+00> : vector<128x4xf32>
    %89 = tpu.matmul %86, %88, %cst_77 {dimension_numbers = #tpu.dot_dimension_numbers<[1], [0], [0], [1], [0, 0, 1, 1], [], []>} : vector<128x4xf32>, vector<4x4xf32>, vector<128x4xf32> -> vector<128x4xf32>
    %90 = arith.addf %81, %89 : vector<128x4xf32>
    %c1_i32_78 = arith.constant 1 : i32
    %91 = arith.addi %55, %c1_i32_78 : i32
    %c1_i32_79 = arith.constant 1 : i32
    %92 = arith.addi %91, %c1_i32_79 : i32
    %93 = arith.index_cast %92 : i32 to index
    %c1_80 = arith.constant 1 : index
    %c0_81 = arith.constant 0 : index
    %94 = vector.load %arg12[%93, %c1_80, %c0_81] : memref<12x18x4xf32, #tpu.memory_space<vmem>>, vector<8x16x4xf32>
    %95 = vector.shape_cast %94 : vector<8x16x4xf32> to vector<128x4xf32>
    %c1_82 = arith.constant 1 : index
    %c1_83 = arith.constant 1 : index
    %c0_84 = arith.constant 0 : index
    %c0_85 = arith.constant 0 : index
    %96 = vector.load %arg7[%c1_82, %c1_83, %c0_84, %c0_85] : memref<3x3x4x4xf32, #tpu.memory_space<vmem>>, vector<1x1x4x4xf32>
    %97 = vector.shape_cast %96 : vector<1x1x4x4xf32> to vector<4x4xf32>
    %cst_86 = arith.constant dense<0.000000e+00> : vector<128x4xf32>
    %98 = tpu.matmul %95, %97, %cst_86 {dimension_numbers = #tpu.dot_dimension_numbers<[1], [0], [0], [1], [0, 0, 1, 1], [], []>} : vector<128x4xf32>, vector<4x4xf32>, vector<128x4xf32> -> vector<128x4xf32>
    %99 = arith.addf %90, %98 : vector<128x4xf32>
    %c1_i32_87 = arith.constant 1 : i32
    %100 = arith.addi %55, %c1_i32_87 : i32
    %c1_i32_88 = arith.constant 1 : i32
    %101 = arith.addi %100, %c1_i32_88 : i32
    %102 = arith.index_cast %101 : i32 to index
    %c2_89 = arith.constant 2 : index
    %c0_90 = arith.constant 0 : index
    %103 = vector.load %arg12[%102, %c2_89, %c0_90] : memref<12x18x4xf32, #tpu.memory_space<vmem>>, vector<8x16x4xf32>
    %104 = vector.shape_cast %103 : vector<8x16x4xf32> to vector<128x4xf32>
    %c1_91 = arith.constant 1 : index
    %c2_92 = arith.constant 2 : index
    %c0_93 = arith.constant 0 : index
    %c0_94 = arith.constant 0 : index
    %105 = vector.load %arg7[%c1_91, %c2_92, %c0_93, %c0_94] : memref<3x3x4x4xf32, #tpu.memory_space<vmem>>, vector<1x1x4x4xf32>
    %106 = vector.shape_cast %105 : vector<1x1x4x4xf32> to vector<4x4xf32>
    %cst_95 = arith.constant dense<0.000000e+00> : vector<128x4xf32>
    %107 = tpu.matmul %104, %106, %cst_95 {dimension_numbers = #tpu.dot_dimension_numbers<[1], [0], [0], [1], [0, 0, 1, 1], [], []>} : vector<128x4xf32>, vector<4x4xf32>, vector<128x4xf32> -> vector<128x4xf32>
    %108 = arith.addf %99, %107 : vector<128x4xf32>
    %c1_i32_96 = arith.constant 1 : i32
    %109 = arith.addi %55, %c1_i32_96 : i32
    %c2_i32_97 = arith.constant 2 : i32
    %110 = arith.addi %109, %c2_i32_97 : i32
    %111 = arith.index_cast %110 : i32 to index
    %c0_98 = arith.constant 0 : index
    %c0_99 = arith.constant 0 : index
    %112 = vector.load %arg12[%111, %c0_98, %c0_99] : memref<12x18x4xf32, #tpu.memory_space<vmem>>, vector<8x16x4xf32>
    %113 = vector.shape_cast %112 : vector<8x16x4xf32> to vector<128x4xf32>
    %c2_100 = arith.constant 2 : index
    %c0_101 = arith.constant 0 : index
    %c0_102 = arith.constant 0 : index
    %c0_103 = arith.constant 0 : index
    %114 = vector.load %arg7[%c2_100, %c0_101, %c0_102, %c0_103] : memref<3x3x4x4xf32, #tpu.memory_space<vmem>>, vector<1x1x4x4xf32>
    %115 = vector.shape_cast %114 : vector<1x1x4x4xf32> to vector<4x4xf32>
    %cst_104 = arith.constant dense<0.000000e+00> : vector<128x4xf32>
    %116 = tpu.matmul %113, %115, %cst_104 {dimension_numbers = #tpu.dot_dimension_numbers<[1], [0], [0], [1], [0, 0, 1, 1], [], []>} : vector<128x4xf32>, vector<4x4xf32>, vector<128x4xf32> -> vector<128x4xf32>
    %117 = arith.addf %108, %116 : vector<128x4xf32>
    %c1_i32_105 = arith.constant 1 : i32
    %118 = arith.addi %55, %c1_i32_105 : i32
    %c2_i32_106 = arith.constant 2 : i32
    %119 = arith.addi %118, %c2_i32_106 : i32
    %120 = arith.index_cast %119 : i32 to index
    %c1_107 = arith.constant 1 : index
    %c0_108 = arith.constant 0 : index
    %121 = vector.load %arg12[%120, %c1_107, %c0_108] : memref<12x18x4xf32, #tpu.memory_space<vmem>>, vector<8x16x4xf32>
    %122 = vector.shape_cast %121 : vector<8x16x4xf32> to vector<128x4xf32>
    %c2_109 = arith.constant 2 : index
    %c1_110 = arith.constant 1 : index
    %c0_111 = arith.constant 0 : index
    %c0_112 = arith.constant 0 : index
    %123 = vector.load %arg7[%c2_109, %c1_110, %c0_111, %c0_112] : memref<3x3x4x4xf32, #tpu.memory_space<vmem>>, vector<1x1x4x4xf32>
    %124 = vector.shape_cast %123 : vector<1x1x4x4xf32> to vector<4x4xf32>
    %cst_113 = arith.constant dense<0.000000e+00> : vector<128x4xf32>
    %125 = tpu.matmul %122, %124, %cst_113 {dimension_numbers = #tpu.dot_dimension_numbers<[1], [0], [0], [1], [0, 0, 1, 1], [], []>} : vector<128x4xf32>, vector<4x4xf32>, vector<128x4xf32> -> vector<128x4xf32>
    %126 = arith.addf %117, %125 : vector<128x4xf32>
    %c1_i32_114 = arith.constant 1 : i32
    %127 = arith.addi %55, %c1_i32_114 : i32
    %c2_i32_115 = arith.constant 2 : i32
    %128 = arith.addi %127, %c2_i32_115 : i32
    %129 = arith.index_cast %128 : i32 to index
    %c2_116 = arith.constant 2 : index
    %c0_117 = arith.constant 0 : index
    %130 = vector.load %arg12[%129, %c2_116, %c0_117] : memref<12x18x4xf32, #tpu.memory_space<vmem>>, vector<8x16x4xf32>
    %131 = vector.shape_cast %130 : vector<8x16x4xf32> to vector<128x4xf32>
    %c2_118 = arith.constant 2 : index
    %c2_119 = arith.constant 2 : index
    %c0_120 = arith.constant 0 : index
    %c0_121 = arith.constant 0 : index
    %132 = vector.load %arg7[%c2_118, %c2_119, %c0_120, %c0_121] : memref<3x3x4x4xf32, #tpu.memory_space<vmem>>, vector<1x1x4x4xf32>
    %133 = vector.shape_cast %132 : vector<1x1x4x4xf32> to vector<4x4xf32>
    %cst_122 = arith.constant dense<0.000000e+00> : vector<128x4xf32>
    %134 = tpu.matmul %131, %133, %cst_122 {dimension_numbers = #tpu.dot_dimension_numbers<[1], [0], [0], [1], [0, 0, 1, 1], [], []>} : vector<128x4xf32>, vector<4x4xf32>, vector<128x4xf32> -> vector<128x4xf32>
    %135 = arith.addf %126, %134 : vector<128x4xf32>
    %c0_123 = arith.constant 0 : index
    %c0_124 = arith.constant 0 : index
    %136 = vector.load %arg8[%c0_123, %c0_124] : memref<1x4xf32, #tpu.memory_space<vmem>>, vector<1x4xf32>
    %137 = vector.broadcast %136 : vector<1x4xf32> to vector<128x4xf32>
    %138 = arith.addf %135, %137 : vector<128x4xf32>
    %cst_125 = arith.constant 0.000000e+00 : f32
    %139 = vector.broadcast %cst_125 : f32 to vector<128x4xf32>
    %140 = arith.maximumf %138, %139 : vector<128x4xf32>
    %c0_126 = arith.constant 0 : index
    %c0_127 = arith.constant 0 : index
    %141 = vector.load %arg9[%c0_126, %c0_127] : memref<4x16xf32, #tpu.memory_space<vmem>>, vector<4x16xf32>
    %cst_128 = arith.constant dense<0.000000e+00> : vector<128x16xf32>
    %142 = tpu.matmul %140, %141, %cst_128 {dimension_numbers = #tpu.dot_dimension_numbers<[1], [0], [0], [1], [0, 0, 1, 1], [], []>} : vector<128x4xf32>, vector<4x16xf32>, vector<128x16xf32> -> vector<128x16xf32>
    %c0_129 = arith.constant 0 : index
    %143 = arith.index_cast %55 : i32 to index
    %c0_130 = arith.constant 0 : index
    %c0_131 = arith.constant 0 : index
    %144 = vector.load %arg3[%c0_129, %143, %c0_130, %c0_131] : memref<1x8x16x16xf32, #tpu.memory_space<vmem>>, vector<1x8x16x16xf32>
    %145 = vector.shape_cast %144 : vector<1x8x16x16xf32> to vector<8x16x16xf32>
    %146 = vector.shape_cast %145 : vector<8x16x16xf32> to vector<128x16xf32>
    %c0_132 = arith.constant 0 : index
    %c0_133 = arith.constant 0 : index
    %147 = vector.load %arg10[%c0_132, %c0_133] : memref<1x16xf32, #tpu.memory_space<vmem>>, vector<1x16xf32>
    %148 = vector.broadcast %147 : vector<1x16xf32> to vector<128x16xf32>
    %149 = arith.addf %142, %148 : vector<128x16xf32>
    %150 = arith.addf %149, %146 : vector<128x16xf32>
    %cst_134 = arith.constant 0.000000e+00 : f32
    %151 = vector.broadcast %cst_134 : f32 to vector<128x16xf32>
    %152 = arith.maximumf %150, %151 : vector<128x16xf32>
    %153 = vector.shape_cast %152 : vector<128x16xf32> to vector<8x16x16xf32>
    %c0_135 = arith.constant 0 : index
    %154 = arith.index_cast %55 : i32 to index
    %c0_136 = arith.constant 0 : index
    %c0_137 = arith.constant 0 : index
    %155 = vector.load %arg11[%c0_135, %154, %c0_136, %c0_137] : memref<1x8x16x16xf32, #tpu.memory_space<vmem>>, vector<1x8x16x16xf32>
    %156 = vector.shape_cast %155 : vector<1x8x16x16xf32> to vector<8x16x16xf32>
    %157 = vector.shape_cast %153 : vector<8x16x16xf32> to vector<1x8x16x16xf32>
    tpu.vector_store %arg11[%c0_135, %154, %c0_136, %c0_137], %157 {strides = array<i32>} : memref<1x8x16x16xf32, #tpu.memory_space<vmem>>, vector<1x8x16x16xf32>,
    %c1_i32_138 = arith.constant 1 : i32
    return
  }
  func.func @transform_0(%arg0: i32, %arg1: i32) -> (i32, i32, i32, i32) {
    %c4_i32 = arith.constant 4 : i32
    %0 = arith.muli %arg1, %c4_i32 : i32
    %c1_i32 = arith.constant 1 : i32
    %1 = arith.subi %0, %c1_i32 : i32
    %c0_i32 = arith.constant 0 : i32
    %2 = arith.maxsi %1, %c0_i32 : i32
    %c0_i32_0 = arith.constant 0 : i32
    %c0_i32_1 = arith.constant 0 : i32
    %c0_i32_2 = arith.constant 0 : i32
    return %arg0, %2, %c0_i32_0, %c0_i32_1 : i32, i32, i32, i32
  }
  func.func @transform_1(%arg0: i32, %arg1: i32) -> (i32, i32, i32, i32) {
    %c0_i32 = arith.constant 0 : i32
    %c0_i32_0 = arith.constant 0 : i32
    %c0_i32_1 = arith.constant 0 : i32
    return %arg0, %arg1, %c0_i32, %c0_i32_0 : i32, i32, i32, i32
  }
  func.func @transform_2(%arg0: i32, %arg1: i32) -> (i32, i32, i32, i32) {
    %c1_i32 = arith.constant 1 : i32
    %0 = arith.addi %arg1, %c1_i32 : i32
    %c4_i32 = arith.constant 4 : i32
    %1 = arith.muli %0, %c4_i32 : i32
    %c7_i32 = arith.constant 7 : i32
    %2 = arith.minsi %1, %c7_i32 : i32
    %c0_i32 = arith.constant 0 : i32
    %c0_i32_0 = arith.constant 0 : i32
    %c0_i32_1 = arith.constant 0 : i32
    return %arg0, %2, %c0_i32, %c0_i32_0 : i32, i32, i32, i32
  }
  func.func @transform_3(%arg0: i32, %arg1: i32) -> (i32, i32) {
    %c0_i32 = arith.constant 0 : i32
    %c0_i32_0 = arith.constant 0 : i32
    %c0_i32_1 = arith.constant 0 : i32
    return %c0_i32, %c0_i32_0 : i32, i32
  }
  func.func @transform_4(%arg0: i32, %arg1: i32) -> (i32, i32) {
    %c0_i32 = arith.constant 0 : i32
    %c0_i32_0 = arith.constant 0 : i32
    %c0_i32_1 = arith.constant 0 : i32
    return %c0_i32, %c0_i32_0 : i32, i32
  }
  func.func @transform_5(%arg0: i32, %arg1: i32) -> (i32, i32, i32, i32) {
    %c0_i32 = arith.constant 0 : i32
    %c0_i32_0 = arith.constant 0 : i32
    %c0_i32_1 = arith.constant 0 : i32
    %c0_i32_2 = arith.constant 0 : i32
    %c0_i32_3 = arith.constant 0 : i32
    return %c0_i32, %c0_i32_0, %c0_i32_1, %c0_i32_2 : i32, i32, i32, i32
  }
  func.func @transform_6(%arg0: i32, %arg1: i32) -> (i32, i32) {
    %c0_i32 = arith.constant 0 : i32
    %c0_i32_0 = arith.constant 0 : i32
    %c0_i32_1 = arith.constant 0 : i32
    return %c0_i32, %c0_i32_0 : i32, i32
  }
  func.func @transform_7(%arg0: i32, %arg1: i32) -> (i32, i32) {
    %c0_i32 = arith.constant 0 : i32
    %c0_i32_0 = arith.constant 0 : i32
    %c0_i32_1 = arith.constant 0 : i32
    return %c0_i32, %c0_i32_0 : i32, i32
  }
  func.func @transform_8(%arg0: i32, %arg1: i32) -> (i32, i32) {
    %c0_i32 = arith.constant 0 : i32
    %c0_i32_0 = arith.constant 0 : i32
    %c0_i32_1 = arith.constant 0 : i32
    return %c0_i32, %c0_i32_0 : i32, i32
  }
  func.func @transform_9(%arg0: i32, %arg1: i32) -> (i32, i32, i32, i32) {
    %c0_i32 = arith.constant 0 : i32
    %c0_i32_0 = arith.constant 0 : i32
    %c0_i32_1 = arith.constant 0 : i32
    return %arg0, %arg1, %c0_i32, %c0_i32_0 : i32, i32, i32, i32
  }
}

module attributes {stable_mosaic.version = 11 : i64} {
  func.func @_bottleneck_fused_kernel(%arg0: i32, %arg1: i32, %arg2: memref<1x2x16x16xf32, #tpu.memory_space<vmem>>, %arg3: memref<1x8x16x16xf32, #tpu.memory_space<vmem>>, %arg4: memref<1x2x16x16xf32, #tpu.memory_space<vmem>>, %arg5: memref<16x4xf32, #tpu.memory_space<vmem>>, %arg6: memref<1x4xf32, #tpu.memory_space<vmem>>, %arg7: memref<3x3x4x4xf32, #tpu.memory_space<vmem>>, %arg8: memref<1x4xf32, #tpu.memory_space<vmem>>, %arg9: memref<4x16xf32, #tpu.memory_space<vmem>>, %arg10: memref<1x16xf32, #tpu.memory_space<vmem>>, %arg11: memref<1x8x16x16xf32, #tpu.memory_space<vmem>>, %arg12: memref<12x18x4xf32, #tpu.memory_space<vmem>>) attributes {dimension_semantics = [#tpu.dimension_semantics<parallel>, #tpu.dimension_semantics<parallel>], iteration_bounds = array<i64: 2, 2>, scalar_prefetch = 0 : i64, scratch_operands = 1 : i64, tpu.core_type = #tpu.core_type<tc>, window_params = [{transform_indices = @transform_0, window_bounds = array<i64: 1, 2, 16, 16>}, {transform_indices = @transform_1, window_bounds = array<i64: 1, 8, 16, 16>}, {transform_indices = @transform_2, window_bounds = array<i64: 1, 2, 16, 16>}, {pipeline_mode = #tpu.pipeline_mode<synchronous>, transform_indices = @transform_3, window_bounds = array<i64: 16, 4>}, {pipeline_mode = #tpu.pipeline_mode<synchronous>, transform_indices = @transform_4, window_bounds = array<i64: 1, 4>}, {pipeline_mode = #tpu.pipeline_mode<synchronous>, transform_indices = @transform_5, window_bounds = array<i64: 3, 3, 4, 4>}, {pipeline_mode = #tpu.pipeline_mode<synchronous>, transform_indices = @transform_6, window_bounds = array<i64: 1, 4>}, {pipeline_mode = #tpu.pipeline_mode<synchronous>, transform_indices = @transform_7, window_bounds = array<i64: 4, 16>}, {pipeline_mode = #tpu.pipeline_mode<synchronous>, transform_indices = @transform_8, window_bounds = array<i64: 1, 16>}, {transform_indices = @transform_9, window_bounds = array<i64: 1, 8, 16, 16>}]} {
    %cst = arith.constant 0.000000e+00 : f32
    %0 = vector.broadcast %cst : f32 to vector<12x1x4xf32>
    %c0 = arith.constant 0 : index
    %c0_0 = arith.constant 0 : index
    %c0_1 = arith.constant 0 : index
    %1 = vector.load %arg12[%c0, %c0_0, %c0_1] : memref<12x18x4xf32, #tpu.memory_space<vmem>>, vector<12x1x4xf32>
    tpu.vector_store %arg12[%c0, %c0_0, %c0_1], %0 {strides = array<i32>} : memref<12x18x4xf32, #tpu.memory_space<vmem>>, vector<12x1x4xf32>,
    %c0_2 = arith.constant 0 : index
    %c17 = arith.constant 17 : index
    %c0_3 = arith.constant 0 : index
    %2 = vector.load %arg12[%c0_2, %c17, %c0_3] : memref<12x18x4xf32, #tpu.memory_space<vmem>>, vector<12x1x4xf32>
    tpu.vector_store %arg12[%c0_2, %c17, %c0_3], %0 {strides = array<i32>} : memref<12x18x4xf32, #tpu.memory_space<vmem>>, vector<12x1x4xf32>,
    %c0_i32 = arith.constant 0 : i32
    %3 = arith.cmpi sgt, %arg1, %c0_i32 : i32
    %4 = arith.extui %3 : i1 to i32
    %5 = arith.sitofp %4 : i32 to f32
    %c0_4 = arith.constant 0 : index
    %c0_5 = arith.constant 0 : index
    %c0_6 = arith.constant 0 : index
    %c0_7 = arith.constant 0 : index
    %6 = vector.load %arg2[%c0_4, %c0_5, %c0_6, %c0_7] : memref<1x2x16x16xf32, #tpu.memory_space<vmem>>, vector<1x2x16x16xf32>
    %7 = vector.shape_cast %6 : vector<1x2x16x16xf32> to vector<2x16x16xf32>
    %8 = vector.shape_cast %7 : vector<2x16x16xf32> to vector<32x16xf32>
    %c0_8 = arith.constant 0 : index
    %c0_9 = arith.constant 0 : index
    %9 = vector.load %arg5[%c0_8, %c0_9] : memref<16x4xf32, #tpu.memory_space<vmem>>, vector<16x4xf32>
    %cst_10 = arith.constant dense<0.000000e+00> : vector<32x4xf32>
    %10 = tpu.matmul %8, %9, %cst_10 {dimension_numbers = #tpu.dot_dimension_numbers<[1], [0], [0], [1], [0, 0, 1, 1], [], []>} : vector<32x16xf32>, vector<16x4xf32>, vector<32x4xf32> -> vector<32x4xf32>
    %c0_11 = arith.constant 0 : index
    %c0_12 = arith.constant 0 : index
    %11 = vector.load %arg6[%c0_11, %c0_12] : memref<1x4xf32, #tpu.memory_space<vmem>>, vector<1x4xf32>
    %12 = vector.broadcast %11 : vector<1x4xf32> to vector<32x4xf32>
    %13 = arith.addf %10, %12 : vector<32x4xf32>
    %cst_13 = arith.constant 0.000000e+00 : f32
    %14 = vector.broadcast %cst_13 : f32 to vector<32x4xf32>
    %15 = arith.maximumf %13, %14 : vector<32x4xf32>
    %16 = vector.broadcast %5 : f32 to vector<32x4xf32>
    %17 = arith.mulf %15, %16 : vector<32x4xf32>
    %18 = vector.shape_cast %17 : vector<32x4xf32> to vector<2x16x4xf32>
    %c0_14 = arith.constant 0 : index
    %c1 = arith.constant 1 : index
    %c0_15 = arith.constant 0 : index
    %19 = vector.load %arg12[%c0_14, %c1, %c0_15] : memref<12x18x4xf32, #tpu.memory_space<vmem>>, vector<2x16x4xf32>
    tpu.vector_store %arg12[%c0_14, %c1, %c0_15], %18 {strides = array<i32>} : memref<12x18x4xf32, #tpu.memory_space<vmem>>, vector<2x16x4xf32>,
    %c1_i32 = arith.constant 1 : i32
    %20 = arith.cmpi slt, %arg1, %c1_i32 : i32
    %21 = arith.extui %20 : i1 to i32
    %22 = arith.sitofp %21 : i32 to f32
    %c0_16 = arith.constant 0 : index
    %c0_17 = arith.constant 0 : index
    %c0_18 = arith.constant 0 : index
    %c0_19 = arith.constant 0 : index
    %23 = vector.load %arg4[%c0_16, %c0_17, %c0_18, %c0_19] : memref<1x2x16x16xf32, #tpu.memory_space<vmem>>, vector<1x2x16x16xf32>
    %24 = vector.shape_cast %23 : vector<1x2x16x16xf32> to vector<2x16x16xf32>
    %25 = vector.shape_cast %24 : vector<2x16x16xf32> to vector<32x16xf32>
    %c0_20 = arith.constant 0 : index
    %c0_21 = arith.constant 0 : index
    %26 = vector.load %arg5[%c0_20, %c0_21] : memref<16x4xf32, #tpu.memory_space<vmem>>, vector<16x4xf32>
    %cst_22 = arith.constant dense<0.000000e+00> : vector<32x4xf32>
    %27 = tpu.matmul %25, %26, %cst_22 {dimension_numbers = #tpu.dot_dimension_numbers<[1], [0], [0], [1], [0, 0, 1, 1], [], []>} : vector<32x16xf32>, vector<16x4xf32>, vector<32x4xf32> -> vector<32x4xf32>
    %c0_23 = arith.constant 0 : index
    %c0_24 = arith.constant 0 : index
    %28 = vector.load %arg6[%c0_23, %c0_24] : memref<1x4xf32, #tpu.memory_space<vmem>>, vector<1x4xf32>
    %29 = vector.broadcast %28 : vector<1x4xf32> to vector<32x4xf32>
    %30 = arith.addf %27, %29 : vector<32x4xf32>
    %cst_25 = arith.constant 0.000000e+00 : f32
    %31 = vector.broadcast %cst_25 : f32 to vector<32x4xf32>
    %32 = arith.maximumf %30, %31 : vector<32x4xf32>
    %33 = vector.broadcast %22 : f32 to vector<32x4xf32>
    %34 = arith.mulf %32, %33 : vector<32x4xf32>
    %35 = vector.shape_cast %34 : vector<32x4xf32> to vector<2x16x4xf32>
    %c10 = arith.constant 10 : index
    %c1_26 = arith.constant 1 : index
    %c0_27 = arith.constant 0 : index
    %36 = vector.load %arg12[%c10, %c1_26, %c0_27] : memref<12x18x4xf32, #tpu.memory_space<vmem>>, vector<2x16x4xf32>
    tpu.vector_store %arg12[%c10, %c1_26, %c0_27], %35 {strides = array<i32>} : memref<12x18x4xf32, #tpu.memory_space<vmem>>, vector<2x16x4xf32>,
    %c0_i32_28 = arith.constant 0 : i32
    %c8_i32 = arith.constant 8 : i32
    %37 = arith.muli %c0_i32_28, %c8_i32 : i32
    %38 = tpu.assume_multiple %37, 8 : i32
    %c0_29 = arith.constant 0 : index
    %39 = arith.index_cast %38 : i32 to index
    %c0_30 = arith.constant 0 : index
    %c0_31 = arith.constant 0 : index
    %40 = vector.load %arg3[%c0_29, %39, %c0_30, %c0_31] : memref<1x8x16x16xf32, #tpu.memory_space<vmem>>, vector<1x8x16x16xf32>
    %41 = vector.shape_cast %40 : vector<1x8x16x16xf32> to vector<8x16x16xf32>
    %42 = vector.shape_cast %41 : vector<8x16x16xf32> to vector<128x16xf32>
    %c0_32 = arith.constant 0 : index
    %c0_33 = arith.constant 0 : index
    %43 = vector.load %arg5[%c0_32, %c0_33] : memref<16x4xf32, #tpu.memory_space<vmem>>, vector<16x4xf32>
    %cst_34 = arith.constant dense<0.000000e+00> : vector<128x4xf32>
    %44 = tpu.matmul %42, %43, %cst_34 {dimension_numbers = #tpu.dot_dimension_numbers<[1], [0], [0], [1], [0, 0, 1, 1], [], []>} : vector<128x16xf32>, vector<16x4xf32>, vector<128x4xf32> -> vector<128x4xf32>
    %c0_35 = arith.constant 0 : index
    %c0_36 = arith.constant 0 : index
    %45 = vector.load %arg6[%c0_35, %c0_36] : memref<1x4xf32, #tpu.memory_space<vmem>>, vector<1x4xf32>
    %46 = vector.broadcast %45 : vector<1x4xf32> to vector<128x4xf32>
    %47 = arith.addf %44, %46 : vector<128x4xf32>
    %cst_37 = arith.constant 0.000000e+00 : f32
    %48 = vector.broadcast %cst_37 : f32 to vector<128x4xf32>
    %49 = arith.maximumf %47, %48 : vector<128x4xf32>
    %50 = vector.shape_cast %49 : vector<128x4xf32> to vector<8x16x4xf32>
    %c2_i32 = arith.constant 2 : i32
    %51 = arith.addi %c2_i32, %38 : i32
    %52 = arith.index_cast %51 : i32 to index
    %c1_38 = arith.constant 1 : index
    %c0_39 = arith.constant 0 : index
    %53 = vector.load %arg12[%52, %c1_38, %c0_39] : memref<12x18x4xf32, #tpu.memory_space<vmem>>, vector<8x16x4xf32>
    tpu.vector_store %arg12[%52, %c1_38, %c0_39], %50 {strides = array<i32>} : memref<12x18x4xf32, #tpu.memory_space<vmem>>, vector<8x16x4xf32>,
    %c1_i32_40 = arith.constant 1 : i32
    %c0_i32_41 = arith.constant 0 : i32
    %c8_i32_42 = arith.constant 8 : i32
    %54 = arith.muli %c0_i32_41, %c8_i32_42 : i32
    %55 = tpu.assume_multiple %54, 8 : i32
    %c1_i32_43 = arith.constant 1 : i32
    %56 = arith.addi %55, %c1_i32_43 : i32
    %c0_i32_44 = arith.constant 0 : i32
    %57 = arith.addi %56, %c0_i32_44 : i32
    %58 = arith.index_cast %57 : i32 to index
    %c0_45 = arith.constant 0 : index
    %c0_46 = arith.constant 0 : index
    %59 = vector.load %arg12[%58, %c0_45, %c0_46] : memref<12x18x4xf32, #tpu.memory_space<vmem>>, vector<8x16x4xf32>
    %60 = vector.shape_cast %59 : vector<8x16x4xf32> to vector<128x4xf32>
    %c0_47 = arith.constant 0 : index
    %c0_48 = arith.constant 0 : index
    %c0_49 = arith.constant 0 : index
    %c0_50 = arith.constant 0 : index
    %61 = vector.load %arg7[%c0_47, %c0_48, %c0_49, %c0_50] : memref<3x3x4x4xf32, #tpu.memory_space<vmem>>, vector<1x1x4x4xf32>
    %62 = vector.shape_cast %61 : vector<1x1x4x4xf32> to vector<4x4xf32>
    %cst_51 = arith.constant dense<0.000000e+00> : vector<128x4xf32>
    %63 = tpu.matmul %60, %62, %cst_51 {dimension_numbers = #tpu.dot_dimension_numbers<[1], [0], [0], [1], [0, 0, 1, 1], [], []>} : vector<128x4xf32>, vector<4x4xf32>, vector<128x4xf32> -> vector<128x4xf32>
    %c1_i32_52 = arith.constant 1 : i32
    %64 = arith.addi %55, %c1_i32_52 : i32
    %c0_i32_53 = arith.constant 0 : i32
    %65 = arith.addi %64, %c0_i32_53 : i32
    %66 = arith.index_cast %65 : i32 to index
    %c1_54 = arith.constant 1 : index
    %c0_55 = arith.constant 0 : index
    %67 = vector.load %arg12[%66, %c1_54, %c0_55] : memref<12x18x4xf32, #tpu.memory_space<vmem>>, vector<8x16x4xf32>
    %68 = vector.shape_cast %67 : vector<8x16x4xf32> to vector<128x4xf32>
    %c0_56 = arith.constant 0 : index
    %c1_57 = arith.constant 1 : index
    %c0_58 = arith.constant 0 : index
    %c0_59 = arith.constant 0 : index
    %69 = vector.load %arg7[%c0_56, %c1_57, %c0_58, %c0_59] : memref<3x3x4x4xf32, #tpu.memory_space<vmem>>, vector<1x1x4x4xf32>
    %70 = vector.shape_cast %69 : vector<1x1x4x4xf32> to vector<4x4xf32>
    %cst_60 = arith.constant dense<0.000000e+00> : vector<128x4xf32>
    %71 = tpu.matmul %68, %70, %cst_60 {dimension_numbers = #tpu.dot_dimension_numbers<[1], [0], [0], [1], [0, 0, 1, 1], [], []>} : vector<128x4xf32>, vector<4x4xf32>, vector<128x4xf32> -> vector<128x4xf32>
    %72 = arith.addf %63, %71 : vector<128x4xf32>
    %c1_i32_61 = arith.constant 1 : i32
    %73 = arith.addi %55, %c1_i32_61 : i32
    %c0_i32_62 = arith.constant 0 : i32
    %74 = arith.addi %73, %c0_i32_62 : i32
    %75 = arith.index_cast %74 : i32 to index
    %c2 = arith.constant 2 : index
    %c0_63 = arith.constant 0 : index
    %76 = vector.load %arg12[%75, %c2, %c0_63] : memref<12x18x4xf32, #tpu.memory_space<vmem>>, vector<8x16x4xf32>
    %77 = vector.shape_cast %76 : vector<8x16x4xf32> to vector<128x4xf32>
    %c0_64 = arith.constant 0 : index
    %c2_65 = arith.constant 2 : index
    %c0_66 = arith.constant 0 : index
    %c0_67 = arith.constant 0 : index
    %78 = vector.load %arg7[%c0_64, %c2_65, %c0_66, %c0_67] : memref<3x3x4x4xf32, #tpu.memory_space<vmem>>, vector<1x1x4x4xf32>
    %79 = vector.shape_cast %78 : vector<1x1x4x4xf32> to vector<4x4xf32>
    %cst_68 = arith.constant dense<0.000000e+00> : vector<128x4xf32>
    %80 = tpu.matmul %77, %79, %cst_68 {dimension_numbers = #tpu.dot_dimension_numbers<[1], [0], [0], [1], [0, 0, 1, 1], [], []>} : vector<128x4xf32>, vector<4x4xf32>, vector<128x4xf32> -> vector<128x4xf32>
    %81 = arith.addf %72, %80 : vector<128x4xf32>
    %c1_i32_69 = arith.constant 1 : i32
    %82 = arith.addi %55, %c1_i32_69 : i32
    %c1_i32_70 = arith.constant 1 : i32
    %83 = arith.addi %82, %c1_i32_70 : i32
    %84 = arith.index_cast %83 : i32 to index
    %c0_71 = arith.constant 0 : index
    %c0_72 = arith.constant 0 : index
    %85 = vector.load %arg12[%84, %c0_71, %c0_72] : memref<12x18x4xf32, #tpu.memory_space<vmem>>, vector<8x16x4xf32>
    %86 = vector.shape_cast %85 : vector<8x16x4xf32> to vector<128x4xf32>
    %c1_73 = arith.constant 1 : index
    %c0_74 = arith.constant 0 : index
    %c0_75 = arith.constant 0 : index
    %c0_76 = arith.constant 0 : index
    %87 = vector.load %arg7[%c1_73, %c0_74, %c0_75, %c0_76] : memref<3x3x4x4xf32, #tpu.memory_space<vmem>>, vector<1x1x4x4xf32>
    %88 = vector.shape_cast %87 : vector<1x1x4x4xf32> to vector<4x4xf32>
    %cst_77 = arith.constant dense<0.000000e+00> : vector<128x4xf32>
    %89 = tpu.matmul %86, %88, %cst_77 {dimension_numbers = #tpu.dot_dimension_numbers<[1], [0], [0], [1], [0, 0, 1, 1], [], []>} : vector<128x4xf32>, vector<4x4xf32>, vector<128x4xf32> -> vector<128x4xf32>
    %90 = arith.addf %81, %89 : vector<128x4xf32>
    %c1_i32_78 = arith.constant 1 : i32
    %91 = arith.addi %55, %c1_i32_78 : i32
    %c1_i32_79 = arith.constant 1 : i32
    %92 = arith.addi %91, %c1_i32_79 : i32
    %93 = arith.index_cast %92 : i32 to index
    %c1_80 = arith.constant 1 : index
    %c0_81 = arith.constant 0 : index
    %94 = vector.load %arg12[%93, %c1_80, %c0_81] : memref<12x18x4xf32, #tpu.memory_space<vmem>>, vector<8x16x4xf32>
    %95 = vector.shape_cast %94 : vector<8x16x4xf32> to vector<128x4xf32>
    %c1_82 = arith.constant 1 : index
    %c1_83 = arith.constant 1 : index
    %c0_84 = arith.constant 0 : index
    %c0_85 = arith.constant 0 : index
    %96 = vector.load %arg7[%c1_82, %c1_83, %c0_84, %c0_85] : memref<3x3x4x4xf32, #tpu.memory_space<vmem>>, vector<1x1x4x4xf32>
    %97 = vector.shape_cast %96 : vector<1x1x4x4xf32> to vector<4x4xf32>
    %cst_86 = arith.constant dense<0.000000e+00> : vector<128x4xf32>
    %98 = tpu.matmul %95, %97, %cst_86 {dimension_numbers = #tpu.dot_dimension_numbers<[1], [0], [0], [1], [0, 0, 1, 1], [], []>} : vector<128x4xf32>, vector<4x4xf32>, vector<128x4xf32> -> vector<128x4xf32>
    %99 = arith.addf %90, %98 : vector<128x4xf32>
    %c1_i32_87 = arith.constant 1 : i32
    %100 = arith.addi %55, %c1_i32_87 : i32
    %c1_i32_88 = arith.constant 1 : i32
    %101 = arith.addi %100, %c1_i32_88 : i32
    %102 = arith.index_cast %101 : i32 to index
    %c2_89 = arith.constant 2 : index
    %c0_90 = arith.constant 0 : index
    %103 = vector.load %arg12[%102, %c2_89, %c0_90] : memref<12x18x4xf32, #tpu.memory_space<vmem>>, vector<8x16x4xf32>
    %104 = vector.shape_cast %103 : vector<8x16x4xf32> to vector<128x4xf32>
    %c1_91 = arith.constant 1 : index
    %c2_92 = arith.constant 2 : index
    %c0_93 = arith.constant 0 : index
    %c0_94 = arith.constant 0 : index
    %105 = vector.load %arg7[%c1_91, %c2_92, %c0_93, %c0_94] : memref<3x3x4x4xf32, #tpu.memory_space<vmem>>, vector<1x1x4x4xf32>
    %106 = vector.shape_cast %105 : vector<1x1x4x4xf32> to vector<4x4xf32>
    %cst_95 = arith.constant dense<0.000000e+00> : vector<128x4xf32>
    %107 = tpu.matmul %104, %106, %cst_95 {dimension_numbers = #tpu.dot_dimension_numbers<[1], [0], [0], [1], [0, 0, 1, 1], [], []>} : vector<128x4xf32>, vector<4x4xf32>, vector<128x4xf32> -> vector<128x4xf32>
    %108 = arith.addf %99, %107 : vector<128x4xf32>
    %c1_i32_96 = arith.constant 1 : i32
    %109 = arith.addi %55, %c1_i32_96 : i32
    %c2_i32_97 = arith.constant 2 : i32
    %110 = arith.addi %109, %c2_i32_97 : i32
    %111 = arith.index_cast %110 : i32 to index
    %c0_98 = arith.constant 0 : index
    %c0_99 = arith.constant 0 : index
    %112 = vector.load %arg12[%111, %c0_98, %c0_99] : memref<12x18x4xf32, #tpu.memory_space<vmem>>, vector<8x16x4xf32>
    %113 = vector.shape_cast %112 : vector<8x16x4xf32> to vector<128x4xf32>
    %c2_100 = arith.constant 2 : index
    %c0_101 = arith.constant 0 : index
    %c0_102 = arith.constant 0 : index
    %c0_103 = arith.constant 0 : index
    %114 = vector.load %arg7[%c2_100, %c0_101, %c0_102, %c0_103] : memref<3x3x4x4xf32, #tpu.memory_space<vmem>>, vector<1x1x4x4xf32>
    %115 = vector.shape_cast %114 : vector<1x1x4x4xf32> to vector<4x4xf32>
    %cst_104 = arith.constant dense<0.000000e+00> : vector<128x4xf32>
    %116 = tpu.matmul %113, %115, %cst_104 {dimension_numbers = #tpu.dot_dimension_numbers<[1], [0], [0], [1], [0, 0, 1, 1], [], []>} : vector<128x4xf32>, vector<4x4xf32>, vector<128x4xf32> -> vector<128x4xf32>
    %117 = arith.addf %108, %116 : vector<128x4xf32>
    %c1_i32_105 = arith.constant 1 : i32
    %118 = arith.addi %55, %c1_i32_105 : i32
    %c2_i32_106 = arith.constant 2 : i32
    %119 = arith.addi %118, %c2_i32_106 : i32
    %120 = arith.index_cast %119 : i32 to index
    %c1_107 = arith.constant 1 : index
    %c0_108 = arith.constant 0 : index
    %121 = vector.load %arg12[%120, %c1_107, %c0_108] : memref<12x18x4xf32, #tpu.memory_space<vmem>>, vector<8x16x4xf32>
    %122 = vector.shape_cast %121 : vector<8x16x4xf32> to vector<128x4xf32>
    %c2_109 = arith.constant 2 : index
    %c1_110 = arith.constant 1 : index
    %c0_111 = arith.constant 0 : index
    %c0_112 = arith.constant 0 : index
    %123 = vector.load %arg7[%c2_109, %c1_110, %c0_111, %c0_112] : memref<3x3x4x4xf32, #tpu.memory_space<vmem>>, vector<1x1x4x4xf32>
    %124 = vector.shape_cast %123 : vector<1x1x4x4xf32> to vector<4x4xf32>
    %cst_113 = arith.constant dense<0.000000e+00> : vector<128x4xf32>
    %125 = tpu.matmul %122, %124, %cst_113 {dimension_numbers = #tpu.dot_dimension_numbers<[1], [0], [0], [1], [0, 0, 1, 1], [], []>} : vector<128x4xf32>, vector<4x4xf32>, vector<128x4xf32> -> vector<128x4xf32>
    %126 = arith.addf %117, %125 : vector<128x4xf32>
    %c1_i32_114 = arith.constant 1 : i32
    %127 = arith.addi %55, %c1_i32_114 : i32
    %c2_i32_115 = arith.constant 2 : i32
    %128 = arith.addi %127, %c2_i32_115 : i32
    %129 = arith.index_cast %128 : i32 to index
    %c2_116 = arith.constant 2 : index
    %c0_117 = arith.constant 0 : index
    %130 = vector.load %arg12[%129, %c2_116, %c0_117] : memref<12x18x4xf32, #tpu.memory_space<vmem>>, vector<8x16x4xf32>
    %131 = vector.shape_cast %130 : vector<8x16x4xf32> to vector<128x4xf32>
    %c2_118 = arith.constant 2 : index
    %c2_119 = arith.constant 2 : index
    %c0_120 = arith.constant 0 : index
    %c0_121 = arith.constant 0 : index
    %132 = vector.load %arg7[%c2_118, %c2_119, %c0_120, %c0_121] : memref<3x3x4x4xf32, #tpu.memory_space<vmem>>, vector<1x1x4x4xf32>
    %133 = vector.shape_cast %132 : vector<1x1x4x4xf32> to vector<4x4xf32>
    %cst_122 = arith.constant dense<0.000000e+00> : vector<128x4xf32>
    %134 = tpu.matmul %131, %133, %cst_122 {dimension_numbers = #tpu.dot_dimension_numbers<[1], [0], [0], [1], [0, 0, 1, 1], [], []>} : vector<128x4xf32>, vector<4x4xf32>, vector<128x4xf32> -> vector<128x4xf32>
    %135 = arith.addf %126, %134 : vector<128x4xf32>
    %c0_123 = arith.constant 0 : index
    %c0_124 = arith.constant 0 : index
    %136 = vector.load %arg8[%c0_123, %c0_124] : memref<1x4xf32, #tpu.memory_space<vmem>>, vector<1x4xf32>
    %137 = vector.broadcast %136 : vector<1x4xf32> to vector<128x4xf32>
    %138 = arith.addf %135, %137 : vector<128x4xf32>
    %cst_125 = arith.constant 0.000000e+00 : f32
    %139 = vector.broadcast %cst_125 : f32 to vector<128x4xf32>
    %140 = arith.maximumf %138, %139 : vector<128x4xf32>
    %c0_126 = arith.constant 0 : index
    %c0_127 = arith.constant 0 : index
    %141 = vector.load %arg9[%c0_126, %c0_127] : memref<4x16xf32, #tpu.memory_space<vmem>>, vector<4x16xf32>
    %cst_128 = arith.constant dense<0.000000e+00> : vector<128x16xf32>
    %142 = tpu.matmul %140, %141, %cst_128 {dimension_numbers = #tpu.dot_dimension_numbers<[1], [0], [0], [1], [0, 0, 1, 1], [], []>} : vector<128x4xf32>, vector<4x16xf32>, vector<128x16xf32> -> vector<128x16xf32>
    %c0_129 = arith.constant 0 : index
    %143 = arith.index_cast %55 : i32 to index
    %c0_130 = arith.constant 0 : index
    %c0_131 = arith.constant 0 : index
    %144 = vector.load %arg3[%c0_129, %143, %c0_130, %c0_131] : memref<1x8x16x16xf32, #tpu.memory_space<vmem>>, vector<1x8x16x16xf32>
    %145 = vector.shape_cast %144 : vector<1x8x16x16xf32> to vector<8x16x16xf32>
    %146 = vector.shape_cast %145 : vector<8x16x16xf32> to vector<128x16xf32>
    %c0_132 = arith.constant 0 : index
    %c0_133 = arith.constant 0 : index
    %147 = vector.load %arg10[%c0_132, %c0_133] : memref<1x16xf32, #tpu.memory_space<vmem>>, vector<1x16xf32>
    %148 = vector.broadcast %147 : vector<1x16xf32> to vector<128x16xf32>
    %149 = arith.addf %142, %148 : vector<128x16xf32>
    %150 = arith.addf %149, %146 : vector<128x16xf32>
    %cst_134 = arith.constant 0.000000e+00 : f32
    %151 = vector.broadcast %cst_134 : f32 to vector<128x16xf32>
    %152 = arith.maximumf %150, %151 : vector<128x16xf32>
    %153 = vector.shape_cast %152 : vector<128x16xf32> to vector<8x16x16xf32>
    %c0_135 = arith.constant 0 : index
    %154 = arith.index_cast %55 : i32 to index
    %c0_136 = arith.constant 0 : index
    %c0_137 = arith.constant 0 : index
    %155 = vector.load %arg11[%c0_135, %154, %c0_136, %c0_137] : memref<1x8x16x16xf32, #tpu.memory_space<vmem>>, vector<1x8x16x16xf32>
    %156 = vector.shape_cast %155 : vector<1x8x16x16xf32> to vector<8x16x16xf32>
    %157 = vector.shape_cast %153 : vector<8x16x16xf32> to vector<1x8x16x16xf32>
    tpu.vector_store %arg11[%c0_135, %154, %c0_136, %c0_137], %157 {strides = array<i32>} : memref<1x8x16x16xf32, #tpu.memory_space<vmem>>, vector<1x8x16x16xf32>,
    %c1_i32_138 = arith.constant 1 : i32
    return
  }
  func.func @transform_0(%arg0: i32, %arg1: i32) -> (i32, i32, i32, i32) {
    %c4_i32 = arith.constant 4 : i32
    %0 = arith.muli %arg1, %c4_i32 : i32
    %c1_i32 = arith.constant 1 : i32
    %1 = arith.subi %0, %c1_i32 : i32
    %c0_i32 = arith.constant 0 : i32
    %2 = arith.maxsi %1, %c0_i32 : i32
    %c0_i32_0 = arith.constant 0 : i32
    %c0_i32_1 = arith.constant 0 : i32
    %c0_i32_2 = arith.constant 0 : i32
    return %arg0, %2, %c0_i32_0, %c0_i32_1 : i32, i32, i32, i32
  }
  func.func @transform_1(%arg0: i32, %arg1: i32) -> (i32, i32, i32, i32) {
    %c0_i32 = arith.constant 0 : i32
    %c0_i32_0 = arith.constant 0 : i32
    %c0_i32_1 = arith.constant 0 : i32
    return %arg0, %arg1, %c0_i32, %c0_i32_0 : i32, i32, i32, i32
  }
  func.func @transform_2(%arg0: i32, %arg1: i32) -> (i32, i32, i32, i32) {
    %c1_i32 = arith.constant 1 : i32
    %0 = arith.addi %arg1, %c1_i32 : i32
    %c4_i32 = arith.constant 4 : i32
    %1 = arith.muli %0, %c4_i32 : i32
    %c7_i32 = arith.constant 7 : i32
    %2 = arith.minsi %1, %c7_i32 : i32
    %c0_i32 = arith.constant 0 : i32
    %c0_i32_0 = arith.constant 0 : i32
    %c0_i32_1 = arith.constant 0 : i32
    return %arg0, %2, %c0_i32, %c0_i32_0 : i32, i32, i32, i32
  }
  func.func @transform_3(%arg0: i32, %arg1: i32) -> (i32, i32) {
    %c0_i32 = arith.constant 0 : i32
    %c0_i32_0 = arith.constant 0 : i32
    %c0_i32_1 = arith.constant 0 : i32
    return %c0_i32, %c0_i32_0 : i32, i32
  }
  func.func @transform_4(%arg0: i32, %arg1: i32) -> (i32, i32) {
    %c0_i32 = arith.constant 0 : i32
    %c0_i32_0 = arith.constant 0 : i32
    %c0_i32_1 = arith.constant 0 : i32
    return %c0_i32, %c0_i32_0 : i32, i32
  }
  func.func @transform_5(%arg0: i32, %arg1: i32) -> (i32, i32, i32, i32) {
    %c0_i32 = arith.constant 0 : i32
    %c0_i32_0 = arith.constant 0 : i32
    %c0_i32_1 = arith.constant 0 : i32
    %c0_i32_2 = arith.constant 0 : i32
    %c0_i32_3 = arith.constant 0 : i32
    return %c0_i32, %c0_i32_0, %c0_i32_1, %c0_i32_2 : i32, i32, i32, i32
  }
  func.func @transform_6(%arg0: i32, %arg1: i32) -> (i32, i32) {
    %c0_i32 = arith.constant 0 : i32
    %c0_i32_0 = arith.constant 0 : i32
    %c0_i32_1 = arith.constant 0 : i32
    return %c0_i32, %c0_i32_0 : i32, i32
  }
  func.func @transform_7(%arg0: i32, %arg1: i32) -> (i32, i32) {
    %c0_i32 = arith.constant 0 : i32
    %c0_i32_0 = arith.constant 0 : i32
    %c0_i32_1 = arith.constant 0 : i32
    return %c0_i32, %c0_i32_0 : i32, i32
  }
  func.func @transform_8(%arg0: i32, %arg1: i32) -> (i32, i32) {
    %c0_i32 = arith.constant 0 : i32
    %c0_i32_0 = arith.constant 0 : i32
    %c0_i32_1 = arith.constant 0 : i32
    return %c0_i32, %c0_i32_0 : i32, i32
  }
  func.func @transform_9(%arg0: i32, %arg1: i32) -> (i32, i32, i32, i32) {
    %c0_i32 = arith.constant 0 : i32
    %c0_i32_0 = arith.constant 0 : i32
    %c0_i32_1 = arith.constant 0 : i32
    return %arg0, %arg1, %c0_i32, %c0_i32_0 : i32, i32, i32, i32
  }
}

</mosaic_0001>

<bundles_post_ra>
// kernel: tpu_custom_call.1
= control target key start
LH: loop header
LB: loop body
LE: loop exit
PB: predicated region body
PF: predicated region fallthrough
CT: control target
= control target key end

     0   :  { %s4347_s0 = inlined_call_operand.hbm [shape: f32[2,16,16,16], index: 0, kind: input, shape index: {}]   ;;  %s4348_s1 = inlined_call_operand.hbm [shape: f32[2,16,16,16], index: 1, kind: input, shape index: {}]   ;;  %s4349_s2 = inlined_call_operand.hbm [shape: f32[2,16,16,16], index: 2, kind: input, shape index: {}]   ;;  %s4350_s3 = inlined_call_operand.vmem [shape: f32[16,4], index: 3, kind: input, shape index: {}]   ;;  %s4351_s4 = inlined_call_operand.vmem [shape: f32[1,4], index: 4, kind: input, shape index: {}]   ;;  %s4352_s5 = inlined_call_operand.hbm [shape: f32[3,3,4,4], index: 5, kind: input, shape index: {}]   ;;  %s4353_s6 = inlined_call_operand.vmem [shape: f32[1,4], index: 6, kind: input, shape index: {}]   ;;  %s4354_s7 = inlined_call_operand.vmem [shape: f32[4,16], index: 7, kind: input, shape index: {}]   ;;  %s4355_s8 = inlined_call_operand.vmem [shape: f32[1,16], index: 8, kind: input, shape index: {}]   ;;  %s4356_s9 = inlined_call_operand.hbm [shape: f32[2,16,16,16], index: 9, kind: output, shape index: {}]  }
   0x1   :  { %4376 = sst [smem:[#allocation34_spill]] %s4347_s0 }
   0x2   :  { %4377 = sst [smem:[#allocation35_spill]] %s4348_s1 }
   0x3   :  { %4378 = sst [smem:[#allocation36_spill]] %s4349_s2 }
   0x4   :  { %4379 = sst [smem:[#allocation37_spill]] %s4350_s3 }
   0x5   :  { %4380 = sst [smem:[#allocation38_spill]] %s4351_s4 }
   0x6   :  { %4381 = sst [smem:[#allocation39_spill]] %s4352_s5 }
   0x7   :  { %4382 = sst [smem:[#allocation40_spill]] %s4353_s6 }
   0x8   :  { %4383 = sst [smem:[#allocation41_spill]] %s4354_s7 }
   0x9   :  { %4384 = sst [smem:[#allocation42_spill]] %s4355_s8 }
   0xa   :  { %4385 = sst [smem:[#allocation43_spill]] %s4356_s9 }
   0xb   :  { %14 = vsyncpa [#allocation4], 0 }
   0xc   :  { %16 = vsyncpa [#allocation4 + $0x1], 0 }
   0xd   :  { %17 = vsyncpa [#allocation7], 0 }
   0xe   :  { %19 = vsyncpa [#allocation7 + $0x1], 0 }
   0xf   :  { %20 = vsyncpa [#allocation10], 0 }
  0x10   :  { %21 = vsyncpa [#allocation5], 0 }
  0x11   :  { %23 = vsyncpa [#allocation5 + $0x1], 0  ;;  %s3314_s30 = smov 0   ;;  %s3316_s10 = smov 0  }
  0x12   :  { %s3318_s11 = smov 0   ;;  %s3320_s12 = smov 0  }
  0x13   :  { %s3322_s13 = smov 0   ;;  %s3324_s14 = smov 0  }
  0x14   :  { %s3326_s15 = smov 0   ;;  %s3328_s16 = smov 0  }
  0x15   :  { %s3330_s17 = smov 0   ;;  %s3332_s18 = smov 0  }
  0x16   :  { %s3334_s19 = smov 0   ;;  %s3336_s20 = smov 0  }
  0x17   :  { %s3338_s21 = smov 0   ;;  %s3340_s22 = smov 0  }
  0x18 LB: > { %4386 = sst [smem:[#allocation17_spill]] %s3214_s12  ;;  %s3385_s23 = sadd.s32 4294967295, %s3254_s22   ;;  %s3254_s22 = sphi %s3340_s22, %s29_s22   ;;  %s3250_s21 = sphi %s3338_s21, %s4452_s21   ;;  %s3246_s20 = sphi %s3336_s20, %s4451_s20   ;;  %s3242_s19 = sphi %s3334_s19, %s4441_s19   ;;  %s3238_s18 = sphi %s3332_s18, %s4440_s18   ;;  %s3234_s17 = sphi %s3330_s17, %s4439_s17   ;;  %s3230_s16 = sphi %s3328_s16, %s4450_s16   ;;  %s3226_s15 = sphi %s3326_s15, %s4449_s15   ;;  %s3222_s14 = sphi %s3324_s14, %s4437_s14   ;;  %s3218_s13 = sphi %s3322_s13, %s4448_s13   ;;  %s3214_s12 = sphi %s3320_s12, %s4447_s12   ;;  %s3210_s11 = sphi %s3318_s11, %s4446_s11   ;;  %s3206_s10 = sphi %s3316_s10, %s4445_s10   ;;  %s3202_s30 = sphi %s3314_s30, %s4444_s30  }
  0x19   : > { %4387 = sst [smem:[#allocation18_spill]] %s3222_s14  ;;  %s2568_s24 = sadd.s32 4294967294, %s3254_s22  }
  0x1a   : > { %4388 = sst [smem:[#allocation19_spill]] %s3234_s17  ;;  %s38_s25 = sadd.s32 1, %s3246_s20 }
  0x1b   : > { %4389 = sst [smem:[#allocation20_spill]] %s3238_s18  ;;  %s41_s26 = sadd.s32 1, %s3250_s21 }
  0x1c   : > { %4390 = sst [smem:[#allocation21_spill]] %s3242_s19  ;;  %p39_p0 = scmp.ge.s32.totalorder %s38_s25, 2 }
  0x1d   : > { %4391 = sst [smem:[#allocation22_spill]] %s3246_s20  ;;  %p66_p1 = scmp.eq.s32.totalorder %s3254_s22, 0 }
  0x1e   : > { %4392 = sst [smem:[#allocation23_spill]] %s3250_s21  ;;  %s86_s27 = sadd.s32 1, %s3222_s14 }
  0x1f   : > { %p93_p2 = scmp.ne.s32.totalorder %s3222_s14, %s3218_s13  ;;  %s4454_s25 = smov (%p39_p0, %s38_s25), 0 }
  0x20   : > { %4393 = sst [smem:[#allocation24_spill]] %s4454_s25  ;;  %s4456_s26 = smov (!%p39_p0, %s41_s26), %s3250_s21 }
  0x21   : > { %s82_s28 = ssub.s32 %s3246_s20, %s4454_s25  ;;  %p3401_p3 = por %p93_p2, %p66_p1 }
  0x22   : > { %p43_p4 = scmp.ge.s32.totalorder %s4456_s26, 2  ;;  %p99_p5 = scmp.ne.s32.totalorder %s3218_s13, %s3214_s12 }
  0x23   : > { %p287_p6 = scmp.eq.s32.totalorder %s3385_s23, 3  ;;  %p293_p7 = scmp.eq.s32.totalorder %s2568_s24, 3 }
  0x24   : > { %s4458_s26 = smov (%p43_p4, %s4456_s26), 0  ;;  %p4373_p11 = scmp.lt.s32.totalorder %s3254_s22, 4 }
  0x25   : > { %4395 = sst [smem:[#allocation25_spill]] %s4458_s26  ;;  %p3410_p8 = por %p287_p6, %p93_p2 }
  0x26   : > { %p3417_p9 = por %p293_p7, %p99_p5  ;;  %s3423_s8 = ssub.s32 %s3250_s21, %s4458_s26 }
  0x27   : > { %s4396_s9 = scalar_select %p3410_p8, 1, 0 }
  0x28   : > { %s4398_s19 = scalar_select %p3417_p9, 1, 0 }
  0x29   : > { %4397 = sst [smem:[#allocation26_spill]] %s4396_s9  ;;  %s83_s6 = sor.u32 %s82_s28, %s3423_s8 }
  0x2a   : > { %4399 = sst [smem:[#allocation27_spill]] %s4398_s19  ;;  %p84_p10 = scmp.eq.s32.totalorder %s83_s6, 0 }
  0x2b   : > { %s3428_s24 = sshll.u32 %s3250_s21, 5  ;;  %s371_s4 = sand.u32 1, %s3254_s22  }
  0x2c   : > { %s3431_s7 = scalar_select %p84_p10, %s3222_s14, %s86_s27  }
  0x2d   : > { %s373_s9 = sand.u32 1, %s3222_s14   ;;  %s2808_s3 = sshll.u32 %s3246_s20, 4 }
  0x2e   : > { %4400 = sst [smem:[#allocation28_spill]] %s3431_s7  ;;  %s2585_s18 = sshll.u32 %s373_s9, 7 }
  0x2f   : > { %s381_s26 = sadd.s32 %s2808_s3, %s3428_s24  ;;  %s375_s28 = scalar_lea.vmem [#allocation6], %s2585_s18 }
  0x30   : > { %s2589_s19 = sshll.u32 %s381_s26, 3  ;;  %s386_s6 = sshll.u32 %s375_s28, 4  ;;  %s387_s6 = int_to_ptr.vmem [resolvable:$true] %s386_s6 }
  0x31   : > { %s4401_s1 = sld [smem:[#allocation35_spill]]  ;;  %p2837_p12 = pnand %p4373_p11, %p3401_p3 }
  0x32   : > { %s3444_s9 = scalar_lea.sflag [#allocation7], %s371_s4  ;;  %s4366_s3 = smov 128  }
  0x33   : > { %s4368_s26 = smov 8   ;;  %p72_p13 = scmp.eq.s32.totalorder %s3385_s23, 0 }
  0x34   : > { %p2575_p0 = scmp.ge.s32.totalorder %s3254_s22, 1  ;;  %p300_p2 = scmp.lt.s32.totalorder %s3254_s22, 5 }
  0x35   : > { %s4402_s5 = sld [smem:[#allocation39_spill]]  ;;  %p3461_p3 = por %p99_p5, %p72_p13 }
  0x36   : > { %p3465_p4 = pnand %p2575_p0, %p300_p2  ;;  %s3258_s21 = smov [#allocation9]  }
  0x37   : > { %s383_s0 = scalar_lea.hbm %s4401_s1, %s2589_s19  ;;  %s319_s29 = sshll.u32 %s3258_s21, 4  ;;  %s320_s29 = int_to_ptr.vmem [resolvable:$true] %s319_s29 }
  0x38   : > { %s384_s27 = sshll.u32 %s383_s0, 4  ;;  %p2829_p6 = pneg %p3465_p4  ;;  %s385_s27 = int_to_ptr.hbm [resolvable:$true] %s384_s27 }
  0x39   : > { %2839 = dma.hbm_to_vmem [thread:$0]  (!%p2837_p12), %s385_s27, 2048, %s387_s6, %s3444_s9, %s4366_s3, %s4366_s3, %s4368_s26  }
  0x3a   : > { %p2830_p5 = pnand %p2829_p6, %p72_p13  ;;  %s3259_s28 = smov 64  }
  0x3b   : > { %s317_s18 = sshll.u32 %s4402_s5, 4  ;;  %s3260_s6 = smov 4   ;;  %s318_s18 = int_to_ptr.hbm [resolvable:$true] %s317_s18 }
  0x3c   : > { %2832 = dma.hbm_to_vmem [thread:$0]  (!%p2830_p5), %s318_s18, 576, %s320_s29, [#allocation10], %s3259_s28, %s3259_s28, %s3260_s6  }
  0x3d   : > { %s2569_s27 = sshll.u32 %s3246_s20, 2  ;;  %s2571_s2 = sshll.u32 %s4454_s25, 2 }
  0x3e   : > { %s2570_s0 = sadd.s32 4294967295, %s2569_s27  ;;  %s2572_s21 = sadd.s32 4294967295, %s2571_s2 }
  0x3f   : > { %p47_p7 = scmp.gt.s32.totalorder %s2570_s0, 0  ;;  %p51_p10 = scmp.gt.s32.totalorder %s2572_s21, 0 }
  0x40   : > { %s58_s3 = sadd.s32 1, %s3234_s17  ;;  %p65_p12 = scmp.ne.s32.totalorder %s3234_s17, %s3230_s16 }
  0x41   : > { %s4460_s0 = smov (!%p47_p7, %s2570_s0), 0  ;;  %s4462_s21 = smov (!%p51_p10, %s2572_s21), 0 }
  0x42   : > { %p71_p0 = scmp.ne.s32.totalorder %s3230_s16, %s3226_s15  ;;  %s54_s26 = ssub.s32 %s4460_s0, %s4462_s21 }
  0x43   : > { %s2804_s1 = sadd.s32 4, %s2569_s27  ;;  %s55_s5 = sor.u32 %s54_s26, %s3423_s8 }
  0x44   : > { %p3483_p2 = por %p66_p1, %p65_p12  ;;  %p56_p6 = scmp.eq.s32.totalorder %s55_s5, 0 }
  0x45   : > { %p3489_p5 = por %p72_p13, %p71_p0  ;;  %p111_p7 = scmp.lt.s32.totalorder %s2804_s1, 7 }
  0x46   : > { %s2806_s28 = sadd.s32 4, %s2571_s2  ;;  %s342_s15 = sand.u32 1, %s3234_s17  }
  0x47   : > { %s3494_s6 = scalar_select %p56_p6, %s3234_s17, %s58_s3  }
  0x48   : > { %p115_p10 = scmp.lt.s32.totalorder %s2806_s28, 7  ;;  %s2578_s26 = sshll.u32 %s342_s15, 5 }
  0x49   : > { %4407 = sst [smem:[#allocation29_spill]] %s3494_s6  ;;  %s2807_s27 = sshll.u32 %s4460_s0, 2 }
  0x4a   : > { %s356_s21 = sadd.s32 %s2807_s27, %s3428_s24  ;;  %s346_s5 = scalar_lea.vmem [#allocation3], %s2578_s26 }
  0x4b   : > { %s361_s25 = sshll.u32 %s346_s5, 4  ;;  %s2584_s20 = sshll.u32 %s356_s21, 3  ;;  %s362_s25 = int_to_ptr.vmem [resolvable:$true] %s361_s25 }
  0x4c   : > { %s4408_s6 = sld [smem:[#allocation34_spill]]  ;;  %p2834_p12 = pnand %p4373_p11, %p3483_p2 }
  0x4d   : > { %s343_s0 = scalar_lea.sflag [#allocation4], %s342_s15  ;;  %s4409_s27 = smov 8  }
  0x4e   : > { %s4410_s26 = smov 128   ;;  %s122_s21 = sadd.s32 1, %s3210_s11 }
  0x4f   : > { %s4464_s1 = smov (!%p111_p7, %s2804_s1), 7  ;;  %s4466_s28 = smov (!%p115_p10, %s2806_s28), 7 }
  0x50   : > { %p129_p0 = scmp.ne.s32.totalorder %s3210_s11, %s3206_s10  ;;  %p135_p6 = scmp.ne.s32.totalorder %s3206_s10, %s3202_s30 }
  0x51   : > { %s398_s18 = sand.u32 1, %s3210_s11   ;;  %s2811_s15 = sshll.u32 %s4464_s1, 2 }
  0x52   : > { %s358_s7 = scalar_lea.hbm %s4408_s6, %s2584_s20  ;;  %s118_s20 = ssub.s32 %s4464_s1, %s4466_s28 }
  0x53   : > { %s359_s17 = sshll.u32 %s358_s7, 4  ;;  %s119_s6 = sor.u32 %s118_s20, %s3423_s8  ;;  %s360_s17 = int_to_ptr.hbm [resolvable:$true] %s359_s17 }
  0x54   : > { %2836 = dma.hbm_to_vmem [thread:$0]  (!%p2834_p12), %s360_s17, 512, %s362_s25, %s343_s0, %s4410_s26, %s4410_s26, %s4409_s27  }
  0x55   : > { %p3519_p2 = por %p129_p0, %p66_p1  ;;  %p120_p11 = scmp.eq.s32.totalorder %s119_s6, 0 }
  0x56   : > { %p3525_p12 = por %p135_p6, %p72_p13  ;;  %s2590_s25 = sshll.u32 %s398_s18, 5 }
  0x57   : > { %s3530_s30 = scalar_select %p120_p11, %s3210_s11, %s122_s21  }
  0x58   : > { %s410_s28 = sadd.s32 %s2811_s15, %s3428_s24  ;;  %s400_s8 = scalar_lea.vmem [#allocation8], %s2590_s25 }
  0x59   : > { %s2595_s5 = sshll.u32 %s410_s28, 3  ;;  %s415_s2 = sshll.u32 %s400_s8, 4  ;;  %s416_s2 = int_to_ptr.vmem [resolvable:$true] %s415_s2 }
  0x5a   : > { %s4413_s20 = sld [smem:[#allocation36_spill]]  ;;  %p4414_p1 = scmp.lt.s32.totalorder %s3254_s22, 4 }
  0x5c   : > { %p2840_p7 = pnand %p4414_p1, %p3519_p2 }
  0x5e   : > { %427 = sbr.rel (%p3465_p4) target bundleno = 931 (0x3a3), region = 56 }
  0x60   : > { %s412_s14 = scalar_lea.hbm %s4413_s20, %s2595_s5 }
  0x61   : > { %s413_s12 = sshll.u32 %s412_s14, 4  ;;  %s414_s12 = int_to_ptr.hbm [resolvable:$true] %s413_s12 }
  0x62   : > { %2842 = dma.hbm_to_vmem [thread:$0]  (!%p2840_p7), %s414_s12, 512, %s416_s2, %s3444_s9, %s4410_s26, %s4410_s26, %s4409_s27  }
  0x63   : > { %s429_s1 = sand.u32 1, %s3230_s16  }
  0x64   : > { %s2597_s24 = sshll.u32 %s429_s1, 5  ;;  %s430_s21 = scalar_lea.sflag [#allocation4], %s429_s1 }
  0x65   : > { %s3547_s18 = scalar_lea.vmem [#allocation3], %s2597_s24 }
  0x66   : > { %3181 = dma.done.wait (%p3489_p5), %s430_s21, 512  }
  0x67   : > { %3183 = vsyncadd (%p3489_p5), %s430_s21, 4294966784  ;;  %s439_s12 = sand.u32 1, %s3385_s23   ;;  %s441_s14 = sand.u32 1, %s3218_s13  }
  0x68   : > { %s3557_s9 = sshll.u32 %s441_s14, 7  ;;  %s440_s19 = scalar_lea.sflag [#allocation7], %s439_s12 }
  0x69   : > { %s3560_s27 = scalar_lea.vmem [#allocation6], %s3557_s9 }
  0x6a   : > { %3185 = dma.done.wait (%p3461_p3), %s440_s19, 2048  }
  0x6b   : > { %3187 = vsyncadd (%p3461_p3), %s440_s19, 4294965248  ;;  %s451_s29 = sand.u32 1, %s3206_s10  }
  0x6c   : > { %s2599_s26 = sshll.u32 %s451_s29, 5 }
  0x6d   : > { %s3567_s6 = scalar_lea.vmem [#allocation8], %s2599_s26 }
  0x6e   : > { %3189 = dma.done.wait (%p3525_p12), %s440_s19, 512  }
  0x6f   : > { %3191 = vsyncadd (%p3525_p12), %s440_s19, 4294966784 }
  0x70   : > { %3193 = dma.done.wait (%p72_p13), [#allocation10], 576  }
  0x71   : > { %3195 = vsyncadd (%p72_p13), [#allocation10], 4294966720  ;;  %s4415_s25 = sld [smem:[#allocation37_spill]]  ;;  %v544_v2 = vld [vmem:[%s3547_s18] sm:$0xff]  ;;  %vm554_vm0 = vcmask 130048   ;;  %v682_v4 = vld [vmem:[%s3560_s27 + $0x10] sm:$0xff] }
  0x72   : > { %v613_v3 = vld [vmem:[%s3567_s6] sm:$0xff]  ;;  %v545_v5 = vld [vmem:[%s3547_s18 + $0x8] sm:$0xff]  ;;  %v683_v7 = vld [vmem:[%s3560_s27 + $0x18] sm:$0xff]  ;;  %s4416_s23 = sld [smem:[#allocation20_spill]]  ;;  %vm516_vm1 = vcmask 24576   ;;  %v3261_v24 = vmov 0.0  }
  0x73   : > { %v614_v6 = vld [vmem:[%s3567_s6 + $0x8] sm:$0xff]  ;;  %v546_v8 = vld [vmem:[%s3547_s18 + $0x10] sm:$0xff]  ;;  %v684_v10 = vld [vmem:[%s3560_s27 + $0x20] sm:$0xff]  ;;  %518 = vst.msk [vmem:[#allocation2 + $0x18] sm:$0x1] %vm516_vm1, %v3261_v24  ;;  %s4417_s3 = sld [smem:[#allocation38_spill]] }
  0x74   : > { %v615_v9 = vld [vmem:[%s3567_s6 + $0x10] sm:$0xff]  ;;  %v547_v11 = vld [vmem:[%s3547_s18 + $0x18] sm:$0xff]  ;;  %v685_v13 = vld [vmem:[%s3560_s27 + $0x28] sm:$0xff]  ;;  %519 = vst.msk [vmem:[#allocation2 + $0x30] sm:$0x1] %vm516_vm1, %v3261_v24  ;;  %vm936_vm2 = vcmask 1043456  }
  0x75   : > { %v616_v12 = vld [vmem:[%s3567_s6 + $0x18] sm:$0xff]  ;;  %v680_v14 = vld [vmem:[%s3560_s27] sm:$0xff]  ;;  %v686_v15 = vld [vmem:[%s3560_s27 + $0x30] sm:$0xff]  ;;  %520 = vst.msk [vmem:[#allocation2 + $0x48] sm:$0x1] %vm516_vm1, %v3261_v24  ;;  %vm605_vm3 = vcmask 31744  }
  0x76   : > { %v681_v16 = vld [vmem:[%s3560_s27 + $0x8] sm:$0xff]  ;;  %v687_v17 = vld [vmem:[%s3560_s27 + $0x38] sm:$0xff]  ;;  %v688_v18 = vld [vmem:[%s3560_s27 + $0x40] sm:$0xff]  ;;  %521 = vst.msk [vmem:[#allocation2 + $0x60] sm:$0x1] %vm516_vm1, %v3261_v24  ;;  %s4419_s29 = sld [smem:[#allocation41_spill]] }
  0x77   : > { %v549_v0 = vld [vmem:[%s4415_s25 + $0x8] sm:$0xff]  ;;  %v548_v1 = vld [vmem:[%s4415_s25] sm:$0xff]  ;;  %v690_v20 = vld [vmem:[%s3560_s27 + $0x50] sm:$0xff]  ;;  %522 = vst.msk [vmem:[#allocation2 + $0x78] sm:$0x1] %vm516_vm1, %v3261_v24  ;;  %s4423_s7 = sld [smem:[#allocation40_spill]] }
  0x78   : > { %581 = vmatpush.msra.mxu0 %v549_v0  ;;  %649 = vmatpush.msra.mxu1 %v549_v0  ;;  %v689_v19 = vld [vmem:[%s3560_s27 + $0x48] sm:$0xff]  ;;  %v691_v21 = vld [vmem:[%s3560_s27 + $0x58] sm:$0xff]  ;;  %v692_v22 = vld [vmem:[%s3560_s27 + $0x60] sm:$0xff]  ;;  %523 = vst.msk [vmem:[#allocation2 + $0x90] sm:$0x1] %vm516_vm1, %v3261_v24  ;;  %p541_p11 = scmp.gt.s32.totalorder %s4416_s23, 0 }
  0x79   : > { %2813 = vmatpush.msra.mxu2 %v549_v0  ;;  %v693_v23 = vld [vmem:[%s3560_s27 + $0x68] sm:$0xff]  ;;  %v694_v25 = vld [vmem:[%s3560_s27 + $0x70] sm:$0xff]  ;;  %524 = vst.msk [vmem:[#allocation2 + $0xa8] sm:$0x1] %vm516_vm1, %v3261_v24  ;;  %v695_v26 = vld [vmem:[%s3560_s27 + $0x78] sm:$0xff]  ;;  %p610_p13 = scmp.lt.s32.totalorder %s4416_s23, 1 }
  0x7a   : > { %582 = vmatpush.msra.mxu0 %v548_v1  ;;  %650 = vmatpush.msra.mxu1 %v548_v1  ;;  %525 = vst.msk [vmem:[#allocation2 + $0xc0] sm:$0x1] %vm516_vm1, %v3261_v24  ;;  %s542_s17 = scalar_select %p541_p11, 1, 0  ;;  %v2971_v27 = vld [vmem:[%s4417_s3] ss:$0 sm:$0xff] }
  0x7b   : > { %2814 = vmatpush.msra.mxu2 %v548_v1  ;;  %2602 = vmatmul.msk.f32.vlgmr.msra.gmra.mxu0 %vm554_vm0, %v544_v2  ;;  %526 = vst.msk [vmem:[#allocation2 + $0xd8] sm:$0x1] %vm516_vm1, %v3261_v24  ;;  %s611_s5 = scalar_select %p610_p13, 1, 0  ;;  %v2972_v28 = vld [vmem:[%s4417_s3] ss:$0 sm:$0xff] }
  0x7c   : > { %2606 = vmatmul.msk.f32.vlgmr.msra.gmra.mxu1 %vm554_vm0, %v613_v3  ;;  %2612 = vmatmul.msk.f32.vlgmr.msra.gmra.mxu2 %vm554_vm0, %v682_v4  ;;  %527 = vst.msk [vmem:[#allocation2 + $0xf0] sm:$0x1] %vm516_vm1, %v3261_v24  ;;  %s543_s1 = scvt.s32.f32 %s542_s17  ;;  %v887_v29 = vld [vmem:[#allocation9 + $0x4] sm:$0xf]  ;;  %v869_v30 = vld [vmem:[#allocation9] sm:$0xf] }
  0x7d   : > { %764 = vmatpush.msrb.mxu1 %v549_v0  ;;  %530 = vst.msk [vmem:[#allocation2 + $0x29] sm:$0x1] %vm516_vm1, %v3261_v24  ;;  %s612_s24 = scvt.s32.f32 %s611_s5  ;;  %2643 = vmatpush.msk.msrb.mxu0 %vm936_vm2, %v869_v30  ;;  %v3666_v38 = vld [vmem:[%s4417_s3] ss:$0 sm:$0xff]  ;;  %v1288_v46 = vld [vmem:[#allocation9 + $0xc] sm:$0xf] }
  0x7e   : > { %531 = vst.msk [vmem:[#allocation2 + $0x41] sm:$0x1] %vm516_vm1, %v3261_v24  ;;  %2815 = vmatpush.msk.msra.mxu3 %vm936_vm2, %v887_v29  ;;  %v600_v33 = vstv %s543_s1  ;;  %v1438_v47 = vld [vmem:[#allocation9 + $0x10] sm:$0xf]  ;;  %s4428_s28 = sld [smem:[#allocation42_spill]]  ;;  %s4213_s17 = scalar_lea.vmem [#allocation11], %s3557_s9 }
  0x7f   : > { %765 = vmatpush.msrb.mxu1 %v548_v1  ;;  %532 = vst.msk [vmem:[#allocation2 + $0x59] sm:$0x1] %vm516_vm1, %v3261_v24  ;;  %v668_v35 = vstv %s612_s24  ;;  %2694 = vmatpush.msk.msrb.mxu2 %vm936_vm2, %v1438_v47  ;;  %s4429_s9 = sld [smem:[#allocation21_spill]]  ;;  %s2812_s5 = sshll.u32 %s4416_s23, 4 }
  0x80   : > { %533 = vst.msk [vmem:[#allocation2 + $0x71] sm:$0x1] %vm516_vm1, %v3261_v24  ;;  %2677 = vmatpush.msk.msrb.mxu3 %vm936_vm2, %v1288_v46  ;;  %s4430_s24 = sld [smem:[#allocation43_spill]]  ;;  %s2412_s18 = sshll.u32 %s4213_s17, 4  ;;  %s2413_s18 = int_to_ptr.vmem [resolvable:$true] %s2412_s18 }
  0x81   : > { %534 = vst.msk [vmem:[#allocation2 + $0x89] sm:$0x1] %vm516_vm1, %v3261_v24  ;;  %2626 = vmatpush.msk.msra.mxu1 %vm936_vm2, %v887_v29  ;;  %s2397_s19 = scalar_lea.sflag [#allocation5], %s441_s14 }
  0x82   : > { %535 = vst.msk [vmem:[#allocation2 + $0xa1] sm:$0x1] %vm516_vm1, %v3261_v24 }
  0x83   : > { %2603 = vmatmul.msk.f32.gmra.mxu0 %vm554_vm0, %v545_v5  ;;  %536 = vst.msk [vmem:[#allocation2 + $0xb9] sm:$0x1] %vm516_vm1, %v3261_v24 }
  0x84   : > { %2607 = vmatmul.msk.f32.gmra.mxu1 %vm554_vm0, %v614_v6  ;;  %2613 = vmatmul.msk.f32.gmra.mxu2 %vm554_vm0, %v683_v7  ;;  %537 = vst.msk [vmem:[#allocation2 + $0xd1] sm:$0x1] %vm516_vm1, %v3261_v24 }
  0x85   : > { %538 = vst.msk [vmem:[#allocation2 + $0xe9] sm:$0x1] %vm516_vm1, %v3261_v24  ;;  %s2799_s8 = sshll.u32 %s4429_s9, 5 }
  0x86   : > { %539 = vst.msk [vmem:[#allocation2 + $0x101] sm:$0x1] %vm516_vm1, %v3261_v24  ;;  %s2409_s2 = sadd.s32 %s2812_s5, %s2799_s8 }
  0x87   : > { %s2800_s0 = sshll.u32 %s2409_s2, 3 }
  0x88   : > { %s2411_s21 = scalar_lea.hbm %s4430_s24, %s2800_s0 }
  0x89   : > { %s2414_s12 = sshll.u32 %s2411_s21, 4  ;;  %s2415_s12 = int_to_ptr.hbm [resolvable:$true] %s2414_s12 }
  0x8b   : > { %2604 = vmatmul.msk.f32.gmra.mxu0 %vm554_vm0, %v546_v8 }
  0x8c   : > { %2608 = vmatmul.msk.f32.gmra.mxu1 %vm554_vm0, %v615_v9  ;;  %2614 = vmatmul.msk.f32.gmra.mxu2 %vm554_vm0, %v684_v10 }
  0x93   : > { %2605 = vmatmul.msk.f32.gmra.mxu0 %vm554_vm0, %v547_v11 }
  0x94   : > { %2609 = vmatmul.msk.f32.gmra.mxu1 %vm554_vm0, %v616_v12  ;;  %2615 = vmatmul.msk.f32.gmra.mxu2 %vm554_vm0, %v685_v13 }
  0x9c   : > { %2610 = vmatmul.msk.f32.vlgmr.msrb.gmra.mxu1 %vm554_vm0, %v680_v14  ;;  %2616 = vmatmul.msk.f32.gmra.mxu2 %vm554_vm0, %v686_v15 }
  0x9d   : > { %2816 = vmatpush.msk.msrb.mxu1 %vm936_vm2, %v869_v30 }
  0xa4   : > { %2611 = vmatmul.msk.f32.gmra.mxu1 %vm554_vm0, %v681_v16  ;;  %2617 = vmatmul.msk.f32.gmra.mxu2 %vm554_vm0, %v687_v17 }
  0xac   : > { %2618 = vmatmul.msk.f32.gmra.mxu2 %vm554_vm0, %v688_v18 }
  0xb4   : > { %2619 = vmatmul.msk.f32.gmra.mxu2 %vm554_vm0, %v689_v19 }
  0xbc   : > { %2620 = vmatmul.msk.f32.gmra.mxu2 %vm554_vm0, %v690_v20 }
  0xc4   : > { %2621 = vmatmul.msk.f32.gmra.mxu2 %vm554_vm0, %v691_v21 }
  0xcc   : > { %2622 = vmatmul.msk.f32.gmra.mxu2 %vm554_vm0, %v692_v22 }
  0xd4   : > { %2623 = vmatmul.msk.f32.gmra.mxu2 %vm554_vm0, %v693_v23 }
  0xdc   : > { %2624 = vmatmul.msk.f32.gmra.mxu2 %vm554_vm0, %v694_v25 }
  0xe4   : > { %2625 = vmatmul.msk.f32.gmra.mxu2 %vm554_vm0, %v695_v26 }
  0xf8   : > { %v584_v31 = vpop.f32.mrf.mxu0 }
  0xf9   : > { %v652_v32 = vpop.f32.mrf.mxu1 }
  0xfa   : > { %v653_v34 = vadd.f32 %v2972_v28, %v652_v32 }
  0xfc   : > { %v664_v36 = vmax.f32 %v653_v34, 0.0 }
  0xfe   : > { %v669_v37 = vmul.f32 %v668_v35, %v664_v36 }
  0xff   : > { %v773_v39 = vpop.f32.mrf.mxu2 }
 0x100   : > { %674 = vst.msk [vmem:[#allocation2 + $0xf1] sm:$0xff] %vm605_vm3, %v669_v37  ;;  %v774_v40 = vadd.f32 %v3666_v38, %v773_v39  ;;  %v587_v41 = vpop.f32.mrf.mxu0 }
 0x101   : > { %v655_v42 = vpop.f32.mrf.mxu1 }
 0x102   : > { %v817_v43 = vmax.f32 %v774_v40, 0.0  ;;  %v656_v44 = vadd.f32 %v2972_v28, %v655_v42  ;;  %v1588_v42 = vld [vmem:[#allocation9 + $0x14] sm:$0xf] }
 0x103   : > { %2711 = vmatpush.msk.msra.mxu0 %vm936_vm2, %v1588_v42 }
 0x104   : > { %836 = vst.msk [vmem:[#allocation2 + $0x49] sm:$0xff] %vm605_vm3, %v817_v43  ;;  %v665_v45 = vmax.f32 %v656_v44, 0.0  ;;  %v1138_v44 = vld [vmem:[#allocation9 + $0x8] sm:$0xf] }
 0x106   : > { %v670_v48 = vmul.f32 %v668_v35, %v665_v45 }
 0x107   : > { %v776_v49 = vpop.f32.mrf.mxu2 }
 0x108   : > { %675 = vst.msk [vmem:[#allocation2 + $0xf9] sm:$0xff] %vm605_vm3, %v670_v48  ;;  %v777_v50 = vadd.f32 %v3666_v38, %v776_v49  ;;  %v590_v51 = vpop.f32.mrf.mxu0 }
 0x109   : > { %v591_v52 = vadd.f32 %v2971_v27, %v590_v51  ;;  %v658_v53 = vpop.f32.mrf.mxu1 }
 0x10a   : > { %v818_v54 = vmax.f32 %v777_v50, 0.0 }
 0x10b   : > { %v598_v55 = vmax.f32 %v591_v52, 0.0  ;;  %v3710_v28 = vld [vmem:[#allocation2 + $0x48] sm:$0xff] }
 0x10c   : > { %837 = vst.msk [vmem:[#allocation2 + $0x51] sm:$0xff] %vm605_vm3, %v818_v54 }
 0x10d   : > { %v603_v56 = vmul.f32 %v600_v33, %v598_v55 }
 0x10f   : > { %608 = vst.msk [vmem:[#allocation2 + $0x19] sm:$0xff] %vm605_vm3, %v603_v56  ;;  %v779_v57 = vpop.f32.mrf.mxu2 }
 0x110   : > { %v780_v58 = vadd.f32 %v3666_v38, %v779_v57  ;;  %v593_v59 = vpop.f32.mrf.mxu0 }
 0x111   : > { %v594_v60 = vadd.f32 %v2971_v27, %v593_v59  ;;  %v661_v61 = vpop.f32.mrf.mxu1  ;;  %v3707_v27 = vld [vmem:[#allocation2 + $0x49] sm:$0xff] }
 0x112   : > { %v819_v62 = vmax.f32 %v780_v58, 0.0 }
 0x113   : > { %v599_v63 = vmax.f32 %v594_v60, 0.0  ;;  %v3728_v34 = vld [vmem:[#allocation2 + $0x50] sm:$0xff] }
 0x114   : > { %838 = vst.msk [vmem:[#allocation2 + $0x61] sm:$0xff] %vm605_vm3, %v819_v62 }
 0x115   : > { %v604_v0 = vmul.f32 %v600_v33, %v599_v63  ;;  %v3721_v33 = vld [vmem:[#allocation2 + $0x51] sm:$0xff] }
 0x116   : > { %v870_v1 = vld [vmem:[#allocation2 + $0x19] sm:$0xff] }
 0x117   : > { %v853_v2 = vld [vmem:[#allocation2 + $0x18] sm:$0xff]  ;;  %609 = vst.msk [vmem:[#allocation2 + $0x21] sm:$0xff] %vm605_vm3, %v604_v0  ;;  %v782_v3 = vpop.f32.mrf.mxu2  ;;  %2627 = vmatmul.msk.f32.vlgmr.msra.gmra.mxu1 %vm605_vm3, %v870_v1 }
 0x118   : > { %2644 = vmatmul.msk.f32.vlgmr.msrb.gmra.mxu0 %vm605_vm3, %v853_v2  ;;  %v783_v4 = vadd.f32 %v3666_v38, %v782_v3  ;;  %2660 = vmatpush.msk.msra.mxu1 %vm936_vm2, %v1138_v44 }
 0x119   : > { %v767_v5 = vpop.f32.mrf.mxu1 }
 0x11a   : > { %v820_v6 = vmax.f32 %v783_v4, 0.0  ;;  %v768_v7 = vadd.f32 %v3666_v38, %v767_v5 }
 0x11b   : > { %v3737_v40 = vld [vmem:[#allocation2 + $0x61] sm:$0xff] }
 0x11c   : > { %839 = vst.msk [vmem:[#allocation2 + $0x69] sm:$0xff] %vm605_vm3, %v820_v6  ;;  %v815_v8 = vmax.f32 %v768_v7, 0.0  ;;  %v3742_v41 = vld [vmem:[#allocation2 + $0x60] sm:$0xff] }
 0x11e   : > { %834 = vst.msk [vmem:[#allocation2 + $0x31] sm:$0xff] %vm605_vm3, %v815_v8  ;;  %v871_v9 = vld [vmem:[#allocation2 + $0x21] sm:$0xff] }
 0x11f   : > { %v854_v10 = vld [vmem:[#allocation2 + $0x20] sm:$0xff]  ;;  %v785_v11 = vpop.f32.mrf.mxu2  ;;  %2628 = vmatmul.msk.f32.vlgmr.msra.gmra.mxu3 %vm605_vm3, %v871_v9 }
 0x120   : > { %2645 = vmatmul.msk.f32.gmra.mxu0 %vm605_vm3, %v854_v10  ;;  %v786_v12 = vadd.f32 %v3666_v38, %v785_v11  ;;  %v1121_v3 = vld [vmem:[#allocation2 + $0x1a] sm:$0xff]  ;;  %v1122_v9 = vld [vmem:[#allocation2 + $0x22] sm:$0xff] }
 0x121   : > { %v770_v13 = vpop.f32.mrf.mxu1 }
 0x122   : > { %v821_v14 = vmax.f32 %v786_v12, 0.0  ;;  %v771_v15 = vadd.f32 %v3666_v38, %v770_v13  ;;  %v1573_v12 = vld [vmem:[#allocation2 + $0x4a] sm:$0xff]  ;;  %v1891_v13 = vld [vmem:[#allocation9 + $0x1c] sm:$0xf] }
 0x123   : > { %v3755_v48 = vld [vmem:[#allocation2 + $0x69] sm:$0xff]  ;;  %2745 = vmatpush.msk.msra.mxu3 %vm936_vm2, %v1891_v13 }
 0x124   : > { %840 = vst.msk [vmem:[#allocation2 + $0x79] sm:$0xff] %vm605_vm3, %v821_v14  ;;  %v816_v16 = vmax.f32 %v771_v15, 0.0  ;;  %v3762_v49 = vld [vmem:[#allocation2 + $0x68] sm:$0xff]  ;;  %v2041_v14 = vld [vmem:[#allocation9 + $0x20] sm:$0xf] }
 0x125   : > { %v1421_v17 = vld [vmem:[#allocation2 + $0x31] sm:$0xff]  ;;  %2762 = vmatpush.msk.msra.mxu2 %vm936_vm2, %v2041_v14 }
 0x126   : > { %v3691_v18 = vld [vmem:[#allocation2 + $0x30] sm:$0xff]  ;;  %835 = vst.msk [vmem:[#allocation2 + $0x39] sm:$0xff] %vm605_vm3, %v816_v16  ;;  %2695 = vmatmul.msk.f32.vlgmr.msrb.gmra.mxu2 %vm605_vm3, %v1421_v17  ;;  %v1741_v15 = vld [vmem:[#allocation9 + $0x18] sm:$0xf] }
 0x127   : > { %v788_v19 = vpop.f32.mrf.mxu2  ;;  %2629 = vmatmul.msk.f32.gmra.mxu3 %vm605_vm3, %v1421_v17  ;;  %v1574_v16 = vld [vmem:[#allocation2 + $0x52] sm:$0xff] }
 0x128   : > { %2646 = vmatmul.msk.f32.gmra.mxu0 %vm605_vm3, %v3691_v18  ;;  %v789_v20 = vadd.f32 %v3666_v38, %v788_v19  ;;  %v1575_v19 = vld [vmem:[#allocation2 + $0x62] sm:$0xff] }
 0x12a   : > { %v822_v21 = vmax.f32 %v789_v20, 0.0 }
 0x12b   : > { %v3771_v54 = vld [vmem:[#allocation2 + $0x79] sm:$0xff] }
 0x12c   : > { %841 = vst.msk [vmem:[#allocation2 + $0x81] sm:$0xff] %vm605_vm3, %v822_v21  ;;  %v3776_v55 = vld [vmem:[#allocation2 + $0x78] sm:$0xff]  ;;  %v1576_v21 = vld [vmem:[#allocation2 + $0x6a] sm:$0xff] }
 0x12d   : > { %v1422_v22 = vld [vmem:[#allocation2 + $0x39] sm:$0xff] }
 0x12e   : > { %2696 = vmatmul.msk.f32.gmra.mxu2 %vm605_vm3, %v1422_v22  ;;  %v3701_v23 = vld [vmem:[#allocation2 + $0x38] sm:$0xff] }
 0x12f   : > { %v791_v24 = vpop.f32.mrf.mxu2  ;;  %2630 = vmatmul.msk.f32.gmra.mxu3 %vm605_vm3, %v1422_v22  ;;  %v1571_v0 = vld [vmem:[#allocation2 + $0x32] sm:$0xff]  ;;  %v1572_v6 = vld [vmem:[#allocation2 + $0x3a] sm:$0xff] }
 0x130   : > { %2647 = vmatmul.msk.f32.gmra.mxu0 %vm605_vm3, %v3701_v23  ;;  %v792_v25 = vadd.f32 %v3666_v38, %v791_v24 }
 0x132   : > { %v823_v26 = vmax.f32 %v792_v25, 0.0 }
 0x133   : > { %v3787_v60 = vld [vmem:[#allocation2 + $0x81] sm:$0xff] }
 0x134   : > { %842 = vst.msk [vmem:[#allocation2 + $0x91] sm:$0xff] %vm605_vm3, %v823_v26  ;;  %v3794_v61 = vld [vmem:[#allocation2 + $0x80] sm:$0xff] }
 0x135   : > { %v1577_v24 = vld [vmem:[#allocation2 + $0x7a] sm:$0xff]  ;;  %v1578_v26 = vld [vmem:[#allocation2 + $0x82] sm:$0xff] }
 0x136   : > { %2697 = vmatmul.msk.f32.gmra.mxu2 %vm605_vm3, %v3707_v27 }
 0x137   : > { %v794_v29 = vpop.f32.mrf.mxu2  ;;  %2631 = vmatmul.msk.f32.gmra.mxu3 %vm605_vm3, %v3707_v27 }
 0x138   : > { %2648 = vmatmul.msk.f32.gmra.mxu0 %vm605_vm3, %v3710_v28  ;;  %v795_v30 = vadd.f32 %v3666_v38, %v794_v29 }
 0x13a   : > { %v824_v31 = vmax.f32 %v795_v30, 0.0 }
 0x13b   : > { %v3719_v32 = vld [vmem:[#allocation2 + $0x90] sm:$0xff] }
 0x13c   : > { %843 = vst.msk [vmem:[#allocation2 + $0x99] sm:$0xff] %vm605_vm3, %v824_v31  ;;  %2654 = vmatmul.msk.f32.vlgmr.msrb.gmra.mxu1 %vm605_vm3, %v3719_v32  ;;  %v3802_v63 = vld [vmem:[#allocation2 + $0x91] sm:$0xff] }
 0x13d   : > { %2728 = vmatpush.msk.msrb.mxu1 %vm936_vm2, %v1741_v15 }
 0x13e   : > { %2698 = vmatmul.msk.f32.gmra.mxu2 %vm605_vm3, %v3721_v33 }
 0x13f   : > { %v797_v35 = vpop.f32.mrf.mxu2  ;;  %2632 = vmatmul.msk.f32.gmra.mxu3 %vm605_vm3, %v3721_v33 }
 0x140   : > { %2649 = vmatmul.msk.f32.gmra.mxu0 %vm605_vm3, %v3728_v34  ;;  %v798_v36 = vadd.f32 %v3666_v38, %v797_v35 }
 0x142   : > { %v825_v37 = vmax.f32 %v798_v36, 0.0 }
 0x143   : > { %v3735_v39 = vld [vmem:[#allocation2 + $0x98] sm:$0xff] }
 0x144   : > { %844 = vst.msk [vmem:[#allocation2 + $0xa9] sm:$0xff] %vm605_vm3, %v825_v37  ;;  %2655 = vmatmul.msk.f32.gmra.mxu1 %vm605_vm3, %v3735_v39  ;;  %v3812_v4 = vld [vmem:[#allocation2 + $0x99] sm:$0xff] }
 0x146   : > { %2699 = vmatmul.msk.f32.gmra.mxu2 %vm605_vm3, %v3737_v40 }
 0x147   : > { %v800_v43 = vpop.f32.mrf.mxu2  ;;  %2633 = vmatmul.msk.f32.gmra.mxu3 %vm605_vm3, %v3737_v40 }
 0x148   : > { %2650 = vmatmul.msk.f32.gmra.mxu0 %vm605_vm3, %v3742_v41  ;;  %v801_v45 = vadd.f32 %v3666_v38, %v800_v43 }
 0x14a   : > { %v826_v46 = vmax.f32 %v801_v45, 0.0 }
 0x14b   : > { %v3753_v47 = vld [vmem:[#allocation2 + $0xa8] sm:$0xff] }
 0x14c   : > { %845 = vst.msk [vmem:[#allocation2 + $0xb1] sm:$0xff] %vm605_vm3, %v826_v46  ;;  %2656 = vmatmul.msk.f32.gmra.mxu1 %vm605_vm3, %v3753_v47  ;;  %v3822_v10 = vld [vmem:[#allocation2 + $0xa9] sm:$0xff] }
 0x14e   : > { %2700 = vmatmul.msk.f32.gmra.mxu2 %vm605_vm3, %v3755_v48 }
 0x14f   : > { %v803_v50 = vpop.f32.mrf.mxu2  ;;  %2634 = vmatmul.msk.f32.gmra.mxu3 %vm605_vm3, %v3755_v48 }
 0x150   : > { %2651 = vmatmul.msk.f32.gmra.mxu0 %vm605_vm3, %v3762_v49  ;;  %v804_v51 = vadd.f32 %v3666_v38, %v803_v50 }
 0x152   : > { %v827_v52 = vmax.f32 %v804_v51, 0.0 }
 0x153   : > { %v3769_v53 = vld [vmem:[#allocation2 + $0xb0] sm:$0xff] }
 0x154   : > { %846 = vst.msk [vmem:[#allocation2 + $0xc1] sm:$0xff] %vm605_vm3, %v827_v52  ;;  %2657 = vmatmul.msk.f32.gmra.mxu1 %vm605_vm3, %v3769_v53  ;;  %v1581_v36 = vld [vmem:[#allocation2 + $0xaa] sm:$0xff]  ;;  %v1582_v43 = vld [vmem:[#allocation2 + $0xb2] sm:$0xff] }
 0x156   : > { %2701 = vmatmul.msk.f32.gmra.mxu2 %vm605_vm3, %v3771_v54 }
 0x157   : > { %v806_v56 = vpop.f32.mrf.mxu2  ;;  %2635 = vmatmul.msk.f32.gmra.mxu3 %vm605_vm3, %v3771_v54 }
 0x158   : > { %2652 = vmatmul.msk.f32.gmra.mxu0 %vm605_vm3, %v3776_v55  ;;  %v807_v57 = vadd.f32 %v3666_v38, %v806_v56 }
 0x15a   : > { %v828_v58 = vmax.f32 %v807_v57, 0.0 }
 0x15b   : > { %v3785_v59 = vld [vmem:[#allocation2 + $0xc0] sm:$0xff] }
 0x15c   : > { %847 = vst.msk [vmem:[#allocation2 + $0xc9] sm:$0xff] %vm605_vm3, %v828_v58  ;;  %2658 = vmatmul.msk.f32.gmra.mxu1 %vm605_vm3, %v3785_v59  ;;  %v3842_v17 = vld [vmem:[#allocation2 + $0xc1] sm:$0xff] }
 0x15e   : > { %2702 = vmatmul.msk.f32.gmra.mxu2 %vm605_vm3, %v3787_v60 }
 0x15f   : > { %2636 = vmatmul.msk.f32.gmra.mxu3 %vm605_vm3, %v3787_v60  ;;  %v809_v1 = vpop.f32.mrf.mxu2 }
 0x160   : > { %2653 = vmatmul.msk.f32.gmra.mxu0 %vm605_vm3, %v3794_v61  ;;  %v810_v2 = vadd.f32 %v3666_v38, %v809_v1 }
 0x162   : > { %v829_v5 = vmax.f32 %v810_v2, 0.0 }
 0x163   : > { %v3800_v62 = vld [vmem:[#allocation2 + $0xc8] sm:$0xff] }
 0x164   : > { %2659 = vmatmul.msk.f32.gmra.mxu1 %vm605_vm3, %v3800_v62  ;;  %848 = vst.msk [vmem:[#allocation2 + $0xd9] sm:$0xff] %vm605_vm3, %v829_v5  ;;  %v3850_v20 = vld [vmem:[#allocation2 + $0xc9] sm:$0xff] }
 0x165   : > { %v1583_v46 = vld [vmem:[#allocation2 + $0xc2] sm:$0xff]  ;;  %v1584_v52 = vld [vmem:[#allocation2 + $0xca] sm:$0xff] }
 0x166   : > { %2703 = vmatmul.msk.f32.gmra.mxu2 %vm605_vm3, %v3802_v63 }
 0x167   : > { %2637 = vmatmul.msk.f32.gmra.mxu3 %vm605_vm3, %v3802_v63  ;;  %v812_v7 = vpop.f32.mrf.mxu2 }
 0x168   : > { %2712 = vmatmul.msk.f32.vlgmr.msra.gmra.mxu0 %vm605_vm3, %v1571_v0  ;;  %v813_v8 = vadd.f32 %v3666_v38, %v812_v7  ;;  %v3833_v38 = vld [vmem:[#allocation2 + $0xb1] sm:$0xff] }
 0x16a   : > { %v830_v11 = vmax.f32 %v813_v8, 0.0 }
 0x16b   : > { %v3858_v22 = vld [vmem:[#allocation2 + $0xd9] sm:$0xff] }
 0x16c   : > { %2661 = vmatmul.msk.f32.vlgmr.msra.gmra.mxu1 %vm605_vm3, %v1121_v3  ;;  %849 = vst.msk [vmem:[#allocation2 + $0xe1] sm:$0xff] %vm605_vm3, %v830_v11 }
 0x16e   : > { %2704 = vmatmul.msk.f32.gmra.mxu2 %vm605_vm3, %v3812_v4 }
 0x16f   : > { %2638 = vmatmul.msk.f32.gmra.mxu3 %vm605_vm3, %v3812_v4 }
 0x170   : > { %2713 = vmatmul.msk.f32.gmra.mxu0 %vm605_vm3, %v1572_v6 }
 0x173   : > { %v3866_v25 = vld [vmem:[#allocation2 + $0xe1] sm:$0xff] }
 0x174   : > { %2662 = vmatmul.msk.f32.gmra.mxu1 %vm605_vm3, %v1122_v9  ;;  %v2036_v8 = vld [vmem:[#allocation2 + $0xda] sm:$0xff]  ;;  %v2037_v15 = vld [vmem:[#allocation2 + $0xe2] sm:$0xff] }
 0x176   : > { %2705 = vmatmul.msk.f32.gmra.mxu2 %vm605_vm3, %v3822_v10 }
 0x177   : > { %2639 = vmatmul.msk.f32.gmra.mxu3 %vm605_vm3, %v3822_v10 }
 0x178   : > { %2714 = vmatmul.msk.f32.gmra.mxu0 %vm605_vm3, %v1573_v12 }
 0x17c   : > { %2663 = vmatmul.msk.f32.gmra.mxu1 %vm605_vm3, %v1571_v0 }
 0x17e   : > { %2706 = vmatmul.msk.f32.gmra.mxu2 %vm605_vm3, %v3833_v38 }
 0x17f   : > { %2640 = vmatmul.msk.f32.gmra.mxu3 %vm605_vm3, %v3833_v38 }
 0x180   : > { %2715 = vmatmul.msk.f32.gmra.mxu0 %vm605_vm3, %v1574_v16 }
 0x184   : > { %2664 = vmatmul.msk.f32.gmra.mxu1 %vm605_vm3, %v1572_v6 }
 0x186   : > { %2707 = vmatmul.msk.f32.gmra.mxu2 %vm605_vm3, %v3842_v17 }
 0x187   : > { %2641 = vmatmul.msk.f32.gmra.mxu3 %vm605_vm3, %v3842_v17 }
 0x188   : > { %2716 = vmatmul.msk.f32.gmra.mxu0 %vm605_vm3, %v1575_v19 }
 0x18c   : > { %2665 = vmatmul.msk.f32.gmra.mxu1 %vm605_vm3, %v1573_v12 }
 0x18e   : > { %2708 = vmatmul.msk.f32.gmra.mxu2 %vm605_vm3, %v3850_v20 }
 0x18f   : > { %2642 = vmatmul.msk.f32.gmra.mxu3 %vm605_vm3, %v3850_v20 }
 0x190   : > { %2717 = vmatmul.msk.f32.gmra.mxu0 %vm605_vm3, %v1576_v21 }
 0x194   : > { %2666 = vmatmul.msk.f32.gmra.mxu1 %vm605_vm3, %v1574_v16  ;;  %v3888_v31 = vpop.f32.mrf.mxu1 }
 0x195   : > { %v3921_v58 = vpop.f32.mrf.mxu0 }
 0x196   : > { %2709 = vmatmul.msk.f32.gmra.mxu2 %vm605_vm3, %v3858_v22 }
 0x197   : > { %2678 = vmatmul.msk.f32.vlgmr.msrb.gmra.mxu3 %vm605_vm3, %v3691_v18  ;;  %v1579_v18 = vld [vmem:[#allocation2 + $0x92] sm:$0xff] }
 0x198   : > { %2718 = vmatmul.msk.f32.gmra.mxu0 %vm605_vm3, %v1577_v24 }
 0x19c   : > { %2667 = vmatmul.msk.f32.gmra.mxu1 %vm605_vm3, %v1575_v19 }
 0x19d   : > { %v3932_v3 = vpop.f32.mrf.mxu0 }
 0x19e   : > { %2710 = vmatmul.msk.f32.gmra.mxu2 %vm605_vm3, %v3866_v25 }
 0x19f   : > { %2679 = vmatmul.msk.f32.gmra.mxu3 %vm605_vm3, %v3701_v23  ;;  %v1580_v23 = vld [vmem:[#allocation2 + $0x9a] sm:$0xff] }
 0x1a0   : > { %2719 = vmatmul.msk.f32.gmra.mxu0 %vm605_vm3, %v1578_v26 }
 0x1a2   : > { %v3874_v29 = vpop.f32.mrf.mxu3 }
 0x1a4   : > { %2668 = vmatmul.msk.f32.gmra.mxu1 %vm605_vm3, %v1576_v21 }
 0x1a5   : > { %v3945_v9 = vpop.f32.mrf.mxu0 }
 0x1a6   : > { %2763 = vmatmul.msk.f32.vlgmr.msra.gmra.mxu2 %vm605_vm3, %v1573_v12 }
 0x1a7   : > { %2680 = vmatmul.msk.f32.gmra.mxu3 %vm605_vm3, %v3710_v28 }
 0x1a8   : > { %2720 = vmatmul.msk.f32.gmra.mxu0 %vm605_vm3, %v1579_v18 }
 0x1a9   : > { %v3926_v0 = vpop.f32.mrf.mxu2 }
 0x1aa   : > { %v3881_v30 = vpop.f32.mrf.mxu3 }
 0x1ac   : > { %2669 = vmatmul.msk.f32.gmra.mxu1 %vm605_vm3, %v1577_v24 }
 0x1ae   : > { %2764 = vmatmul.msk.f32.gmra.mxu2 %vm605_vm3, %v1574_v16 }
 0x1af   : > { %2681 = vmatmul.msk.f32.gmra.mxu3 %vm605_vm3, %v3728_v34 }
 0x1b0   : > { %2721 = vmatmul.msk.f32.gmra.mxu0 %vm605_vm3, %v1580_v23 }
 0x1b1   : > { %v3936_v6 = vpop.f32.mrf.mxu2 }
 0x1b2   : > { %v3890_v35 = vpop.f32.mrf.mxu3 }
 0x1b4   : > { %2670 = vmatmul.msk.f32.gmra.mxu1 %vm605_vm3, %v1578_v26 }
 0x1b6   : > { %2765 = vmatmul.msk.f32.gmra.mxu2 %vm605_vm3, %v1575_v19 }
 0x1b7   : > { %2682 = vmatmul.msk.f32.gmra.mxu3 %vm605_vm3, %v3742_v41 }
 0x1b8   : > { %2722 = vmatmul.msk.f32.gmra.mxu0 %vm605_vm3, %v1581_v36 }
 0x1b9   : > { %v1103_v37 = vpop.f32.mrf.mxu1  ;;  %v3951_v14 = vpop.f32.mrf.mxu2 }
 0x1ba   : > { %v3897_v42 = vpop.f32.mrf.mxu3 }
 0x1bc   : > { %2671 = vmatmul.msk.f32.gmra.mxu1 %vm605_vm3, %v1579_v18 }
 0x1be   : > { %2766 = vmatmul.msk.f32.gmra.mxu2 %vm605_vm3, %v1576_v21  ;;  %v3959_v21 = vpop.f32.mrf.mxu0 }
 0x1bf   : > { %2683 = vmatmul.msk.f32.gmra.mxu3 %vm605_vm3, %v3762_v49 }
 0x1c0   : > { %2723 = vmatmul.msk.f32.gmra.mxu0 %vm605_vm3, %v1582_v43 }
 0x1c1   : > { %v1106_v44 = vpop.f32.mrf.mxu1 }
 0x1c2   : > { %v3904_v45 = vpop.f32.mrf.mxu3 }
 0x1c4   : > { %2672 = vmatmul.msk.f32.gmra.mxu1 %vm605_vm3, %v1580_v23 }
 0x1c6   : > { %2767 = vmatmul.msk.f32.gmra.mxu2 %vm605_vm3, %v1577_v24 }
 0x1c7   : > { %2684 = vmatmul.msk.f32.gmra.mxu3 %vm605_vm3, %v3776_v55 }
 0x1c8   : > { %2724 = vmatmul.msk.f32.gmra.mxu0 %vm605_vm3, %v1583_v46 }
 0x1c9   : > { %v1109_v50 = vpop.f32.mrf.mxu1 }
 0x1ca   : > { %v3911_v51 = vpop.f32.mrf.mxu3 }
 0x1cc   : > { %2673 = vmatmul.msk.f32.gmra.mxu1 %vm605_vm3, %v1581_v36 }
 0x1ce   : > { %2768 = vmatmul.msk.f32.gmra.mxu2 %vm605_vm3, %v1578_v26  ;;  %v3965_v26 = vpop.f32.mrf.mxu2 }
 0x1cf   : > { %2685 = vmatmul.msk.f32.gmra.mxu3 %vm605_vm3, %v3794_v61 }
 0x1d0   : > { %2725 = vmatmul.msk.f32.gmra.mxu0 %vm605_vm3, %v1584_v52 }
 0x1d1   : > { %v1112_v56 = vpop.f32.mrf.mxu1 }
 0x1d2   : > { %v3918_v57 = vpop.f32.mrf.mxu3 }
 0x1d4   : > { %2674 = vmatmul.msk.f32.gmra.mxu1 %vm605_vm3, %v1582_v43 }
 0x1d6   : > { %2769 = vmatmul.msk.f32.gmra.mxu2 %vm605_vm3, %v1579_v18 }
 0x1d7   : > { %2686 = vmatmul.msk.f32.gmra.mxu3 %vm605_vm3, %v3719_v32 }
 0x1d8   : > { %2726 = vmatmul.msk.f32.gmra.mxu0 %vm605_vm3, %v2036_v8 }
 0x1d9   : > { %v1115_v1 = vpop.f32.mrf.mxu1 }
 0x1da   : > { %v3928_v2 = vpop.f32.mrf.mxu3 }
 0x1dc   : > { %2675 = vmatmul.msk.f32.gmra.mxu1 %vm605_vm3, %v1583_v46 }
 0x1de   : > { %2770 = vmatmul.msk.f32.gmra.mxu2 %vm605_vm3, %v1580_v23 }
 0x1df   : > { %2687 = vmatmul.msk.f32.gmra.mxu3 %vm605_vm3, %v3735_v39 }
 0x1e0   : > { %2727 = vmatmul.msk.f32.gmra.mxu0 %vm605_vm3, %v2037_v15 }
 0x1e1   : > { %v1118_v5 = vpop.f32.mrf.mxu1 }
 0x1e2   : > { %v3938_v7 = vpop.f32.mrf.mxu3 }
 0x1e4   : > { %2676 = vmatmul.msk.f32.gmra.mxu1 %vm605_vm3, %v1584_v52 }
 0x1e6   : > { %2771 = vmatmul.msk.f32.gmra.mxu2 %vm605_vm3, %v1581_v36  ;;  %v3974_v36 = vpop.f32.mrf.mxu0 }
 0x1e7   : > { %2688 = vmatmul.msk.f32.gmra.mxu3 %vm605_vm3, %v3753_v47 }
 0x1e9   : > { %v3947_v11 = vpop.f32.mrf.mxu1 }
 0x1ea   : > { %v987_v12 = vpop.f32.mrf.mxu3 }
 0x1eb   : > { %v3949_v13 = vadd.f32 %v1103_v37, %v987_v12 }
 0x1ec   : > { %2729 = vmatmul.msk.f32.vlgmr.msrb.gmra.mxu1 %vm605_vm3, %v3710_v28 }
 0x1ee   : > { %2772 = vmatmul.msk.f32.gmra.mxu2 %vm605_vm3, %v1582_v43 }
 0x1ef   : > { %2689 = vmatmul.msk.f32.gmra.mxu3 %vm605_vm3, %v3769_v53 }
 0x1f1   : > { %v1210_v16 = vpop.f32.mrf.mxu1 }
 0x1f2   : > { %v990_v19 = vpop.f32.mrf.mxu3 }
 0x1f3   : > { %v3961_v24 = vadd.f32 %v1106_v44, %v990_v19  ;;  %v4003_v19 = vld [vmem:[#allocation2 + $0xe0] sm:$0xff] }
 0x1f4   : > { %2730 = vmatmul.msk.f32.gmra.mxu1 %vm605_vm3, %v3728_v34  ;;  %v3979_v34 = vpop.f32.mrf.mxu2 }
 0x1f5   : > { %4418 = vst [vmem:[#allocation30_spill] sm:$0xff] %v3979_v34 }
 0x1f6   : > { %2773 = vmatmul.msk.f32.gmra.mxu2 %vm605_vm3, %v1583_v46  ;;  %v3985_v46 = vld [vmem:[#allocation2 + $0xd8] sm:$0xff] }
 0x1f7   : > { %2690 = vmatmul.msk.f32.gmra.mxu3 %vm605_vm3, %v3785_v59 }
 0x1f9   : > { %v1213_v28 = vpop.f32.mrf.mxu1 }
 0x1fa   : > { %v993_v18 = vpop.f32.mrf.mxu3 }
 0x1fb   : > { %v3970_v23 = vadd.f32 %v1109_v50, %v993_v18  ;;  %v3992_v50 = vpop.f32.mrf.mxu0 }
 0x1fc   : > { %2731 = vmatmul.msk.f32.gmra.mxu1 %vm605_vm3, %v3742_v41  ;;  %v2210_v41 = vld [vmem:[%s4419_s29] sm:$0xf]  ;;  %s3110_s29 = sshra.s32 %s2415_s12, 4  ;;  %s3111_s29 = int_to_ptr.hbm [resolvable:$true] %s3110_s29 }
 0x1fd   : > { %2779 = vmatpush.msk.msrb.mxu0 %vm936_vm2, %v2210_v41  ;;  %s3112_s26 = scalar_lea.hbm %s3111_s29, 128  ;;  %p3117_p10 = scmp.lt.s32.totalorder %s3111_s29, %s4430_s24 }
 0x1fe   : > { %2774 = vmatmul.msk.f32.gmra.mxu2 %vm605_vm3, %v1584_v52  ;;  %p3113_p3 = scmp.ne.s32.totalorder %s3111_s29, %s3112_s26 }
 0x1ff   : > { %2691 = vmatmul.msk.f32.gmra.mxu3 %vm605_vm3, %v3800_v62 }
 0x200   : > { %p3114_p4 = pnand %p3113_p3, %p3410_p8 }
 0x201   : > { %v1216_v37 = vpop.f32.mrf.mxu1 }
 0x202   : > { %v996_v43 = vpop.f32.mrf.mxu3  ;;  %p3115_p5 = pneg %p3114_p4 }
 0x203   : > { %v3981_v44 = vadd.f32 %v1112_v56, %v996_v43  ;;  %v3996_v56 = vpop.f32.mrf.mxu2 }
 0x204   : > { %2732 = vmatmul.msk.f32.gmra.mxu1 %vm605_vm3, %v3762_v49  ;;  %4420 = vst [vmem:[#allocation31_spill] sm:$0xff] %v3996_v56 }
 0x206   : > { %2775 = vmatmul.msk.f32.gmra.mxu2 %vm605_vm3, %v2036_v8  ;;  %v1091_v8 = vpop.f32.mrf.mxu0 }
 0x207   : > { %2692 = vmatmul.msk.f32.gmra.mxu3 %vm605_vm3, %v3985_v46 }
 0x209   : > { %v1219_v52 = vpop.f32.mrf.mxu1 }
 0x20a   : > { %v999_v12 = vpop.f32.mrf.mxu3 }
 0x20b   : > { %v3998_v49 = vadd.f32 %v1115_v1, %v999_v12  ;;  %v4009_v34 = vpop.f32.mrf.mxu2  ;;  %v2038_v1 = vld [vmem:[#allocation2 + $0xf2] sm:$0xff] }
 0x20c   : > { %2733 = vmatmul.msk.f32.gmra.mxu1 %vm605_vm3, %v3776_v55  ;;  %4421 = vst [vmem:[#allocation32_spill] sm:$0xff] %v4009_v34 }
 0x20e   : > { %2776 = vmatmul.msk.f32.gmra.mxu2 %vm605_vm3, %v2037_v15  ;;  %v1094_v12 = vpop.f32.mrf.mxu0 }
 0x20f   : > { %2693 = vmatmul.msk.f32.gmra.mxu3 %vm605_vm3, %v4003_v19 }
 0x211   : > { %v1222_v18 = vpop.f32.mrf.mxu1 }
 0x212   : > { %v1002_v43 = vpop.f32.mrf.mxu3 }
 0x213   : > { %v4007_v41 = vadd.f32 %v1118_v5, %v1002_v43  ;;  %v2039_v5 = vld [vmem:[#allocation2 + $0xfa] sm:$0xff]  ;;  %v4020_v43 = vpop.f32.mrf.mxu2 }
 0x214   : > { %2734 = vmatmul.msk.f32.gmra.mxu1 %vm605_vm3, %v3794_v61  ;;  %4422 = vst [vmem:[#allocation33_spill] sm:$0xff] %v4020_v43  ;;  %v1077_v61 = vadd.f32 %v3932_v3, %v3874_v29  ;;  %v1080_v43 = vadd.f32 %v3945_v9, %v3881_v30 }
 0x216   : > { %2777 = vmatmul.msk.f32.gmra.mxu2 %vm605_vm3, %v2038_v1  ;;  %v1256_v1 = vadd.f32 %v1210_v16, %v1077_v61  ;;  %v1257_v3 = vadd.f32 %v1213_v28, %v1080_v43 }
 0x217   : > { %2746 = vmatmul.msk.f32.vlgmr.msra.gmra.mxu3 %vm605_vm3, %v3707_v27 }
 0x219   : > { %v1225_v55 = vpop.f32.mrf.mxu1 }
 0x21a   : > { %v4016_v15 = vpop.f32.mrf.mxu3 }
 0x21c   : > { %2735 = vmatmul.msk.f32.gmra.mxu1 %vm605_vm3, %v3719_v32  ;;  %v1097_v32 = vpop.f32.mrf.mxu0 }
 0x21d   : > { %v1098_v29 = vadd.f32 %v1097_v32, %v3928_v2 }
 0x21e   : > { %2778 = vmatmul.msk.f32.gmra.mxu2 %vm605_vm3, %v2039_v5 }
 0x21f   : > { %2747 = vmatmul.msk.f32.gmra.mxu3 %vm605_vm3, %v3721_v33 }
 0x221   : > { %v1228_v27 = vpop.f32.mrf.mxu1 }
 0x222   : > { %v1360_v34 = vpop.f32.mrf.mxu3 }
 0x223   : > { %v4027_v56 = vadd.f32 %v1360_v34, %v1256_v1  ;;  %v4040_v34 = vpop.f32.mrf.mxu2 }
 0x224   : > { %2736 = vmatmul.msk.f32.gmra.mxu1 %vm605_vm3, %v3735_v39  ;;  %v1083_v39 = vadd.f32 %v3959_v21, %v3890_v35  ;;  %v1100_v30 = vpop.f32.mrf.mxu0 }
 0x226   : > { %v1258_v2 = vadd.f32 %v1216_v37, %v1083_v39 }
 0x227   : > { %2748 = vmatmul.msk.f32.gmra.mxu3 %vm605_vm3, %v3737_v40  ;;  %v1101_v40 = vadd.f32 %v1100_v30, %v3938_v7 }
 0x229   : > { %v1231_v5 = vpop.f32.mrf.mxu1 }
 0x22a   : > { %v1263_v33 = vadd.f32 %v1231_v5, %v1098_v29  ;;  %v1363_v16 = vpop.f32.mrf.mxu3 }
 0x22b   : > { %v4036_v61 = vadd.f32 %v1363_v16, %v1257_v3  ;;  %v4055_v35 = vpop.f32.mrf.mxu2 }
 0x22c   : > { %2737 = vmatmul.msk.f32.gmra.mxu1 %vm605_vm3, %v3753_v47  ;;  %v1086_v47 = vadd.f32 %v3974_v36, %v3897_v42 }
 0x22f   : > { %2749 = vmatmul.msk.f32.gmra.mxu3 %vm605_vm3, %v3755_v48  ;;  %v1259_v48 = vadd.f32 %v1219_v52, %v1086_v47 }
 0x231   : > { %v1234_v9 = vpop.f32.mrf.mxu1 }
 0x232   : > { %v1264_v28 = vadd.f32 %v1234_v9, %v1101_v40  ;;  %v1366_v43 = vpop.f32.mrf.mxu3 }
 0x233   : > { %v4047_v1 = vadd.f32 %v1366_v43, %v1258_v2  ;;  %v4066_v36 = vpop.f32.mrf.mxu2 }
 0x234   : > { %2738 = vmatmul.msk.f32.gmra.mxu1 %vm605_vm3, %v3769_v53  ;;  %v1089_v53 = vadd.f32 %v3992_v50, %v3904_v45 }
 0x236   : > { %v1260_v42 = vadd.f32 %v1222_v18, %v1089_v53 }
 0x237   : > { %2750 = vmatmul.msk.f32.gmra.mxu3 %vm605_vm3, %v3771_v54 }
 0x239   : > { %v1237_v21 = vpop.f32.mrf.mxu1 }
 0x23a   : > { %v1265_v7 = vadd.f32 %v1237_v21, %v3949_v13  ;;  %v1369_v37 = vpop.f32.mrf.mxu3 }
 0x23b   : > { %v4058_v32 = vadd.f32 %v1369_v37, %v1259_v48  ;;  %v4079_v5 = vpop.f32.mrf.mxu2  ;;  %v1888_v37 = vld [vmem:[#allocation2 + $0xf1] sm:$0xff] }
 0x23c   : > { %2739 = vmatmul.msk.f32.gmra.mxu1 %vm605_vm3, %v3785_v59  ;;  %v1092_v59 = vadd.f32 %v1091_v8, %v3911_v51 }
 0x23e   : > { %v1261_v45 = vadd.f32 %v1225_v55, %v1092_v59 }
 0x23f   : > { %2751 = vmatmul.msk.f32.gmra.mxu3 %vm605_vm3, %v3787_v60 }
 0x241   : > { %v1240_v54 = vpop.f32.mrf.mxu1 }
 0x242   : > { %v1266_v52 = vadd.f32 %v1240_v54, %v3961_v24  ;;  %v1372_v29 = vpop.f32.mrf.mxu3  ;;  %v1095_v24 = vadd.f32 %v1094_v12, %v3918_v57 }
 0x243   : > { %v4069_v13 = vadd.f32 %v1372_v29, %v1260_v42 }
 0x244   : > { %2740 = vmatmul.msk.f32.gmra.mxu1 %vm605_vm3, %v3800_v62  ;;  %v1262_v62 = vadd.f32 %v1228_v27, %v1095_v24  ;;  %v1738_v27 = vld [vmem:[#allocation2 + $0xf0] sm:$0xff] }
 0x247   : > { %2752 = vmatmul.msk.f32.gmra.mxu3 %vm605_vm3, %v3802_v63 }
 0x249   : > { %v1243_v50 = vpop.f32.mrf.mxu1 }
 0x24a   : > { %v1267_v60 = vadd.f32 %v1243_v50, %v3970_v23  ;;  %v1375_v18 = vpop.f32.mrf.mxu3  ;;  %v4091_v23 = vpop.f32.mrf.mxu2 }
 0x24b   : > { %v4077_v3 = vadd.f32 %v1375_v18, %v1261_v45 }
 0x24c   : > { %2741 = vmatmul.msk.f32.gmra.mxu1 %vm605_vm3, %v3985_v46 }
 0x24f   : > { %2753 = vmatmul.msk.f32.gmra.mxu3 %vm605_vm3, %v3812_v4 }
 0x251   : > { %v1246_v51 = vpop.f32.mrf.mxu1 }
 0x252   : > { %v1268_v63 = vadd.f32 %v1246_v51, %v3981_v44  ;;  %v1378_v8 = vpop.f32.mrf.mxu3  ;;  %v4101_v44 = vpop.f32.mrf.mxu2 }
 0x253   : > { %v4087_v55 = vadd.f32 %v1378_v8, %v1262_v62 }
 0x254   : > { %2742 = vmatmul.msk.f32.gmra.mxu1 %vm605_vm3, %v4003_v19 }
 0x257   : > { %2754 = vmatmul.msk.f32.gmra.mxu3 %vm605_vm3, %v3822_v10  ;;  %v1739_v10 = vld [vmem:[#allocation2 + $0xf8] sm:$0xff] }
 0x259   : > { %v1249_v46 = vpop.f32.mrf.mxu1 }
 0x25a   : > { %v1269_v57 = vadd.f32 %v1249_v46, %v3998_v49  ;;  %v1381_v12 = vpop.f32.mrf.mxu3  ;;  %v4109_v49 = vpop.f32.mrf.mxu2 }
 0x25b   : > { %v4096_v4 = vadd.f32 %v1381_v12, %v1263_v33 }
 0x25c   : > { %2743 = vmatmul.msk.f32.gmra.mxu1 %vm605_vm3, %v1738_v27 }
 0x25f   : > { %2755 = vmatmul.msk.f32.gmra.mxu3 %vm605_vm3, %v3833_v38 }
 0x261   : > { %v1252_v19 = vpop.f32.mrf.mxu1 }
 0x262   : > { %v1270_v16 = vadd.f32 %v1252_v19, %v4007_v41  ;;  %v1384_v39 = vpop.f32.mrf.mxu3  ;;  %v4117_v41 = vpop.f32.mrf.mxu2 }
 0x263   : > { %v4104_v30 = vadd.f32 %v1384_v39, %v1264_v28  ;;  %v1657_v28 = vpop.f32.mrf.mxu0 }
 0x264   : > { %2744 = vmatmul.msk.f32.gmra.mxu1 %vm605_vm3, %v1739_v10 }
 0x267   : > { %2756 = vmatmul.msk.f32.gmra.mxu3 %vm605_vm3, %v3842_v17 }
 0x269   : > { %v1810_v9 = vpop.f32.mrf.mxu1 }
 0x26a   : > { %v1387_v33 = vpop.f32.mrf.mxu3  ;;  %v2110_v47 = vpop.f32.mrf.mxu2 }
 0x26b   : > { %v4111_v40 = vadd.f32 %v1387_v33, %v1265_v7  ;;  %v1660_v7 = vpop.f32.mrf.mxu0  ;;  %v1557_v33 = vadd.f32 %v3951_v14, %v4036_v61 }
 0x26f   : > { %2757 = vmatmul.msk.f32.gmra.mxu3 %vm605_vm3, %v3850_v20 }
 0x271   : > { %v1813_v48 = vpop.f32.mrf.mxu1 }
 0x272   : > { %v1390_v38 = vpop.f32.mrf.mxu3  ;;  %v2113_v53 = vpop.f32.mrf.mxu2 }
 0x273   : > { %v4115_v2 = vadd.f32 %v1390_v38, %v1266_v52  ;;  %v1663_v59 = vpop.f32.mrf.mxu0 }
 0x277   : > { %2758 = vmatmul.msk.f32.gmra.mxu3 %vm605_vm3, %v3858_v22  ;;  %v1074_v22 = vadd.f32 %v3921_v58, %v3888_v31 }
 0x279   : > { %v1816_v52 = vpop.f32.mrf.mxu1  ;;  %v1255_v29 = vadd.f32 %v3947_v11, %v1074_v22  ;;  %v1556_v11 = vadd.f32 %v3936_v6, %v4027_v56 }
 0x27a   : > { %v1393_v43 = vpop.f32.mrf.mxu3  ;;  %v2116_v50 = vpop.f32.mrf.mxu2 }
 0x27b   : > { %v4121_v17 = vadd.f32 %v1393_v43, %v1267_v60  ;;  %v1405_v45 = vadd.f32 %v4016_v15, %v1255_v29  ;;  %v1666_v31 = vpop.f32.mrf.mxu0  ;;  %v4143_v15 = vld [vmem:[%s4423_s7] ss:$0 sm:$0xff]  ;;  %v1706_v12 = vadd.f32 %v1660_v7, %v1556_v11  ;;  %s3116_s7 = scalar_lea.hbm %s4430_s24, 512 }
 0x27c   : > { %p3118_p0 = scmp.lt.s32.totalorder %s3116_s7, %s3112_s26 }
 0x27d   : > { %v1555_v18 = vadd.f32 %v3926_v0, %v1405_v45  ;;  %v1859_v19 = vadd.f32 %v1813_v48, %v1706_v12  ;;  %v1558_v48 = vadd.f32 %v3965_v26, %v4047_v1 }
 0x27e   : > { %p3119_p6 = por %p3118_p0, %p3117_p10 }
 0x27f   : > { %2759 = vmatmul.msk.f32.gmra.mxu3 %vm605_vm3, %v3866_v25  ;;  %v1889_v25 = vld [vmem:[#allocation2 + $0xf9] sm:$0xff]  ;;  %v1705_v51 = vadd.f32 %v1657_v28, %v1555_v18  ;;  %v1708_v61 = vadd.f32 %v1666_v31, %v1558_v48 }
 0x280   : > { %p3120_p2 = pnand %p3119_p6, %p3115_p5 }
 0x281   : > { %v1819_v62 = vpop.f32.mrf.mxu1  ;;  %v1858_v58 = vadd.f32 %v1810_v9, %v1705_v51  ;;  %v1707_v9 = vadd.f32 %v1663_v59, %v1557_v33 }
 0x282   : > { %v1396_v21 = vpop.f32.mrf.mxu3  ;;  %v2119_v46 = vpop.f32.mrf.mxu2  ;;  %v1861_v29 = vadd.f32 %v1819_v62, %v1708_v61  ;;  %v4425_v62 = vld [vmem:[#allocation31_spill] sm:$0xff] }
 0x283   : > { %v4125_v20 = vadd.f32 %v1396_v21, %v1268_v63  ;;  %v1669_v39 = vpop.f32.mrf.mxu0  ;;  %v1860_v43 = vadd.f32 %v1816_v52, %v1707_v9  ;;  %v4424_v52 = vld [vmem:[#allocation30_spill] sm:$0xff] }
 0x284   : > { %v1559_v45 = vadd.f32 %v4424_v52, %v4058_v32  ;;  %v1563_v52 = vadd.f32 %v4040_v34, %v4096_v4 }
 0x286   : > { %v1709_v51 = vadd.f32 %v1669_v39, %v1559_v45 }
 0x287   : > { %2760 = vmatmul.msk.f32.gmra.mxu3 %vm605_vm3, %v1888_v37 }
 0x289   : > { %v1822_v27 = vpop.f32.mrf.mxu1 }
 0x28a   : > { %v1399_v42 = vpop.f32.mrf.mxu3  ;;  %v2122_v38 = vpop.f32.mrf.mxu2 }
 0x28b   : > { %v4130_v54 = vadd.f32 %v1399_v42, %v1269_v57  ;;  %v1672_v42 = vpop.f32.mrf.mxu0 }
 0x28f   : > { %2761 = vmatmul.msk.f32.gmra.mxu3 %vm605_vm3, %v1889_v25 }
 0x291   : > { %v1825_v21 = vpop.f32.mrf.mxu1 }
 0x292   : > { %v1402_v60 = vpop.f32.mrf.mxu3 }
 0x293   : > { %v4136_v24 = vadd.f32 %v1402_v60, %v1270_v16  ;;  %v1675_v1 = vpop.f32.mrf.mxu0 }
 0x299   : > { %v1828_v18 = vpop.f32.mrf.mxu1 }
 0x29a   : > { %v1960_v63 = vpop.f32.mrf.mxu3 }
 0x29b   : > { %v2008_v8 = vadd.f32 %v1960_v63, %v1858_v58 }
 0x29d   : > { %v2158_v57 = vadd.f32 %v2110_v47, %v2008_v8  ;;  %v1560_v8 = vadd.f32 %v4425_v62, %v4069_v13 }
 0x29f   : > { %v2178_v0 = vadd.f32 %v4143_v15, %v2158_v57 }
 0x2a1   : > { %v2194_v16 = vmax.f32 %v2178_v0, 0.0  ;;  %v1831_v12 = vpop.f32.mrf.mxu1  ;;  %v1710_v0 = vadd.f32 %v1672_v42, %v1560_v8 }
 0x2a2   : > { %v1963_v10 = vpop.f32.mrf.mxu3 }
 0x2a3   : > { %v2009_v6 = vadd.f32 %v1963_v10, %v1859_v19  ;;  %2780 = vmatmul.msk.f32.vlgmr.msrb.gmra.mxu0 %vm605_vm3, %v2194_v16  ;;  %v1863_v16 = vadd.f32 %v1825_v21, %v1710_v0  ;;  %v4427_v21 = vld [vmem:[#allocation33_spill] sm:$0xff] }
 0x2a5   : > { %v2159_v56 = vadd.f32 %v2113_v53, %v2009_v6  ;;  %v2125_v53 = vpop.f32.mrf.mxu2 }
 0x2a7   : > { %v2179_v28 = vadd.f32 %v4143_v15, %v2159_v56 }
 0x2a9   : > { %v2195_v47 = vmax.f32 %v2179_v28, 0.0 }
 0x2aa   : > { %v1966_v7 = vpop.f32.mrf.mxu3 }
 0x2ab   : > { %v2010_v37 = vadd.f32 %v1966_v7, %v1860_v43  ;;  %2781 = vmatmul.msk.f32.gmra.mxu0 %vm605_vm3, %v2195_v47 }
 0x2ad   : > { %v2160_v14 = vadd.f32 %v2116_v50, %v2010_v37  ;;  %v1862_v50 = vadd.f32 %v1822_v27, %v1709_v51  ;;  %v2128_v63 = vpop.f32.mrf.mxu2  ;;  %v4426_v27 = vld [vmem:[#allocation32_spill] sm:$0xff]  ;;  %v1562_v37 = vadd.f32 %v4427_v21, %v4087_v55  ;;  %v1567_v21 = vadd.f32 %v4091_v23, %v4121_v17 }
 0x2ae   : > { %v1561_v33 = vadd.f32 %v4426_v27, %v4077_v3 }
 0x2af   : > { %v2180_v22 = vadd.f32 %v4143_v15, %v2160_v14 }
 0x2b0   : > { %v1711_v9 = vadd.f32 %v1675_v1, %v1561_v33 }
 0x2b1   : > { %v2196_v59 = vmax.f32 %v2180_v22, 0.0 }
 0x2b2   : > { %v1969_v25 = vpop.f32.mrf.mxu3  ;;  %v1864_v43 = vadd.f32 %v1828_v18, %v1711_v9 }
 0x2b3   : > { %v2011_v60 = vadd.f32 %v1969_v25, %v1861_v29  ;;  %2782 = vmatmul.msk.f32.gmra.mxu0 %vm605_vm3, %v2196_v59 }
 0x2b5   : > { %v2161_v26 = vadd.f32 %v2119_v46, %v2011_v60  ;;  %v1678_v46 = vpop.f32.mrf.mxu0  ;;  %v2131_v56 = vpop.f32.mrf.mxu2 }
 0x2b6   : > { %v1712_v61 = vadd.f32 %v1678_v46, %v1562_v37 }
 0x2b7   : > { %v2181_v58 = vadd.f32 %v4143_v15, %v2161_v26 }
 0x2b9   : > { %v2197_v31 = vmax.f32 %v2181_v58, 0.0 }
 0x2ba   : > { %v1972_v11 = vpop.f32.mrf.mxu3 }
 0x2bb   : > { %v2012_v57 = vadd.f32 %v1972_v11, %v1862_v50  ;;  %2783 = vmatmul.msk.f32.gmra.mxu0 %vm605_vm3, %v2197_v31  ;;  %v1564_v31 = vadd.f32 %v4055_v35, %v4104_v30 }
 0x2bd   : > { %v2162_v32 = vadd.f32 %v2122_v38, %v2012_v57  ;;  %v1834_v38 = vpop.f32.mrf.mxu1  ;;  %v1681_v7 = vpop.f32.mrf.mxu0 }
 0x2be   : > { %v2134_v14 = vpop.f32.mrf.mxu2  ;;  %v1713_v18 = vadd.f32 %v1681_v7, %v1563_v52 }
 0x2bf   : > { %v2182_v19 = vadd.f32 %v4143_v15, %v2162_v32 }
 0x2c0   : > { %v1866_v51 = vadd.f32 %v1834_v38, %v1713_v18 }
 0x2c1   : > { %v2198_v39 = vmax.f32 %v2182_v19, 0.0  ;;  %v1565_v19 = vadd.f32 %v4066_v36, %v4111_v40 }
 0x2c2   : > { %v1975_v10 = vpop.f32.mrf.mxu3 }
 0x2c3   : > { %v2013_v6 = vadd.f32 %v1975_v10, %v1863_v16  ;;  %2784 = vmatmul.msk.f32.gmra.mxu0 %vm605_vm3, %v2198_v39 }
 0x2c5   : > { %v2163_v13 = vadd.f32 %v2125_v53, %v2013_v6  ;;  %v1865_v53 = vadd.f32 %v1831_v12, %v1712_v61  ;;  %v1837_v59 = vpop.f32.mrf.mxu1  ;;  %v1684_v60 = vpop.f32.mrf.mxu0 }
 0x2c6   : > { %v2137_v1 = vpop.f32.mrf.mxu2  ;;  %v1714_v62 = vadd.f32 %v1684_v60, %v1564_v31 }
 0x2c7   : > { %v2183_v28 = vadd.f32 %v4143_v15, %v2163_v13 }
 0x2c8   : > { %v1867_v57 = vadd.f32 %v1837_v59, %v1714_v62 }
 0x2c9   : > { %v2199_v47 = vmax.f32 %v2183_v28, 0.0 }
 0x2ca   : > { %v1978_v48 = vpop.f32.mrf.mxu3 }
 0x2cb   : > { %v2014_v42 = vadd.f32 %v1978_v48, %v1864_v43  ;;  %2785 = vmatmul.msk.f32.gmra.mxu0 %vm605_vm3, %v2199_v47 }
 0x2cd   : > { %v2164_v3 = vadd.f32 %v2128_v63, %v2014_v42  ;;  %v1840_v11 = vpop.f32.mrf.mxu1  ;;  %v1687_v4 = vpop.f32.mrf.mxu0 }
 0x2ce   : > { %v2140_v12 = vpop.f32.mrf.mxu2  ;;  %v1715_v16 = vadd.f32 %v1687_v4, %v1565_v19  ;;  %v1570_v4 = vadd.f32 %v4117_v41, %v4136_v24 }
 0x2cf   : > { %v2184_v22 = vadd.f32 %v4143_v15, %v2164_v3 }
 0x2d0   : > { %v1868_v27 = vadd.f32 %v1840_v11, %v1715_v16  ;;  %v4208_v16 = vld [vmem:[%s4428_s28] ss:$0 sm:$0xff] }
 0x2d1   : > { %v2200_v29 = vmax.f32 %v2184_v22, 0.0 }
 0x2d2   : > { %v1981_v25 = vpop.f32.mrf.mxu3 }
 0x2d3   : > { %v2015_v45 = vadd.f32 %v1981_v25, %v1865_v53  ;;  %2786 = vmatmul.msk.f32.gmra.mxu0 %vm605_vm3, %v2200_v29  ;;  %v1568_v29 = vadd.f32 %v4101_v44, %v4125_v20 }
 0x2d5   : > { %v2165_v55 = vadd.f32 %v2131_v56, %v2015_v45  ;;  %v1843_v30 = vpop.f32.mrf.mxu1  ;;  %v1690_v10 = vpop.f32.mrf.mxu0  ;;  %v1566_v56 = vadd.f32 %v4079_v5, %v4115_v2 }
 0x2d6   : > { %v2143_v9 = vpop.f32.mrf.mxu2 }
 0x2d7   : > { %v2185_v26 = vadd.f32 %v4143_v15, %v2165_v55  ;;  %v1716_v40 = vadd.f32 %v1690_v10, %v1566_v56 }
 0x2d9   : > { %v2201_v58 = vmax.f32 %v2185_v26, 0.0  ;;  %v1869_v43 = vadd.f32 %v1843_v30, %v1716_v40  ;;  %v1569_v26 = vadd.f32 %v4109_v49, %v4130_v54  ;;  %v2213_v40 = vld [vmem:[%s3560_s27 + $0x10] sm:$0xff] }
 0x2da   : > { %v1984_v50 = vpop.f32.mrf.mxu3 }
 0x2db   : > { %v2016_v63 = vadd.f32 %v1984_v50, %v1866_v51  ;;  %2787 = vmatmul.msk.f32.gmra.mxu0 %vm605_vm3, %v2201_v58 }
 0x2dd   : > { %v2166_v34 = vadd.f32 %v2134_v14, %v2016_v63  ;;  %v1846_v38 = vpop.f32.mrf.mxu1  ;;  %v1693_v7 = vpop.f32.mrf.mxu0 }
 0x2de   : > { %v2146_v2 = vpop.f32.mrf.mxu2  ;;  %v1717_v42 = vadd.f32 %v1693_v7, %v1567_v21  ;;  %v2214_v7 = vld [vmem:[%s3560_s27 + $0x18] sm:$0xff] }
 0x2df   : > { %v2186_v8 = vadd.f32 %v4143_v15, %v2166_v34 }
 0x2e0   : > { %v1870_v14 = vadd.f32 %v1846_v38, %v1717_v42 }
 0x2e1   : > { %v2202_v32 = vmax.f32 %v2186_v8, 0.0 }
 0x2e2   : > { %v1987_v0 = vpop.f32.mrf.mxu3 }
 0x2e3   : > { %v2017_v46 = vadd.f32 %v1987_v0, %v1867_v57  ;;  %2788 = vmatmul.msk.f32.gmra.mxu0 %vm605_vm3, %v2202_v32 }
 0x2e5   : > { %v2167_v35 = vadd.f32 %v2137_v1, %v2017_v46  ;;  %v1849_v22 = vpop.f32.mrf.mxu1  ;;  %v1696_v25 = vpop.f32.mrf.mxu0 }
 0x2e6   : > { %v1718_v17 = vadd.f32 %v1696_v25, %v1568_v29  ;;  %v2149_v45 = vpop.f32.mrf.mxu2 }
 0x2e7   : > { %v2187_v39 = vadd.f32 %v4143_v15, %v2167_v35 }
 0x2e8   : > { %v1871_v60 = vadd.f32 %v1849_v22, %v1718_v17  ;;  %v2216_v22 = vld [vmem:[%s3560_s27 + $0x28] sm:$0xff] }
 0x2e9   : > { %v2203_v33 = vmax.f32 %v2187_v39, 0.0  ;;  %v2211_v39 = vld [vmem:[%s3560_s27] sm:$0xff] }
 0x2ea   : > { %v1990_v6 = vpop.f32.mrf.mxu3 }
 0x2eb   : > { %v2018_v13 = vadd.f32 %v1990_v6, %v1868_v27  ;;  %2789 = vmatmul.msk.f32.gmra.mxu0 %vm605_vm3, %v2203_v33 }
 0x2ed   : > { %v2168_v36 = vadd.f32 %v2140_v12, %v2018_v13  ;;  %v1699_v51 = vpop.f32.mrf.mxu0  ;;  %v1852_v44 = vpop.f32.mrf.mxu1 }
 0x2ee   : > { %v1719_v58 = vadd.f32 %v1699_v51, %v1569_v26  ;;  %v2152_v11 = vpop.f32.mrf.mxu2 }
 0x2ef   : > { %v2188_v28 = vadd.f32 %v4143_v15, %v2168_v36 }
 0x2f0   : > { %v1872_v31 = vadd.f32 %v1852_v44, %v1719_v58  ;;  %v2219_v44 = vld [vmem:[%s3560_s27 + $0x40] sm:$0xff] }
 0x2f1   : > { %v2204_v47 = vmax.f32 %v2188_v28, 0.0 }
 0x2f2   : > { %v1993_v48 = vpop.f32.mrf.mxu3 }
 0x2f3   : > { %v2019_v37 = vadd.f32 %v1993_v48, %v1869_v43  ;;  %2790 = vmatmul.msk.f32.gmra.mxu0 %vm605_vm3, %v2204_v47 }
 0x2f5   : > { %v2169_v5 = vadd.f32 %v2143_v9, %v2019_v37  ;;  %v1702_v54 = vpop.f32.mrf.mxu0  ;;  %v1855_v8 = vpop.f32.mrf.mxu1 }
 0x2f6   : > { %v1720_v57 = vadd.f32 %v1702_v54, %v1570_v4  ;;  %v2155_v35 = vpop.f32.mrf.mxu2 }
 0x2f7   : > { %v2189_v3 = vadd.f32 %v4143_v15, %v2169_v5 }
 0x2f8   : > { %v1873_v12 = vadd.f32 %v1855_v8, %v1720_v57 }
 0x2f9   : > { %v2205_v61 = vmax.f32 %v2189_v3, 0.0 }
 0x2fa   : > { %v1996_v53 = vpop.f32.mrf.mxu3 }
 0x2fb   : > { %v2020_v59 = vadd.f32 %v1996_v53, %v1870_v14  ;;  %2791 = vmatmul.msk.f32.gmra.mxu0 %vm605_vm3, %v2205_v61 }
 0x2fd   : > { %v2170_v23 = vadd.f32 %v2146_v2, %v2020_v59  ;;  %v2215_v2 = vld [vmem:[%s3560_s27 + $0x20] sm:$0xff] }
 0x2ff   : > { %v2190_v52 = vadd.f32 %v4143_v15, %v2170_v23  ;;  %v2217_v23 = vld [vmem:[%s3560_s27 + $0x30] sm:$0xff] }
 0x301   : > { %v2206_v55 = vmax.f32 %v2190_v52, 0.0 }
 0x302   : > { %v1999_v18 = vpop.f32.mrf.mxu3 }
 0x303   : > { %v2021_v1 = vadd.f32 %v1999_v18, %v1871_v60  ;;  %2792 = vmatmul.msk.f32.gmra.mxu0 %vm605_vm3, %v2206_v55  ;;  %v2218_v55 = vld [vmem:[%s3560_s27 + $0x38] sm:$0xff] }
 0x305   : > { %v2171_v20 = vadd.f32 %v2149_v45, %v2021_v1 }
 0x307   : > { %v2191_v50 = vadd.f32 %v4143_v15, %v2171_v20 }
 0x309   : > { %v2207_v63 = vmax.f32 %v2191_v50, 0.0 }
 0x30a   : > { %v2002_v34 = vpop.f32.mrf.mxu3 }
 0x30b   : > { %v2022_v62 = vadd.f32 %v2002_v34, %v1872_v31  ;;  %2793 = vmatmul.msk.f32.gmra.mxu0 %vm605_vm3, %v2207_v63  ;;  %v2220_v63 = vld [vmem:[%s3560_s27 + $0x48] sm:$0xff] }
 0x30d   : > { %v2172_v49 = vadd.f32 %v2152_v11, %v2022_v62 }
 0x30f   : > { %v2192_v32 = vadd.f32 %v4143_v15, %v2172_v49  ;;  %v2221_v49 = vld [vmem:[%s3560_s27 + $0x50] sm:$0xff] }
 0x311   : > { %v2208_v0 = vmax.f32 %v2192_v32, 0.0 }
 0x312   : > { %v2005_v19 = vpop.f32.mrf.mxu3 }
 0x313   : > { %v2023_v46 = vadd.f32 %v2005_v19, %v1873_v12  ;;  %2794 = vmatmul.msk.f32.gmra.mxu0 %vm605_vm3, %v2208_v0  ;;  %v2222_v12 = vld [vmem:[%s3560_s27 + $0x58] sm:$0xff] }
 0x315   : > { %v2173_v41 = vadd.f32 %v2155_v35, %v2023_v46 }
 0x317   : > { %v2193_v24 = vadd.f32 %v4143_v15, %v2173_v41  ;;  %v2212_v15 = vld [vmem:[%s3560_s27 + $0x8] sm:$0xff]  ;;  %v2223_v41 = vld [vmem:[%s3560_s27 + $0x60] sm:$0xff] }
 0x319   : > { %v2209_v30 = vmax.f32 %v2193_v24, 0.0 }
 0x31b   : > { %2795 = vmatmul.msk.f32.gmra.mxu0 %vm605_vm3, %v2209_v30 }
 0x320   : > { %v2299_v10 = vpop.f32.mrf.mxu0 }
 0x321   : > { %v2300_v27 = vadd.f32 %v4208_v16, %v2299_v10 }
 0x323   : > { %v2347_v33 = vadd.f32 %v2300_v27, %v2211_v39  ;;  %v2224_v27 = vld [vmem:[%s3560_s27 + $0x68] sm:$0xff] }
 0x325   : > { %v2363_v6 = vmax.f32 %v2347_v33, 0.0 }
 0x327   : > { %2380 = vst.msk [vmem:[%s4213_s17] sm:$0xff] %vm554_vm0, %v2363_v6 }
 0x328   : > { %v2302_v56 = vpop.f32.mrf.mxu0 }
 0x329   : > { %v2303_v13 = vadd.f32 %v4208_v16, %v2302_v56 }
 0x32b   : > { %v2348_v9 = vadd.f32 %v2303_v13, %v2212_v15  ;;  %v2225_v13 = vld [vmem:[%s3560_s27 + $0x70] sm:$0xff] }
 0x32d   : > { %v2364_v36 = vmax.f32 %v2348_v9, 0.0 }
 0x32f   : > { %2381 = vst.msk [vmem:[%s4213_s17 + $0x8] sm:$0xff] %vm554_vm0, %v2364_v36 }
 0x330   : > { %v2305_v28 = vpop.f32.mrf.mxu0 }
 0x331   : > { %v2306_v38 = vadd.f32 %v4208_v16, %v2305_v28 }
 0x333   : > { %v2349_v43 = vadd.f32 %v2306_v38, %v2213_v40  ;;  %v2226_v38 = vld [vmem:[%s3560_s27 + $0x78] sm:$0xff] }
 0x335   : > { %v2365_v47 = vmax.f32 %v2349_v43, 0.0 }
 0x337   : > { %2382 = vst.msk [vmem:[%s4213_s17 + $0x10] sm:$0xff] %vm554_vm0, %v2365_v47 }
 0x338   : > { %v2308_v48 = vpop.f32.mrf.mxu0 }
 0x339   : > { %v2309_v21 = vadd.f32 %v4208_v16, %v2308_v48 }
 0x33b   : > { %v2350_v37 = vadd.f32 %v2309_v21, %v2214_v7 }
 0x33d   : > { %v2366_v5 = vmax.f32 %v2350_v37, 0.0 }
 0x33f   : > { %2383 = vst.msk [vmem:[%s4213_s17 + $0x18] sm:$0xff] %vm554_vm0, %v2366_v5 }
 0x340   : > { %v2311_v42 = vpop.f32.mrf.mxu0 }
 0x341   : > { %v2312_v3 = vadd.f32 %v4208_v16, %v2311_v42 }
 0x343   : > { %v2351_v14 = vadd.f32 %v2312_v3, %v2215_v2 }
 0x345   : > { %v2367_v61 = vmax.f32 %v2351_v14, 0.0 }
 0x347   : > { %2384 = vst.msk [vmem:[%s4213_s17 + $0x20] sm:$0xff] %vm554_vm0, %v2367_v61 }
 0x348   : > { %v2314_v53 = vpop.f32.mrf.mxu0 }
 0x349   : > { %v2315_v29 = vadd.f32 %v4208_v16, %v2314_v53 }
 0x34b   : > { %v2352_v59 = vadd.f32 %v2315_v29, %v2216_v22 }
 0x34d   : > { %v2368_v25 = vmax.f32 %v2352_v59, 0.0 }
 0x34f   : > { %2385 = vst.msk [vmem:[%s4213_s17 + $0x28] sm:$0xff] %vm554_vm0, %v2368_v25 }
 0x350   : > { %v2317_v17 = vpop.f32.mrf.mxu0 }
 0x351   : > { %v2318_v52 = vadd.f32 %v4208_v16, %v2317_v17 }
 0x353   : > { %v2353_v45 = vadd.f32 %v2318_v52, %v2217_v23 }
 0x355   : > { %v2369_v60 = vmax.f32 %v2353_v45, 0.0 }
 0x357   : > { %2386 = vst.msk [vmem:[%s4213_s17 + $0x30] sm:$0xff] %vm554_vm0, %v2369_v60 }
 0x358   : > { %v2320_v18 = vpop.f32.mrf.mxu0 }
 0x359   : > { %v2321_v26 = vadd.f32 %v4208_v16, %v2320_v18 }
 0x35b   : > { %v2354_v1 = vadd.f32 %v2321_v26, %v2218_v55 }
 0x35d   : > { %v2370_v51 = vmax.f32 %v2354_v1, 0.0 }
 0x35f   : > { %2387 = vst.msk [vmem:[%s4213_s17 + $0x38] sm:$0xff] %vm554_vm0, %v2370_v51 }
 0x360   : > { %v2323_v20 = vpop.f32.mrf.mxu0 }
 0x361   : > { %v2324_v58 = vadd.f32 %v4208_v16, %v2323_v20 }
 0x363   : > { %v2355_v50 = vadd.f32 %v2324_v58, %v2219_v44 }
 0x365   : > { %v2371_v31 = vmax.f32 %v2355_v50, 0.0 }
 0x367   : > { %2388 = vst.msk [vmem:[%s4213_s17 + $0x40] sm:$0xff] %vm554_vm0, %v2371_v31 }
 0x368   : > { %v2326_v11 = vpop.f32.mrf.mxu0 }
 0x369   : > { %v2327_v34 = vadd.f32 %v4208_v16, %v2326_v11 }
 0x36b   : > { %v2356_v4 = vadd.f32 %v2327_v34, %v2220_v63 }
 0x36d   : > { %v2372_v62 = vmax.f32 %v2356_v4, 0.0 }
 0x36f   : > { %2389 = vst.msk [vmem:[%s4213_s17 + $0x48] sm:$0xff] %vm554_vm0, %v2372_v62 }
 0x370   : > { %v2329_v54 = vpop.f32.mrf.mxu0 }
 0x371   : > { %v2330_v8 = vadd.f32 %v4208_v16, %v2329_v54 }
 0x373   : > { %v2357_v57 = vadd.f32 %v2330_v8, %v2221_v49 }
 0x375   : > { %v2373_v32 = vmax.f32 %v2357_v57, 0.0 }
 0x377   : > { %2390 = vst.msk [vmem:[%s4213_s17 + $0x50] sm:$0xff] %vm554_vm0, %v2373_v32 }
 0x378   : > { %v2332_v0 = vpop.f32.mrf.mxu0 }
 0x379   : > { %v2333_v19 = vadd.f32 %v4208_v16, %v2332_v0 }
 0x37b   : > { %v2358_v46 = vadd.f32 %v2333_v19, %v2222_v12 }
 0x37d   : > { %v2374_v35 = vmax.f32 %v2358_v46, 0.0 }
 0x37f   : > { %2391 = vst.msk [vmem:[%s4213_s17 + $0x58] sm:$0xff] %vm554_vm0, %v2374_v35 }
 0x380   : > { %v2335_v24 = vpop.f32.mrf.mxu0 }
 0x381   : > { %v2336_v30 = vadd.f32 %v4208_v16, %v2335_v24 }
 0x383   : > { %v2359_v39 = vadd.f32 %v2336_v30, %v2223_v41 }
 0x385   : > { %v2375_v10 = vmax.f32 %v2359_v39, 0.0 }
 0x387   : > { %2392 = vst.msk [vmem:[%s4213_s17 + $0x60] sm:$0xff] %vm554_vm0, %v2375_v10 }
 0x388   : > { %v2338_v33 = vpop.f32.mrf.mxu0 }
 0x389   : > { %v2339_v6 = vadd.f32 %v4208_v16, %v2338_v33 }
 0x38b   : > { %v2360_v15 = vadd.f32 %v2339_v6, %v2224_v27 }
 0x38d   : > { %v2376_v56 = vmax.f32 %v2360_v15, 0.0 }
 0x38f   : > { %2393 = vst.msk [vmem:[%s4213_s17 + $0x68] sm:$0xff] %vm554_vm0, %v2376_v56 }
 0x390   : > { %v2341_v9 = vpop.f32.mrf.mxu0 }
 0x391   : > { %v2342_v36 = vadd.f32 %v4208_v16, %v2341_v9 }
 0x393   : > { %v2361_v40 = vadd.f32 %v2342_v36, %v2225_v13 }
 0x395   : > { %v2377_v28 = vmax.f32 %v2361_v40, 0.0 }
 0x397   : > { %2394 = vst.msk [vmem:[%s4213_s17 + $0x70] sm:$0xff] %vm554_vm0, %v2377_v28 }
 0x398   : > { %v2344_v43 = vpop.f32.mrf.mxu0 }
 0x399   : > { %v2345_v47 = vadd.f32 %v4208_v16, %v2344_v43 }
 0x39b   : > { %v2362_v7 = vadd.f32 %v2345_v47, %v2226_v38 }
 0x39d   : > { %v2378_v48 = vmax.f32 %v2362_v7, 0.0 }
 0x39f   : > { %2395 = vst.msk [vmem:[%s4213_s17 + $0x78] sm:$0xff] %vm554_vm0, %v2378_v48 }
 0x3a0   : > { %3123 = shalt.err (!%p3120_p2)
}
 0x3a1   : > { %s3262_s14 = smov 128   ;;  %s3263_s28 = smov 8  }
 0x3a2   : > { %2827 = dma.vmem_to_hbm [thread:$0]  (%p3410_p8), %s2413_s18, 2048, %s2415_s12, %s2397_s19, %s3262_s14, %s3262_s14, %s3263_s28  }
 0x3a3 PF: > { %s4432_s17 = sld [smem:[#allocation17_spill]]  ;;  %p2850_p12 = scmp.ge.s32.totalorder %s3254_s22, 2 }
 0x3a5   : > { %p2844_p1 = pnand %p2850_p12, %p3417_p9 }
 0x3a7   : > { %p2845_p7 = pneg %p2844_p1 }
 0x3a9   : > { %s2429_s5 = sand.u32 1, %s4432_s17  }
 0x3aa   : > { %s2430_s8 = scalar_lea.sflag [#allocation5], %s2429_s5 }
 0x3ab   : > { %3197 = dma.done.wait (%p2845_p7), %s2430_s8, 2048  }
 0x3ac   : > { %3199 = vsyncadd (%p2845_p7), %s2430_s8, 4294965248  ;;  %s29_s22 = sadd.s32 1, %s3254_s22   ;;  %s4435_s0 = smov %s3530_s30 }
 0x3ad   : > { %p4300_p11 = scmp.ge.s32.totalorder %s29_s22, 6   ;;  %s4436_s20 = sld [smem:[#allocation18_spill]] }
 0x3ae   : > { %s4437_s14 = sld [smem:[#allocation28_spill]]  ;;  %s4444_s30 = smov %s3206_s10 }
 0x3af   : > { %s4438_s1 = sld [smem:[#allocation19_spill]]  ;;  %s4445_s10 = smov %s3210_s11 }
 0x3b0   : > { %s4439_s17 = sld [smem:[#allocation29_spill]]  ;;  %s4446_s11 = smov %s4435_s0 }
 0x3b1   : > { %s4440_s18 = sld [smem:[#allocation22_spill]]  ;;  %s4447_s12 = smov %s3218_s13 }
 0x3b2   : > { %s4441_s19 = sld [smem:[#allocation23_spill]]  ;;  %s4449_s15 = smov %s3230_s16 }
 0x3b3   : > { %s4442_s21 = sld [smem:[#allocation24_spill]]  ;;  %s4448_s13 = smov %s4436_s20 }
 0x3b4   : > { %s4443_s23 = sld [smem:[#allocation25_spill]] }
 0x3b5   : > { %s4450_s16 = smov %s4438_s1 }
 0x3b6   :  { %28 = sbr.rel (!%p4300_p11) target bundleno = 24 (0x18), region = 143 }
 0x3b9   : > { %s4451_s20 = smov %s4442_s21 }
 0x3ba   : > { %s4452_s21 = smov %s4443_s23 }
 0x3bb   :  { %2436 = vsyncpa [#allocation4], 1 }
 0x3bc   :  { %2438 = vsyncpa [#allocation4 + $0x1], 1 }
 0x3bd   :  { %2439 = vsyncpa [#allocation7], 1 }
 0x3be   :  { %2441 = vsyncpa [#allocation7 + $0x1], 1 }
 0x3bf   :  { %2442 = vsyncpa [#allocation10], 1 }
 0x3c0   :  { %2443 = vsyncpa [#allocation5], 1 }
 0x3c1   :  { %2445 = vsyncpa [#allocation5 + $0x1], 1 }

// kernel: tpu_custom_call.1
= control target key start
LH: loop header
LB: loop body
LE: loop exit
PB: predicated region body
PF: predicated region fallthrough
CT: control target
= control target key end

     0   :  { %s4347_s0 = inlined_call_operand.hbm [shape: f32[2,16,16,16], index: 0, kind: input, shape index: {}]   ;;  %s4348_s1 = inlined_call_operand.hbm [shape: f32[2,16,16,16], index: 1, kind: input, shape index: {}]   ;;  %s4349_s2 = inlined_call_operand.hbm [shape: f32[2,16,16,16], index: 2, kind: input, shape index: {}]   ;;  %s4350_s3 = inlined_call_operand.vmem [shape: f32[16,4], index: 3, kind: input, shape index: {}]   ;;  %s4351_s4 = inlined_call_operand.vmem [shape: f32[1,4], index: 4, kind: input, shape index: {}]   ;;  %s4352_s5 = inlined_call_operand.hbm [shape: f32[3,3,4,4], index: 5, kind: input, shape index: {}]   ;;  %s4353_s6 = inlined_call_operand.vmem [shape: f32[1,4], index: 6, kind: input, shape index: {}]   ;;  %s4354_s7 = inlined_call_operand.vmem [shape: f32[4,16], index: 7, kind: input, shape index: {}]   ;;  %s4355_s8 = inlined_call_operand.vmem [shape: f32[1,16], index: 8, kind: input, shape index: {}]   ;;  %s4356_s9 = inlined_call_operand.hbm [shape: f32[2,16,16,16], index: 9, kind: output, shape index: {}]  }
   0x1   :  { %4376 = sst [smem:[#allocation34_spill]] %s4347_s0 }
   0x2   :  { %4377 = sst [smem:[#allocation35_spill]] %s4348_s1 }
   0x3   :  { %4378 = sst [smem:[#allocation36_spill]] %s4349_s2 }
   0x4   :  { %4379 = sst [smem:[#allocation37_spill]] %s4350_s3 }
   0x5   :  { %4380 = sst [smem:[#allocation38_spill]] %s4351_s4 }
   0x6   :  { %4381 = sst [smem:[#allocation39_spill]] %s4352_s5 }
   0x7   :  { %4382 = sst [smem:[#allocation40_spill]] %s4353_s6 }
   0x8   :  { %4383 = sst [smem:[#allocation41_spill]] %s4354_s7 }
   0x9   :  { %4384 = sst [smem:[#allocation42_spill]] %s4355_s8 }
   0xa   :  { %4385 = sst [smem:[#allocation43_spill]] %s4356_s9 }
   0xb   :  { %14 = vsyncpa [#allocation4], 0 }
   0xc   :  { %16 = vsyncpa [#allocation4 + $0x1], 0 }
   0xd   :  { %17 = vsyncpa [#allocation7], 0 }
   0xe   :  { %19 = vsyncpa [#allocation7 + $0x1], 0 }
   0xf   :  { %20 = vsyncpa [#allocation10], 0 }
  0x10   :  { %21 = vsyncpa [#allocation5], 0 }
  0x11   :  { %23 = vsyncpa [#allocation5 + $0x1], 0  ;;  %s3314_s30 = smov 0   ;;  %s3316_s10 = smov 0  }
  0x12   :  { %s3318_s11 = smov 0   ;;  %s3320_s12 = smov 0  }
  0x13   :  { %s3322_s13 = smov 0   ;;  %s3324_s14 = smov 0  }
  0x14   :  { %s3326_s15 = smov 0   ;;  %s3328_s16 = smov 0  }
  0x15   :  { %s3330_s17 = smov 0   ;;  %s3332_s18 = smov 0  }
  0x16   :  { %s3334_s19 = smov 0   ;;  %s3336_s20 = smov 0  }
  0x17   :  { %s3338_s21 = smov 0   ;;  %s3340_s22 = smov 0  }
  0x18 LB: > { %4386 = sst [smem:[#allocation17_spill]] %s3214_s12  ;;  %s3385_s23 = sadd.s32 4294967295, %s3254_s22   ;;  %s3254_s22 = sphi %s3340_s22, %s29_s22   ;;  %s3250_s21 = sphi %s3338_s21, %s4452_s21   ;;  %s3246_s20 = sphi %s3336_s20, %s4451_s20   ;;  %s3242_s19 = sphi %s3334_s19, %s4441_s19   ;;  %s3238_s18 = sphi %s3332_s18, %s4440_s18   ;;  %s3234_s17 = sphi %s3330_s17, %s4439_s17   ;;  %s3230_s16 = sphi %s3328_s16, %s4450_s16   ;;  %s3226_s15 = sphi %s3326_s15, %s4449_s15   ;;  %s3222_s14 = sphi %s3324_s14, %s4437_s14   ;;  %s3218_s13 = sphi %s3322_s13, %s4448_s13   ;;  %s3214_s12 = sphi %s3320_s12, %s4447_s12   ;;  %s3210_s11 = sphi %s3318_s11, %s4446_s11   ;;  %s3206_s10 = sphi %s3316_s10, %s4445_s10   ;;  %s3202_s30 = sphi %s3314_s30, %s4444_s30  }
  0x19   : > { %4387 = sst [smem:[#allocation18_spill]] %s3222_s14  ;;  %s2568_s24 = sadd.s32 4294967294, %s3254_s22  }
  0x1a   : > { %4388 = sst [smem:[#allocation19_spill]] %s3234_s17  ;;  %s38_s25 = sadd.s32 1, %s3246_s20 }
  0x1b   : > { %4389 = sst [smem:[#allocation20_spill]] %s3238_s18  ;;  %s41_s26 = sadd.s32 1, %s3250_s21 }
  0x1c   : > { %4390 = sst [smem:[#allocation21_spill]] %s3242_s19  ;;  %p39_p0 = scmp.ge.s32.totalorder %s38_s25, 2 }
  0x1d   : > { %4391 = sst [smem:[#allocation22_spill]] %s3246_s20  ;;  %p66_p1 = scmp.eq.s32.totalorder %s3254_s22, 0 }
  0x1e   : > { %4392 = sst [smem:[#allocation23_spill]] %s3250_s21  ;;  %s86_s27 = sadd.s32 1, %s3222_s14 }
  0x1f   : > { %p93_p2 = scmp.ne.s32.totalorder %s3222_s14, %s3218_s13  ;;  %s4454_s25 = smov (%p39_p0, %s38_s25), 0 }
  0x20   : > { %4393 = sst [smem:[#allocation24_spill]] %s4454_s25  ;;  %s4456_s26 = smov (!%p39_p0, %s41_s26), %s3250_s21 }
  0x21   : > { %s82_s28 = ssub.s32 %s3246_s20, %s4454_s25  ;;  %p3401_p3 = por %p93_p2, %p66_p1 }
  0x22   : > { %p43_p4 = scmp.ge.s32.totalorder %s4456_s26, 2  ;;  %p99_p5 = scmp.ne.s32.totalorder %s3218_s13, %s3214_s12 }
  0x23   : > { %p287_p6 = scmp.eq.s32.totalorder %s3385_s23, 3  ;;  %p293_p7 = scmp.eq.s32.totalorder %s2568_s24, 3 }
  0x24   : > { %s4458_s26 = smov (%p43_p4, %s4456_s26), 0  ;;  %p4373_p11 = scmp.lt.s32.totalorder %s3254_s22, 4 }
  0x25   : > { %4395 = sst [smem:[#allocation25_spill]] %s4458_s26  ;;  %p3410_p8 = por %p287_p6, %p93_p2 }
  0x26   : > { %p3417_p9 = por %p293_p7, %p99_p5  ;;  %s3423_s8 = ssub.s32 %s3250_s21, %s4458_s26 }
  0x27   : > { %s4396_s9 = scalar_select %p3410_p8, 1, 0 }
  0x28   : > { %s4398_s19 = scalar_select %p3417_p9, 1, 0 }
  0x29   : > { %4397 = sst [smem:[#allocation26_spill]] %s4396_s9  ;;  %s83_s6 = sor.u32 %s82_s28, %s3423_s8 }
  0x2a   : > { %4399 = sst [smem:[#allocation27_spill]] %s4398_s19  ;;  %p84_p10 = scmp.eq.s32.totalorder %s83_s6, 0 }
  0x2b   : > { %s3428_s24 = sshll.u32 %s3250_s21, 5  ;;  %s371_s4 = sand.u32 1, %s3254_s22  }
  0x2c   : > { %s3431_s7 = scalar_select %p84_p10, %s3222_s14, %s86_s27  }
  0x2d   : > { %s373_s9 = sand.u32 1, %s3222_s14   ;;  %s2808_s3 = sshll.u32 %s3246_s20, 4 }
  0x2e   : > { %4400 = sst [smem:[#allocation28_spill]] %s3431_s7  ;;  %s2585_s18 = sshll.u32 %s373_s9, 7 }
  0x2f   : > { %s381_s26 = sadd.s32 %s2808_s3, %s3428_s24  ;;  %s375_s28 = scalar_lea.vmem [#allocation6], %s2585_s18 }
  0x30   : > { %s2589_s19 = sshll.u32 %s381_s26, 3  ;;  %s386_s6 = sshll.u32 %s375_s28, 4  ;;  %s387_s6 = int_to_ptr.vmem [resolvable:$true] %s386_s6 }
  0x31   : > { %s4401_s1 = sld [smem:[#allocation35_spill]]  ;;  %p2837_p12 = pnand %p4373_p11, %p3401_p3 }
  0x32   : > { %s3444_s9 = scalar_lea.sflag [#allocation7], %s371_s4  ;;  %s4366_s3 = smov 128  }
  0x33   : > { %s4368_s26 = smov 8   ;;  %p72_p13 = scmp.eq.s32.totalorder %s3385_s23, 0 }
  0x34   : > { %p2575_p0 = scmp.ge.s32.totalorder %s3254_s22, 1  ;;  %p300_p2 = scmp.lt.s32.totalorder %s3254_s22, 5 }
  0x35   : > { %s4402_s5 = sld [smem:[#allocation39_spill]]  ;;  %p3461_p3 = por %p99_p5, %p72_p13 }
  0x36   : > { %p3465_p4 = pnand %p2575_p0, %p300_p2  ;;  %s3258_s21 = smov [#allocation9]  }
  0x37   : > { %s383_s0 = scalar_lea.hbm %s4401_s1, %s2589_s19  ;;  %s319_s29 = sshll.u32 %s3258_s21, 4  ;;  %s320_s29 = int_to_ptr.vmem [resolvable:$true] %s319_s29 }
  0x38   : > { %s384_s27 = sshll.u32 %s383_s0, 4  ;;  %p2829_p6 = pneg %p3465_p4  ;;  %s385_s27 = int_to_ptr.hbm [resolvable:$true] %s384_s27 }
  0x39   : > { %2839 = dma.hbm_to_vmem [thread:$0]  (!%p2837_p12), %s385_s27, 2048, %s387_s6, %s3444_s9, %s4366_s3, %s4366_s3, %s4368_s26  }
  0x3a   : > { %p2830_p5 = pnand %p2829_p6, %p72_p13  ;;  %s3259_s28 = smov 64  }
  0x3b   : > { %s317_s18 = sshll.u32 %s4402_s5, 4  ;;  %s3260_s6 = smov 4   ;;  %s318_s18 = int_to_ptr.hbm [resolvable:$true] %s317_s18 }
  0x3c   : > { %2832 = dma.hbm_to_vmem [thread:$0]  (!%p2830_p5), %s318_s18, 576, %s320_s29, [#allocation10], %s3259_s28, %s3259_s28, %s3260_s6  }
  0x3d   : > { %s2569_s27 = sshll.u32 %s3246_s20, 2  ;;  %s2571_s2 = sshll.u32 %s4454_s25, 2 }
  0x3e   : > { %s2570_s0 = sadd.s32 4294967295, %s2569_s27  ;;  %s2572_s21 = sadd.s32 4294967295, %s2571_s2 }
  0x3f   : > { %p47_p7 = scmp.gt.s32.totalorder %s2570_s0, 0  ;;  %p51_p10 = scmp.gt.s32.totalorder %s2572_s21, 0 }
  0x40   : > { %s58_s3 = sadd.s32 1, %s3234_s17  ;;  %p65_p12 = scmp.ne.s32.totalorder %s3234_s17, %s3230_s16 }
  0x41   : > { %s4460_s0 = smov (!%p47_p7, %s2570_s0), 0  ;;  %s4462_s21 = smov (!%p51_p10, %s2572_s21), 0 }
  0x42   : > { %p71_p0 = scmp.ne.s32.totalorder %s3230_s16, %s3226_s15  ;;  %s54_s26 = ssub.s32 %s4460_s0, %s4462_s21 }
  0x43   : > { %s2804_s1 = sadd.s32 4, %s2569_s27  ;;  %s55_s5 = sor.u32 %s54_s26, %s3423_s8 }
  0x44   : > { %p3483_p2 = por %p66_p1, %p65_p12  ;;  %p56_p6 = scmp.eq.s32.totalorder %s55_s5, 0 }
  0x45   : > { %p3489_p5 = por %p72_p13, %p71_p0  ;;  %p111_p7 = scmp.lt.s32.totalorder %s2804_s1, 7 }
  0x46   : > { %s2806_s28 = sadd.s32 4, %s2571_s2  ;;  %s342_s15 = sand.u32 1, %s3234_s17  }
  0x47   : > { %s3494_s6 = scalar_select %p56_p6, %s3234_s17, %s58_s3  }
  0x48   : > { %p115_p10 = scmp.lt.s32.totalorder %s2806_s28, 7  ;;  %s2578_s26 = sshll.u32 %s342_s15, 5 }
  0x49   : > { %4407 = sst [smem:[#allocation29_spill]] %s3494_s6  ;;  %s2807_s27 = sshll.u32 %s4460_s0, 2 }
  0x4a   : > { %s356_s21 = sadd.s32 %s2807_s27, %s3428_s24  ;;  %s346_s5 = scalar_lea.vmem [#allocation3], %s2578_s26 }
  0x4b   : > { %s361_s25 = sshll.u32 %s346_s5, 4  ;;  %s2584_s20 = sshll.u32 %s356_s21, 3  ;;  %s362_s25 = int_to_ptr.vmem [resolvable:$true] %s361_s25 }
  0x4c   : > { %s4408_s6 = sld [smem:[#allocation34_spill]]  ;;  %p2834_p12 = pnand %p4373_p11, %p3483_p2 }
  0x4d   : > { %s343_s0 = scalar_lea.sflag [#allocation4], %s342_s15  ;;  %s4409_s27 = smov 8  }
  0x4e   : > { %s4410_s26 = smov 128   ;;  %s122_s21 = sadd.s32 1, %s3210_s11 }
  0x4f   : > { %s4464_s1 = smov (!%p111_p7, %s2804_s1), 7  ;;  %s4466_s28 = smov (!%p115_p10, %s2806_s28), 7 }
  0x50   : > { %p129_p0 = scmp.ne.s32.totalorder %s3210_s11, %s3206_s10  ;;  %p135_p6 = scmp.ne.s32.totalorder %s3206_s10, %s3202_s30 }
  0x51   : > { %s398_s18 = sand.u32 1, %s3210_s11   ;;  %s2811_s15 = sshll.u32 %s4464_s1, 2 }
  0x52   : > { %s358_s7 = scalar_lea.hbm %s4408_s6, %s2584_s20  ;;  %s118_s20 = ssub.s32 %s4464_s1, %s4466_s28 }
  0x53   : > { %s359_s17 = sshll.u32 %s358_s7, 4  ;;  %s119_s6 = sor.u32 %s118_s20, %s3423_s8  ;;  %s360_s17 = int_to_ptr.hbm [resolvable:$true] %s359_s17 }
  0x54   : > { %2836 = dma.hbm_to_vmem [thread:$0]  (!%p2834_p12), %s360_s17, 512, %s362_s25, %s343_s0, %s4410_s26, %s4410_s26, %s4409_s27  }
  0x55   : > { %p3519_p2 = por %p129_p0, %p66_p1  ;;  %p120_p11 = scmp.eq.s32.totalorder %s119_s6, 0 }
  0x56   : > { %p3525_p12 = por %p135_p6, %p72_p13  ;;  %s2590_s25 = sshll.u32 %s398_s18, 5 }
  0x57   : > { %s3530_s30 = scalar_select %p120_p11, %s3210_s11, %s122_s21  }
  0x58   : > { %s410_s28 = sadd.s32 %s2811_s15, %s3428_s24  ;;  %s400_s8 = scalar_lea.vmem [#allocation8], %s2590_s25 }
  0x59   : > { %s2595_s5 = sshll.u32 %s410_s28, 3  ;;  %s415_s2 = sshll.u32 %s400_s8, 4  ;;  %s416_s2 = int_to_ptr.vmem [resolvable:$true] %s415_s2 }
  0x5a   : > { %s4413_s20 = sld [smem:[#allocation36_spill]]  ;;  %p4414_p1 = scmp.lt.s32.totalorder %s3254_s22, 4 }
  0x5c   : > { %p2840_p7 = pnand %p4414_p1, %p3519_p2 }
  0x5e   : > { %427 = sbr.rel (%p3465_p4) target bundleno = 931 (0x3a3), region = 56 }
  0x60   : > { %s412_s14 = scalar_lea.hbm %s4413_s20, %s2595_s5 }
  0x61   : > { %s413_s12 = sshll.u32 %s412_s14, 4  ;;  %s414_s12 = int_to_ptr.hbm [resolvable:$true] %s413_s12 }
  0x62   : > { %2842 = dma.hbm_to_vmem [thread:$0]  (!%p2840_p7), %s414_s12, 512, %s416_s2, %s3444_s9, %s4410_s26, %s4410_s26, %s4409_s27  }
  0x63   : > { %s429_s1 = sand.u32 1, %s3230_s16  }
  0x64   : > { %s2597_s24 = sshll.u32 %s429_s1, 5  ;;  %s430_s21 = scalar_lea.sflag [#allocation4], %s429_s1 }
  0x65   : > { %s3547_s18 = scalar_lea.vmem [#allocation3], %s2597_s24 }
  0x66   : > { %3181 = dma.done.wait (%p3489_p5), %s430_s21, 512  }
  0x67   : > { %3183 = vsyncadd (%p3489_p5), %s430_s21, 4294966784  ;;  %s439_s12 = sand.u32 1, %s3385_s23   ;;  %s441_s14 = sand.u32 1, %s3218_s13  }
  0x68   : > { %s3557_s9 = sshll.u32 %s441_s14, 7  ;;  %s440_s19 = scalar_lea.sflag [#allocation7], %s439_s12 }
  0x69   : > { %s3560_s27 = scalar_lea.vmem [#allocation6], %s3557_s9 }
  0x6a   : > { %3185 = dma.done.wait (%p3461_p3), %s440_s19, 2048  }
  0x6b   : > { %3187 = vsyncadd (%p3461_p3), %s440_s19, 4294965248  ;;  %s451_s29 = sand.u32 1, %s3206_s10  }
  0x6c   : > { %s2599_s26 = sshll.u32 %s451_s29, 5 }
  0x6d   : > { %s3567_s6 = scalar_lea.vmem [#allocation8], %s2599_s26 }
  0x6e   : > { %3189 = dma.done.wait (%p3525_p12), %s440_s19, 512  }
  0x6f   : > { %3191 = vsyncadd (%p3525_p12), %s440_s19, 4294966784 }
  0x70   : > { %3193 = dma.done.wait (%p72_p13), [#allocation10], 576  }
  0x71   : > { %3195 = vsyncadd (%p72_p13), [#allocation10], 4294966720  ;;  %s4415_s25 = sld [smem:[#allocation37_spill]]  ;;  %v544_v2 = vld [vmem:[%s3547_s18] sm:$0xff]  ;;  %vm554_vm0 = vcmask 130048   ;;  %v682_v4 = vld [vmem:[%s3560_s27 + $0x10] sm:$0xff] }
  0x72   : > { %v613_v3 = vld [vmem:[%s3567_s6] sm:$0xff]  ;;  %v545_v5 = vld [vmem:[%s3547_s18 + $0x8] sm:$0xff]  ;;  %v683_v7 = vld [vmem:[%s3560_s27 + $0x18] sm:$0xff]  ;;  %s4416_s23 = sld [smem:[#allocation20_spill]]  ;;  %vm516_vm1 = vcmask 24576   ;;  %v3261_v24 = vmov 0.0  }
  0x73   : > { %v614_v6 = vld [vmem:[%s3567_s6 + $0x8] sm:$0xff]  ;;  %v546_v8 = vld [vmem:[%s3547_s18 + $0x10] sm:$0xff]  ;;  %v684_v10 = vld [vmem:[%s3560_s27 + $0x20] sm:$0xff]  ;;  %518 = vst.msk [vmem:[#allocation2 + $0x18] sm:$0x1] %vm516_vm1, %v3261_v24  ;;  %s4417_s3 = sld [smem:[#allocation38_spill]] }
  0x74   : > { %v615_v9 = vld [vmem:[%s3567_s6 + $0x10] sm:$0xff]  ;;  %v547_v11 = vld [vmem:[%s3547_s18 + $0x18] sm:$0xff]  ;;  %v685_v13 = vld [vmem:[%s3560_s27 + $0x28] sm:$0xff]  ;;  %519 = vst.msk [vmem:[#allocation2 + $0x30] sm:$0x1] %vm516_vm1, %v3261_v24  ;;  %vm936_vm2 = vcmask 1043456  }
  0x75   : > { %v616_v12 = vld [vmem:[%s3567_s6 + $0x18] sm:$0xff]  ;;  %v680_v14 = vld [vmem:[%s3560_s27] sm:$0xff]  ;;  %v686_v15 = vld [vmem:[%s3560_s27 + $0x30] sm:$0xff]  ;;  %520 = vst.msk [vmem:[#allocation2 + $0x48] sm:$0x1] %vm516_vm1, %v3261_v24  ;;  %vm605_vm3 = vcmask 31744  }
  0x76   : > { %v681_v16 = vld [vmem:[%s3560_s27 + $0x8] sm:$0xff]  ;;  %v687_v17 = vld [vmem:[%s3560_s27 + $0x38] sm:$0xff]  ;;  %v688_v18 = vld [vmem:[%s3560_s27 + $0x40] sm:$0xff]  ;;  %521 = vst.msk [vmem:[#allocation2 + $0x60] sm:$0x1] %vm516_vm1, %v3261_v24  ;;  %s4419_s29 = sld [smem:[#allocation41_spill]] }
  0x77   : > { %v549_v0 = vld [vmem:[%s4415_s25 + $0x8] sm:$0xff]  ;;  %v548_v1 = vld [vmem:[%s4415_s25] sm:$0xff]  ;;  %v690_v20 = vld [vmem:[%s3560_s27 + $0x50] sm:$0xff]  ;;  %522 = vst.msk [vmem:[#allocation2 + $0x78] sm:$0x1] %vm516_vm1, %v3261_v24  ;;  %s4423_s7 = sld [smem:[#allocation40_spill]] }
  0x78   : > { %581 = vmatpush.msra.mxu0 %v549_v0  ;;  %649 = vmatpush.msra.mxu1 %v549_v0  ;;  %v689_v19 = vld [vmem:[%s3560_s27 + $0x48] sm:$0xff]  ;;  %v691_v21 = vld [vmem:[%s3560_s27 + $0x58] sm:$0xff]  ;;  %v692_v22 = vld [vmem:[%s3560_s27 + $0x60] sm:$0xff]  ;;  %523 = vst.msk [vmem:[#allocation2 + $0x90] sm:$0x1] %vm516_vm1, %v3261_v24  ;;  %p541_p11 = scmp.gt.s32.totalorder %s4416_s23, 0 }
  0x79   : > { %2813 = vmatpush.msra.mxu2 %v549_v0  ;;  %v693_v23 = vld [vmem:[%s3560_s27 + $0x68] sm:$0xff]  ;;  %v694_v25 = vld [vmem:[%s3560_s27 + $0x70] sm:$0xff]  ;;  %524 = vst.msk [vmem:[#allocation2 + $0xa8] sm:$0x1] %vm516_vm1, %v3261_v24  ;;  %v695_v26 = vld [vmem:[%s3560_s27 + $0x78] sm:$0xff]  ;;  %p610_p13 = scmp.lt.s32.totalorder %s4416_s23, 1 }
  0x7a   : > { %582 = vmatpush.msra.mxu0 %v548_v1  ;;  %650 = vmatpush.msra.mxu1 %v548_v1  ;;  %525 = vst.msk [vmem:[#allocation2 + $0xc0] sm:$0x1] %vm516_vm1, %v3261_v24  ;;  %s542_s17 = scalar_select %p541_p11, 1, 0  ;;  %v2971_v27 = vld [vmem:[%s4417_s3] ss:$0 sm:$0xff] }
  0x7b   : > { %2814 = vmatpush.msra.mxu2 %v548_v1  ;;  %2602 = vmatmul.msk.f32.vlgmr.msra.gmra.mxu0 %vm554_vm0, %v544_v2  ;;  %526 = vst.msk [vmem:[#allocation2 + $0xd8] sm:$0x1] %vm516_vm1, %v3261_v24  ;;  %s611_s5 = scalar_select %p610_p13, 1, 0  ;;  %v2972_v28 = vld [vmem:[%s4417_s3] ss:$0 sm:$0xff] }
  0x7c   : > { %2606 = vmatmul.msk.f32.vlgmr.msra.gmra.mxu1 %vm554_vm0, %v613_v3  ;;  %2612 = vmatmul.msk.f32.vlgmr.msra.gmra.mxu2 %vm554_vm0, %v682_v4  ;;  %527 = vst.msk [vmem:[#allocation2 + $0xf0] sm:$0x1] %vm516_vm1, %v3261_v24  ;;  %s543_s1 = scvt.s32.f32 %s542_s17  ;;  %v887_v29 = vld [vmem:[#allocation9 + $0x4] sm:$0xf]  ;;  %v869_v30 = vld [vmem:[#allocation9] sm:$0xf] }
  0x7d   : > { %764 = vmatpush.msrb.mxu1 %v549_v0  ;;  %530 = vst.msk [vmem:[#allocation2 + $0x29] sm:$0x1] %vm516_vm1, %v3261_v24  ;;  %s612_s24 = scvt.s32.f32 %s611_s5  ;;  %2643 = vmatpush.msk.msrb.mxu0 %vm936_vm2, %v869_v30  ;;  %v3666_v38 = vld [vmem:[%s4417_s3] ss:$0 sm:$0xff]  ;;  %v1288_v46 = vld [vmem:[#allocation9 + $0xc] sm:$0xf] }
  0x7e   : > { %531 = vst.msk [vmem:[#allocation2 + $0x41] sm:$0x1] %vm516_vm1, %v3261_v24  ;;  %2815 = vmatpush.msk.msra.mxu3 %vm936_vm2, %v887_v29  ;;  %v600_v33 = vstv %s543_s1  ;;  %v1438_v47 = vld [vmem:[#allocation9 + $0x10] sm:$0xf]  ;;  %s4428_s28 = sld [smem:[#allocation42_spill]]  ;;  %s4213_s17 = scalar_lea.vmem [#allocation11], %s3557_s9 }
  0x7f   : > { %765 = vmatpush.msrb.mxu1 %v548_v1  ;;  %532 = vst.msk [vmem:[#allocation2 + $0x59] sm:$0x1] %vm516_vm1, %v3261_v24  ;;  %v668_v35 = vstv %s612_s24  ;;  %2694 = vmatpush.msk.msrb.mxu2 %vm936_vm2, %v1438_v47  ;;  %s4429_s9 = sld [smem:[#allocation21_spill]]  ;;  %s2812_s5 = sshll.u32 %s4416_s23, 4 }
  0x80   : > { %533 = vst.msk [vmem:[#allocation2 + $0x71] sm:$0x1] %vm516_vm1, %v3261_v24  ;;  %2677 = vmatpush.msk.msrb.mxu3 %vm936_vm2, %v1288_v46  ;;  %s4430_s24 = sld [smem:[#allocation43_spill]]  ;;  %s2412_s18 = sshll.u32 %s4213_s17, 4  ;;  %s2413_s18 = int_to_ptr.vmem [resolvable:$true] %s2412_s18 }
  0x81   : > { %534 = vst.msk [vmem:[#allocation2 + $0x89] sm:$0x1] %vm516_vm1, %v3261_v24  ;;  %2626 = vmatpush.msk.msra.mxu1 %vm936_vm2, %v887_v29  ;;  %s2397_s19 = scalar_lea.sflag [#allocation5], %s441_s14 }
  0x82   : > { %535 = vst.msk [vmem:[#allocation2 + $0xa1] sm:$0x1] %vm516_vm1, %v3261_v24 }
  0x83   : > { %2603 = vmatmul.msk.f32.gmra.mxu0 %vm554_vm0, %v545_v5  ;;  %536 = vst.msk [vmem:[#allocation2 + $0xb9] sm:$0x1] %vm516_vm1, %v3261_v24 }
  0x84   : > { %2607 = vmatmul.msk.f32.gmra.mxu1 %vm554_vm0, %v614_v6  ;;  %2613 = vmatmul.msk.f32.gmra.mxu2 %vm554_vm0, %v683_v7  ;;  %537 = vst.msk [vmem:[#allocation2 + $0xd1] sm:$0x1] %vm516_vm1, %v3261_v24 }
  0x85   : > { %538 = vst.msk [vmem:[#allocation2 + $0xe9] sm:$0x1] %vm516_vm1, %v3261_v24  ;;  %s2799_s8 = sshll.u32 %s4429_s9, 5 }
  0x86   : > { %539 = vst.msk [vmem:[#allocation2 + $0x101] sm:$0x1] %vm516_vm1, %v3261_v24  ;;  %s2409_s2 = sadd.s32 %s2812_s5, %s2799_s8 }
  0x87   : > { %s2800_s0 = sshll.u32 %s2409_s2, 3 }
  0x88   : > { %s2411_s21 = scalar_lea.hbm %s4430_s24, %s2800_s0 }
  0x89   : > { %s2414_s12 = sshll.u32 %s2411_s21, 4  ;;  %s2415_s12 = int_to_ptr.hbm [resolvable:$true] %s2414_s12 }
  0x8b   : > { %2604 = vmatmul.msk.f32.gmra.mxu0 %vm554_vm0, %v546_v8 }
  0x8c   : > { %2608 = vmatmul.msk.f32.gmra.mxu1 %vm554_vm0, %v615_v9  ;;  %2614 = vmatmul.msk.f32.gmra.mxu2 %vm554_vm0, %v684_v10 }
  0x93   : > { %2605 = vmatmul.msk.f32.gmra.mxu0 %vm554_vm0, %v547_v11 }
  0x94   : > { %2609 = vmatmul.msk.f32.gmra.mxu1 %vm554_vm0, %v616_v12  ;;  %2615 = vmatmul.msk.f32.gmra.mxu2 %vm554_vm0, %v685_v13 }
  0x9c   : > { %2610 = vmatmul.msk.f32.vlgmr.msrb.gmra.mxu1 %vm554_vm0, %v680_v14  ;;  %2616 = vmatmul.msk.f32.gmra.mxu2 %vm554_vm0, %v686_v15 }
  0x9d   : > { %2816 = vmatpush.msk.msrb.mxu1 %vm936_vm2, %v869_v30 }
  0xa4   : > { %2611 = vmatmul.msk.f32.gmra.mxu1 %vm554_vm0, %v681_v16  ;;  %2617 = vmatmul.msk.f32.gmra.mxu2 %vm554_vm0, %v687_v17 }
  0xac   : > { %2618 = vmatmul.msk.f32.gmra.mxu2 %vm554_vm0, %v688_v18 }
  0xb4   : > { %2619 = vmatmul.msk.f32.gmra.mxu2 %vm554_vm0, %v689_v19 }
  0xbc   : > { %2620 = vmatmul.msk.f32.gmra.mxu2 %vm554_vm0, %v690_v20 }
  0xc4   : > { %2621 = vmatmul.msk.f32.gmra.mxu2 %vm554_vm0, %v691_v21 }
  0xcc   : > { %2622 = vmatmul.msk.f32.gmra.mxu2 %vm554_vm0, %v692_v22 }
  0xd4   : > { %2623 = vmatmul.msk.f32.gmra.mxu2 %vm554_vm0, %v693_v23 }
  0xdc   : > { %2624 = vmatmul.msk.f32.gmra.mxu2 %vm554_vm0, %v694_v25 }
  0xe4   : > { %2625 = vmatmul.msk.f32.gmra.mxu2 %vm554_vm0, %v695_v26 }
  0xf8   : > { %v584_v31 = vpop.f32.mrf.mxu0 }
  0xf9   : > { %v652_v32 = vpop.f32.mrf.mxu1 }
  0xfa   : > { %v653_v34 = vadd.f32 %v2972_v28, %v652_v32 }
  0xfc   : > { %v664_v36 = vmax.f32 %v653_v34, 0.0 }
  0xfe   : > { %v669_v37 = vmul.f32 %v668_v35, %v664_v36 }
  0xff   : > { %v773_v39 = vpop.f32.mrf.mxu2 }
 0x100   : > { %674 = vst.msk [vmem:[#allocation2 + $0xf1] sm:$0xff] %vm605_vm3, %v669_v37  ;;  %v774_v40 = vadd.f32 %v3666_v38, %v773_v39  ;;  %v587_v41 = vpop.f32.mrf.mxu0 }
 0x101   : > { %v655_v42 = vpop.f32.mrf.mxu1 }
 0x102   : > { %v817_v43 = vmax.f32 %v774_v40, 0.0  ;;  %v656_v44 = vadd.f32 %v2972_v28, %v655_v42  ;;  %v1588_v42 = vld [vmem:[#allocation9 + $0x14] sm:$0xf] }
 0x103   : > { %2711 = vmatpush.msk.msra.mxu0 %vm936_vm2, %v1588_v42 }
 0x104   : > { %836 = vst.msk [vmem:[#allocation2 + $0x49] sm:$0xff] %vm605_vm3, %v817_v43  ;;  %v665_v45 = vmax.f32 %v656_v44, 0.0  ;;  %v1138_v44 = vld [vmem:[#allocation9 + $0x8] sm:$0xf] }
 0x106   : > { %v670_v48 = vmul.f32 %v668_v35, %v665_v45 }
 0x107   : > { %v776_v49 = vpop.f32.mrf.mxu2 }
 0x108   : > { %675 = vst.msk [vmem:[#allocation2 + $0xf9] sm:$0xff] %vm605_vm3, %v670_v48  ;;  %v777_v50 = vadd.f32 %v3666_v38, %v776_v49  ;;  %v590_v51 = vpop.f32.mrf.mxu0 }
 0x109   : > { %v591_v52 = vadd.f32 %v2971_v27, %v590_v51  ;;  %v658_v53 = vpop.f32.mrf.mxu1 }
 0x10a   : > { %v818_v54 = vmax.f32 %v777_v50, 0.0 }
 0x10b   : > { %v598_v55 = vmax.f32 %v591_v52, 0.0  ;;  %v3710_v28 = vld [vmem:[#allocation2 + $0x48] sm:$0xff] }
 0x10c   : > { %837 = vst.msk [vmem:[#allocation2 + $0x51] sm:$0xff] %vm605_vm3, %v818_v54 }
 0x10d   : > { %v603_v56 = vmul.f32 %v600_v33, %v598_v55 }
 0x10f   : > { %608 = vst.msk [vmem:[#allocation2 + $0x19] sm:$0xff] %vm605_vm3, %v603_v56  ;;  %v779_v57 = vpop.f32.mrf.mxu2 }
 0x110   : > { %v780_v58 = vadd.f32 %v3666_v38, %v779_v57  ;;  %v593_v59 = vpop.f32.mrf.mxu0 }
 0x111   : > { %v594_v60 = vadd.f32 %v2971_v27, %v593_v59  ;;  %v661_v61 = vpop.f32.mrf.mxu1  ;;  %v3707_v27 = vld [vmem:[#allocation2 + $0x49] sm:$0xff] }
 0x112   : > { %v819_v62 = vmax.f32 %v780_v58, 0.0 }
 0x113   : > { %v599_v63 = vmax.f32 %v594_v60, 0.0  ;;  %v3728_v34 = vld [vmem:[#allocation2 + $0x50] sm:$0xff] }
 0x114   : > { %838 = vst.msk [vmem:[#allocation2 + $0x61] sm:$0xff] %vm605_vm3, %v819_v62 }
 0x115   : > { %v604_v0 = vmul.f32 %v600_v33, %v599_v63  ;;  %v3721_v33 = vld [vmem:[#allocation2 + $0x51] sm:$0xff] }
 0x116   : > { %v870_v1 = vld [vmem:[#allocation2 + $0x19] sm:$0xff] }
 0x117   : > { %v853_v2 = vld [vmem:[#allocation2 + $0x18] sm:$0xff]  ;;  %609 = vst.msk [vmem:[#allocation2 + $0x21] sm:$0xff] %vm605_vm3, %v604_v0  ;;  %v782_v3 = vpop.f32.mrf.mxu2  ;;  %2627 = vmatmul.msk.f32.vlgmr.msra.gmra.mxu1 %vm605_vm3, %v870_v1 }
 0x118   : > { %2644 = vmatmul.msk.f32.vlgmr.msrb.gmra.mxu0 %vm605_vm3, %v853_v2  ;;  %v783_v4 = vadd.f32 %v3666_v38, %v782_v3  ;;  %2660 = vmatpush.msk.msra.mxu1 %vm936_vm2, %v1138_v44 }
 0x119   : > { %v767_v5 = vpop.f32.mrf.mxu1 }
 0x11a   : > { %v820_v6 = vmax.f32 %v783_v4, 0.0  ;;  %v768_v7 = vadd.f32 %v3666_v38, %v767_v5 }
 0x11b   : > { %v3737_v40 = vld [vmem:[#allocation2 + $0x61] sm:$0xff] }
 0x11c   : > { %839 = vst.msk [vmem:[#allocation2 + $0x69] sm:$0xff] %vm605_vm3, %v820_v6  ;;  %v815_v8 = vmax.f32 %v768_v7, 0.0  ;;  %v3742_v41 = vld [vmem:[#allocation2 + $0x60] sm:$0xff] }
 0x11e   : > { %834 = vst.msk [vmem:[#allocation2 + $0x31] sm:$0xff] %vm605_vm3, %v815_v8  ;;  %v871_v9 = vld [vmem:[#allocation2 + $0x21] sm:$0xff] }
 0x11f   : > { %v854_v10 = vld [vmem:[#allocation2 + $0x20] sm:$0xff]  ;;  %v785_v11 = vpop.f32.mrf.mxu2  ;;  %2628 = vmatmul.msk.f32.vlgmr.msra.gmra.mxu3 %vm605_vm3, %v871_v9 }
 0x120   : > { %2645 = vmatmul.msk.f32.gmra.mxu0 %vm605_vm3, %v854_v10  ;;  %v786_v12 = vadd.f32 %v3666_v38, %v785_v11  ;;  %v1121_v3 = vld [vmem:[#allocation2 + $0x1a] sm:$0xff]  ;;  %v1122_v9 = vld [vmem:[#allocation2 + $0x22] sm:$0xff] }
 0x121   : > { %v770_v13 = vpop.f32.mrf.mxu1 }
 0x122   : > { %v821_v14 = vmax.f32 %v786_v12, 0.0  ;;  %v771_v15 = vadd.f32 %v3666_v38, %v770_v13  ;;  %v1573_v12 = vld [vmem:[#allocation2 + $0x4a] sm:$0xff]  ;;  %v1891_v13 = vld [vmem:[#allocation9 + $0x1c] sm:$0xf] }
 0x123   : > { %v3755_v48 = vld [vmem:[#allocation2 + $0x69] sm:$0xff]  ;;  %2745 = vmatpush.msk.msra.mxu3 %vm936_vm2, %v1891_v13 }
 0x124   : > { %840 = vst.msk [vmem:[#allocation2 + $0x79] sm:$0xff] %vm605_vm3, %v821_v14  ;;  %v816_v16 = vmax.f32 %v771_v15, 0.0  ;;  %v3762_v49 = vld [vmem:[#allocation2 + $0x68] sm:$0xff]  ;;  %v2041_v14 = vld [vmem:[#allocation9 + $0x20] sm:$0xf] }
 0x125   : > { %v1421_v17 = vld [vmem:[#allocation2 + $0x31] sm:$0xff]  ;;  %2762 = vmatpush.msk.msra.mxu2 %vm936_vm2, %v2041_v14 }
 0x126   : > { %v3691_v18 = vld [vmem:[#allocation2 + $0x30] sm:$0xff]  ;;  %835 = vst.msk [vmem:[#allocation2 + $0x39] sm:$0xff] %vm605_vm3, %v816_v16  ;;  %2695 = vmatmul.msk.f32.vlgmr.msrb.gmra.mxu2 %vm605_vm3, %v1421_v17  ;;  %v1741_v15 = vld [vmem:[#allocation9 + $0x18] sm:$0xf] }
 0x127   : > { %v788_v19 = vpop.f32.mrf.mxu2  ;;  %2629 = vmatmul.msk.f32.gmra.mxu3 %vm605_vm3, %v1421_v17  ;;  %v1574_v16 = vld [vmem:[#allocation2 + $0x52] sm:$0xff] }
 0x128   : > { %2646 = vmatmul.msk.f32.gmra.mxu0 %vm605_vm3, %v3691_v18  ;;  %v789_v20 = vadd.f32 %v3666_v38, %v788_v19  ;;  %v1575_v19 = vld [vmem:[#allocation2 + $0x62] sm:$0xff] }
 0x12a   : > { %v822_v21 = vmax.f32 %v789_v20, 0.0 }
 0x12b   : > { %v3771_v54 = vld [vmem:[#allocation2 + $0x79] sm:$0xff] }
 0x12c   : > { %841 = vst.msk [vmem:[#allocation2 + $0x81] sm:$0xff] %vm605_vm3, %v822_v21  ;;  %v3776_v55 = vld [vmem:[#allocation2 + $0x78] sm:$0xff]  ;;  %v1576_v21 = vld [vmem:[#allocation2 + $0x6a] sm:$0xff] }
 0x12d   : > { %v1422_v22 = vld [vmem:[#allocation2 + $0x39] sm:$0xff] }
 0x12e   : > { %2696 = vmatmul.msk.f32.gmra.mxu2 %vm605_vm3, %v1422_v22  ;;  %v3701_v23 = vld [vmem:[#allocation2 + $0x38] sm:$0xff] }
 0x12f   : > { %v791_v24 = vpop.f32.mrf.mxu2  ;;  %2630 = vmatmul.msk.f32.gmra.mxu3 %vm605_vm3, %v1422_v22  ;;  %v1571_v0 = vld [vmem:[#allocation2 + $0x32] sm:$0xff]  ;;  %v1572_v6 = vld [vmem:[#allocation2 + $0x3a] sm:$0xff] }
 0x130   : > { %2647 = vmatmul.msk.f32.gmra.mxu0 %vm605_vm3, %v3701_v23  ;;  %v792_v25 = vadd.f32 %v3666_v38, %v791_v24 }
 0x132   : > { %v823_v26 = vmax.f32 %v792_v25, 0.0 }
 0x133   : > { %v3787_v60 = vld [vmem:[#allocation2 + $0x81] sm:$0xff] }
 0x134   : > { %842 = vst.msk [vmem:[#allocation2 + $0x91] sm:$0xff] %vm605_vm3, %v823_v26  ;;  %v3794_v61 = vld [vmem:[#allocation2 + $0x80] sm:$0xff] }
 0x135   : > { %v1577_v24 = vld [vmem:[#allocation2 + $0x7a] sm:$0xff]  ;;  %v1578_v26 = vld [vmem:[#allocation2 + $0x82] sm:$0xff] }
 0x136   : > { %2697 = vmatmul.msk.f32.gmra.mxu2 %vm605_vm3, %v3707_v27 }
 0x137   : > { %v794_v29 = vpop.f32.mrf.mxu2  ;;  %2631 = vmatmul.msk.f32.gmra.mxu3 %vm605_vm3, %v3707_v27 }
 0x138   : > { %2648 = vmatmul.msk.f32.gmra.mxu0 %vm605_vm3, %v3710_v28  ;;  %v795_v30 = vadd.f32 %v3666_v38, %v794_v29 }
 0x13a   : > { %v824_v31 = vmax.f32 %v795_v30, 0.0 }
 0x13b   : > { %v3719_v32 = vld [vmem:[#allocation2 + $0x90] sm:$0xff] }
 0x13c   : > { %843 = vst.msk [vmem:[#allocation2 + $0x99] sm:$0xff] %vm605_vm3, %v824_v31  ;;  %2654 = vmatmul.msk.f32.vlgmr.msrb.gmra.mxu1 %vm605_vm3, %v3719_v32  ;;  %v3802_v63 = vld [vmem:[#allocation2 + $0x91] sm:$0xff] }
 0x13d   : > { %2728 = vmatpush.msk.msrb.mxu1 %vm936_vm2, %v1741_v15 }
 0x13e   : > { %2698 = vmatmul.msk.f32.gmra.mxu2 %vm605_vm3, %v3721_v33 }
 0x13f   : > { %v797_v35 = vpop.f32.mrf.mxu2  ;;  %2632 = vmatmul.msk.f32.gmra.mxu3 %vm605_vm3, %v3721_v33 }
 0x140   : > { %2649 = vmatmul.msk.f32.gmra.mxu0 %vm605_vm3, %v3728_v34  ;;  %v798_v36 = vadd.f32 %v3666_v38, %v797_v35 }
 0x142   : > { %v825_v37 = vmax.f32 %v798_v36, 0.0 }
 0x143   : > { %v3735_v39 = vld [vmem:[#allocation2 + $0x98] sm:$0xff] }
 0x144   : > { %844 = vst.msk [vmem:[#allocation2 + $0xa9] sm:$0xff] %vm605_vm3, %v825_v37  ;;  %2655 = vmatmul.msk.f32.gmra.mxu1 %vm605_vm3, %v3735_v39  ;;  %v3812_v4 = vld [vmem:[#allocation2 + $0x99] sm:$0xff] }
 0x146   : > { %2699 = vmatmul.msk.f32.gmra.mxu2 %vm605_vm3, %v3737_v40 }
 0x147   : > { %v800_v43 = vpop.f32.mrf.mxu2  ;;  %2633 = vmatmul.msk.f32.gmra.mxu3 %vm605_vm3, %v3737_v40 }
 0x148   : > { %2650 = vmatmul.msk.f32.gmra.mxu0 %vm605_vm3, %v3742_v41  ;;  %v801_v45 = vadd.f32 %v3666_v38, %v800_v43 }
 0x14a   : > { %v826_v46 = vmax.f32 %v801_v45, 0.0 }
 0x14b   : > { %v3753_v47 = vld [vmem:[#allocation2 + $0xa8] sm:$0xff] }
 0x14c   : > { %845 = vst.msk [vmem:[#allocation2 + $0xb1] sm:$0xff] %vm605_vm3, %v826_v46  ;;  %2656 = vmatmul.msk.f32.gmra.mxu1 %vm605_vm3, %v3753_v47  ;;  %v3822_v10 = vld [vmem:[#allocation2 + $0xa9] sm:$0xff] }
 0x14e   : > { %2700 = vmatmul.msk.f32.gmra.mxu2 %vm605_vm3, %v3755_v48 }
 0x14f   : > { %v803_v50 = vpop.f32.mrf.mxu2  ;;  %2634 = vmatmul.msk.f32.gmra.mxu3 %vm605_vm3, %v3755_v48 }
 0x150   : > { %2651 = vmatmul.msk.f32.gmra.mxu0 %vm605_vm3, %v3762_v49  ;;  %v804_v51 = vadd.f32 %v3666_v38, %v803_v50 }
 0x152   : > { %v827_v52 = vmax.f32 %v804_v51, 0.0 }
 0x153   : > { %v3769_v53 = vld [vmem:[#allocation2 + $0xb0] sm:$0xff] }
 0x154   : > { %846 = vst.msk [vmem:[#allocation2 + $0xc1] sm:$0xff] %vm605_vm3, %v827_v52  ;;  %2657 = vmatmul.msk.f32.gmra.mxu1 %vm605_vm3, %v3769_v53  ;;  %v1581_v36 = vld [vmem:[#allocation2 + $0xaa] sm:$0xff]  ;;  %v1582_v43 = vld [vmem:[#allocation2 + $0xb2] sm:$0xff] }
 0x156   : > { %2701 = vmatmul.msk.f32.gmra.mxu2 %vm605_vm3, %v3771_v54 }
 0x157   : > { %v806_v56 = vpop.f32.mrf.mxu2  ;;  %2635 = vmatmul.msk.f32.gmra.mxu3 %vm605_vm3, %v3771_v54 }
 0x158   : > { %2652 = vmatmul.msk.f32.gmra.mxu0 %vm605_vm3, %v3776_v55  ;;  %v807_v57 = vadd.f32 %v3666_v38, %v806_v56 }
 0x15a   : > { %v828_v58 = vmax.f32 %v807_v57, 0.0 }
 0x15b   : > { %v3785_v59 = vld [vmem:[#allocation2 + $0xc0] sm:$0xff] }
 0x15c   : > { %847 = vst.msk [vmem:[#allocation2 + $0xc9] sm:$0xff] %vm605_vm3, %v828_v58  ;;  %2658 = vmatmul.msk.f32.gmra.mxu1 %vm605_vm3, %v3785_v59  ;;  %v3842_v17 = vld [vmem:[#allocation2 + $0xc1] sm:$0xff] }
 0x15e   : > { %2702 = vmatmul.msk.f32.gmra.mxu2 %vm605_vm3, %v3787_v60 }
 0x15f   : > { %2636 = vmatmul.msk.f32.gmra.mxu3 %vm605_vm3, %v3787_v60  ;;  %v809_v1 = vpop.f32.mrf.mxu2 }
 0x160   : > { %2653 = vmatmul.msk.f32.gmra.mxu0 %vm605_vm3, %v3794_v61  ;;  %v810_v2 = vadd.f32 %v3666_v38, %v809_v1 }
 0x162   : > { %v829_v5 = vmax.f32 %v810_v2, 0.0 }
 0x163   : > { %v3800_v62 = vld [vmem:[#allocation2 + $0xc8] sm:$0xff] }
 0x164   : > { %2659 = vmatmul.msk.f32.gmra.mxu1 %vm605_vm3, %v3800_v62  ;;  %848 = vst.msk [vmem:[#allocation2 + $0xd9] sm:$0xff] %vm605_vm3, %v829_v5  ;;  %v3850_v20 = vld [vmem:[#allocation2 + $0xc9] sm:$0xff] }
 0x165   : > { %v1583_v46 = vld [vmem:[#allocation2 + $0xc2] sm:$0xff]  ;;  %v1584_v52 = vld [vmem:[#allocation2 + $0xca] sm:$0xff] }
 0x166   : > { %2703 = vmatmul.msk.f32.gmra.mxu2 %vm605_vm3, %v3802_v63 }
 0x167   : > { %2637 = vmatmul.msk.f32.gmra.mxu3 %vm605_vm3, %v3802_v63  ;;  %v812_v7 = vpop.f32.mrf.mxu2 }
 0x168   : > { %2712 = vmatmul.msk.f32.vlgmr.msra.gmra.mxu0 %vm605_vm3, %v1571_v0  ;;  %v813_v8 = vadd.f32 %v3666_v38, %v812_v7  ;;  %v3833_v38 = vld [vmem:[#allocation2 + $0xb1] sm:$0xff] }
 0x16a   : > { %v830_v11 = vmax.f32 %v813_v8, 0.0 }
 0x16b   : > { %v3858_v22 = vld [vmem:[#allocation2 + $0xd9] sm:$0xff] }
 0x16c   : > { %2661 = vmatmul.msk.f32.vlgmr.msra.gmra.mxu1 %vm605_vm3, %v1121_v3  ;;  %849 = vst.msk [vmem:[#allocation2 + $0xe1] sm:$0xff] %vm605_vm3, %v830_v11 }
 0x16e   : > { %2704 = vmatmul.msk.f32.gmra.mxu2 %vm605_vm3, %v3812_v4 }
 0x16f   : > { %2638 = vmatmul.msk.f32.gmra.mxu3 %vm605_vm3, %v3812_v4 }
 0x170   : > { %2713 = vmatmul.msk.f32.gmra.mxu0 %vm605_vm3, %v1572_v6 }
 0x173   : > { %v3866_v25 = vld [vmem:[#allocation2 + $0xe1] sm:$0xff] }
 0x174   : > { %2662 = vmatmul.msk.f32.gmra.mxu1 %vm605_vm3, %v1122_v9  ;;  %v2036_v8 = vld [vmem:[#allocation2 + $0xda] sm:$0xff]  ;;  %v2037_v15 = vld [vmem:[#allocation2 + $0xe2] sm:$0xff] }
 0x176   : > { %2705 = vmatmul.msk.f32.gmra.mxu2 %vm605_vm3, %v3822_v10 }
 0x177   : > { %2639 = vmatmul.msk.f32.gmra.mxu3 %vm605_vm3, %v3822_v10 }
 0x178   : > { %2714 = vmatmul.msk.f32.gmra.mxu0 %vm605_vm3, %v1573_v12 }
 0x17c   : > { %2663 = vmatmul.msk.f32.gmra.mxu1 %vm605_vm3, %v1571_v0 }
 0x17e   : > { %2706 = vmatmul.msk.f32.gmra.mxu2 %vm605_vm3, %v3833_v38 }
 0x17f   : > { %2640 = vmatmul.msk.f32.gmra.mxu3 %vm605_vm3, %v3833_v38 }
 0x180   : > { %2715 = vmatmul.msk.f32.gmra.mxu0 %vm605_vm3, %v1574_v16 }
 0x184   : > { %2664 = vmatmul.msk.f32.gmra.mxu1 %vm605_vm3, %v1572_v6 }
 0x186   : > { %2707 = vmatmul.msk.f32.gmra.mxu2 %vm605_vm3, %v3842_v17 }
 0x187   : > { %2641 = vmatmul.msk.f32.gmra.mxu3 %vm605_vm3, %v3842_v17 }
 0x188   : > { %2716 = vmatmul.msk.f32.gmra.mxu0 %vm605_vm3, %v1575_v19 }
 0x18c   : > { %2665 = vmatmul.msk.f32.gmra.mxu1 %vm605_vm3, %v1573_v12 }
 0x18e   : > { %2708 = vmatmul.msk.f32.gmra.mxu2 %vm605_vm3, %v3850_v20 }
 0x18f   : > { %2642 = vmatmul.msk.f32.gmra.mxu3 %vm605_vm3, %v3850_v20 }
 0x190   : > { %2717 = vmatmul.msk.f32.gmra.mxu0 %vm605_vm3, %v1576_v21 }
 0x194   : > { %2666 = vmatmul.msk.f32.gmra.mxu1 %vm605_vm3, %v1574_v16  ;;  %v3888_v31 = vpop.f32.mrf.mxu1 }
 0x195   : > { %v3921_v58 = vpop.f32.mrf.mxu0 }
 0x196   : > { %2709 = vmatmul.msk.f32.gmra.mxu2 %vm605_vm3, %v3858_v22 }
 0x197   : > { %2678 = vmatmul.msk.f32.vlgmr.msrb.gmra.mxu3 %vm605_vm3, %v3691_v18  ;;  %v1579_v18 = vld [vmem:[#allocation2 + $0x92] sm:$0xff] }
 0x198   : > { %2718 = vmatmul.msk.f32.gmra.mxu0 %vm605_vm3, %v1577_v24 }
 0x19c   : > { %2667 = vmatmul.msk.f32.gmra.mxu1 %vm605_vm3, %v1575_v19 }
 0x19d   : > { %v3932_v3 = vpop.f32.mrf.mxu0 }
 0x19e   : > { %2710 = vmatmul.msk.f32.gmra.mxu2 %vm605_vm3, %v3866_v25 }
 0x19f   : > { %2679 = vmatmul.msk.f32.gmra.mxu3 %vm605_vm3, %v3701_v23  ;;  %v1580_v23 = vld [vmem:[#allocation2 + $0x9a] sm:$0xff] }
 0x1a0   : > { %2719 = vmatmul.msk.f32.gmra.mxu0 %vm605_vm3, %v1578_v26 }
 0x1a2   : > { %v3874_v29 = vpop.f32.mrf.mxu3 }
 0x1a4   : > { %2668 = vmatmul.msk.f32.gmra.mxu1 %vm605_vm3, %v1576_v21 }
 0x1a5   : > { %v3945_v9 = vpop.f32.mrf.mxu0 }
 0x1a6   : > { %2763 = vmatmul.msk.f32.vlgmr.msra.gmra.mxu2 %vm605_vm3, %v1573_v12 }
 0x1a7   : > { %2680 = vmatmul.msk.f32.gmra.mxu3 %vm605_vm3, %v3710_v28 }
 0x1a8   : > { %2720 = vmatmul.msk.f32.gmra.mxu0 %vm605_vm3, %v1579_v18 }
 0x1a9   : > { %v3926_v0 = vpop.f32.mrf.mxu2 }
 0x1aa   : > { %v3881_v30 = vpop.f32.mrf.mxu3 }
 0x1ac   : > { %2669 = vmatmul.msk.f32.gmra.mxu1 %vm605_vm3, %v1577_v24 }
 0x1ae   : > { %2764 = vmatmul.msk.f32.gmra.mxu2 %vm605_vm3, %v1574_v16 }
 0x1af   : > { %2681 = vmatmul.msk.f32.gmra.mxu3 %vm605_vm3, %v3728_v34 }
 0x1b0   : > { %2721 = vmatmul.msk.f32.gmra.mxu0 %vm605_vm3, %v1580_v23 }
 0x1b1   : > { %v3936_v6 = vpop.f32.mrf.mxu2 }
 0x1b2   : > { %v3890_v35 = vpop.f32.mrf.mxu3 }
 0x1b4   : > { %2670 = vmatmul.msk.f32.gmra.mxu1 %vm605_vm3, %v1578_v26 }
 0x1b6   : > { %2765 = vmatmul.msk.f32.gmra.mxu2 %vm605_vm3, %v1575_v19 }
 0x1b7   : > { %2682 = vmatmul.msk.f32.gmra.mxu3 %vm605_vm3, %v3742_v41 }
 0x1b8   : > { %2722 = vmatmul.msk.f32.gmra.mxu0 %vm605_vm3, %v1581_v36 }
 0x1b9   : > { %v1103_v37 = vpop.f32.mrf.mxu1  ;;  %v3951_v14 = vpop.f32.mrf.mxu2 }
 0x1ba   : > { %v3897_v42 = vpop.f32.mrf.mxu3 }
 0x1bc   : > { %2671 = vmatmul.msk.f32.gmra.mxu1 %vm605_vm3, %v1579_v18 }
 0x1be   : > { %2766 = vmatmul.msk.f32.gmra.mxu2 %vm605_vm3, %v1576_v21  ;;  %v3959_v21 = vpop.f32.mrf.mxu0 }
 0x1bf   : > { %2683 = vmatmul.msk.f32.gmra.mxu3 %vm605_vm3, %v3762_v49 }
 0x1c0   : > { %2723 = vmatmul.msk.f32.gmra.mxu0 %vm605_vm3, %v1582_v43 }
 0x1c1   : > { %v1106_v44 = vpop.f32.mrf.mxu1 }
 0x1c2   : > { %v3904_v45 = vpop.f32.mrf.mxu3 }
 0x1c4   : > { %2672 = vmatmul.msk.f32.gmra.mxu1 %vm605_vm3, %v1580_v23 }
 0x1c6   : > { %2767 = vmatmul.msk.f32.gmra.mxu2 %vm605_vm3, %v1577_v24 }
 0x1c7   : > { %2684 = vmatmul.msk.f32.gmra.mxu3 %vm605_vm3, %v3776_v55 }
 0x1c8   : > { %2724 = vmatmul.msk.f32.gmra.mxu0 %vm605_vm3, %v1583_v46 }
 0x1c9   : > { %v1109_v50 = vpop.f32.mrf.mxu1 }
 0x1ca   : > { %v3911_v51 = vpop.f32.mrf.mxu3 }
 0x1cc   : > { %2673 = vmatmul.msk.f32.gmra.mxu1 %vm605_vm3, %v1581_v36 }
 0x1ce   : > { %2768 = vmatmul.msk.f32.gmra.mxu2 %vm605_vm3, %v1578_v26  ;;  %v3965_v26 = vpop.f32.mrf.mxu2 }
 0x1cf   : > { %2685 = vmatmul.msk.f32.gmra.mxu3 %vm605_vm3, %v3794_v61 }
 0x1d0   : > { %2725 = vmatmul.msk.f32.gmra.mxu0 %vm605_vm3, %v1584_v52 }
 0x1d1   : > { %v1112_v56 = vpop.f32.mrf.mxu1 }
 0x1d2   : > { %v3918_v57 = vpop.f32.mrf.mxu3 }
 0x1d4   : > { %2674 = vmatmul.msk.f32.gmra.mxu1 %vm605_vm3, %v1582_v43 }
 0x1d6   : > { %2769 = vmatmul.msk.f32.gmra.mxu2 %vm605_vm3, %v1579_v18 }
 0x1d7   : > { %2686 = vmatmul.msk.f32.gmra.mxu3 %vm605_vm3, %v3719_v32 }
 0x1d8   : > { %2726 = vmatmul.msk.f32.gmra.mxu0 %vm605_vm3, %v2036_v8 }
 0x1d9   : > { %v1115_v1 = vpop.f32.mrf.mxu1 }
 0x1da   : > { %v3928_v2 = vpop.f32.mrf.mxu3 }
 0x1dc   : > { %2675 = vmatmul.msk.f32.gmra.mxu1 %vm605_vm3, %v1583_v46 }
 0x1de   : > { %2770 = vmatmul.msk.f32.gmra.mxu2 %vm605_vm3, %v1580_v23 }
 0x1df   : > { %2687 = vmatmul.msk.f32.gmra.mxu3 %vm605_vm3, %v3735_v39 }
 0x1e0   : > { %2727 = vmatmul.msk.f32.gmra.mxu0 %vm605_vm3, %v2037_v15 }
 0x1e1   : > { %v1118_v5 = vpop.f32.mrf.mxu1 }
 0x1e2   : > { %v3938_v7 = vpop.f32.mrf.mxu3 }
 0x1e4   : > { %2676 = vmatmul.msk.f32.gmra.mxu1 %vm605_vm3, %v1584_v52 }
 0x1e6   : > { %2771 = vmatmul.msk.f32.gmra.mxu2 %vm605_vm3, %v1581_v36  ;;  %v3974_v36 = vpop.f32.mrf.mxu0 }
 0x1e7   : > { %2688 = vmatmul.msk.f32.gmra.mxu3 %vm605_vm3, %v3753_v47 }
 0x1e9   : > { %v3947_v11 = vpop.f32.mrf.mxu1 }
 0x1ea   : > { %v987_v12 = vpop.f32.mrf.mxu3 }
 0x1eb   : > { %v3949_v13 = vadd.f32 %v1103_v37, %v987_v12 }
 0x1ec   : > { %2729 = vmatmul.msk.f32.vlgmr.msrb.gmra.mxu1 %vm605_vm3, %v3710_v28 }
 0x1ee   : > { %2772 = vmatmul.msk.f32.gmra.mxu2 %vm605_vm3, %v1582_v43 }
 0x1ef   : > { %2689 = vmatmul.msk.f32.gmra.mxu3 %vm605_vm3, %v3769_v53 }
 0x1f1   : > { %v1210_v16 = vpop.f32.mrf.mxu1 }
 0x1f2   : > { %v990_v19 = vpop.f32.mrf.mxu3 }
 0x1f3   : > { %v3961_v24 = vadd.f32 %v1106_v44, %v990_v19  ;;  %v4003_v19 = vld [vmem:[#allocation2 + $0xe0] sm:$0xff] }
 0x1f4   : > { %2730 = vmatmul.msk.f32.gmra.mxu1 %vm605_vm3, %v3728_v34  ;;  %v3979_v34 = vpop.f32.mrf.mxu2 }
 0x1f5   : > { %4418 = vst [vmem:[#allocation30_spill] sm:$0xff] %v3979_v34 }
 0x1f6   : > { %2773 = vmatmul.msk.f32.gmra.mxu2 %vm605_vm3, %v1583_v46  ;;  %v3985_v46 = vld [vmem:[#allocation2 + $0xd8] sm:$0xff] }
 0x1f7   : > { %2690 = vmatmul.msk.f32.gmra.mxu3 %vm605_vm3, %v3785_v59 }
 0x1f9   : > { %v1213_v28 = vpop.f32.mrf.mxu1 }
 0x1fa   : > { %v993_v18 = vpop.f32.mrf.mxu3 }
 0x1fb   : > { %v3970_v23 = vadd.f32 %v1109_v50, %v993_v18  ;;  %v3992_v50 = vpop.f32.mrf.mxu0 }
 0x1fc   : > { %2731 = vmatmul.msk.f32.gmra.mxu1 %vm605_vm3, %v3742_v41  ;;  %v2210_v41 = vld [vmem:[%s4419_s29] sm:$0xf]  ;;  %s3110_s29 = sshra.s32 %s2415_s12, 4  ;;  %s3111_s29 = int_to_ptr.hbm [resolvable:$true] %s3110_s29 }
 0x1fd   : > { %2779 = vmatpush.msk.msrb.mxu0 %vm936_vm2, %v2210_v41  ;;  %s3112_s26 = scalar_lea.hbm %s3111_s29, 128  ;;  %p3117_p10 = scmp.lt.s32.totalorder %s3111_s29, %s4430_s24 }
 0x1fe   : > { %2774 = vmatmul.msk.f32.gmra.mxu2 %vm605_vm3, %v1584_v52  ;;  %p3113_p3 = scmp.ne.s32.totalorder %s3111_s29, %s3112_s26 }
 0x1ff   : > { %2691 = vmatmul.msk.f32.gmra.mxu3 %vm605_vm3, %v3800_v62 }
 0x200   : > { %p3114_p4 = pnand %p3113_p3, %p3410_p8 }
 0x201   : > { %v1216_v37 = vpop.f32.mrf.mxu1 }
 0x202   : > { %v996_v43 = vpop.f32.mrf.mxu3  ;;  %p3115_p5 = pneg %p3114_p4 }
 0x203   : > { %v3981_v44 = vadd.f32 %v1112_v56, %v996_v43  ;;  %v3996_v56 = vpop.f32.mrf.mxu2 }
 0x204   : > { %2732 = vmatmul.msk.f32.gmra.mxu1 %vm605_vm3, %v3762_v49  ;;  %4420 = vst [vmem:[#allocation31_spill] sm:$0xff] %v3996_v56 }
 0x206   : > { %2775 = vmatmul.msk.f32.gmra.mxu2 %vm605_vm3, %v2036_v8  ;;  %v1091_v8 = vpop.f32.mrf.mxu0 }
 0x207   : > { %2692 = vmatmul.msk.f32.gmra.mxu3 %vm605_vm3, %v3985_v46 }
 0x209   : > { %v1219_v52 = vpop.f32.mrf.mxu1 }
 0x20a   : > { %v999_v12 = vpop.f32.mrf.mxu3 }
 0x20b   : > { %v3998_v49 = vadd.f32 %v1115_v1, %v999_v12  ;;  %v4009_v34 = vpop.f32.mrf.mxu2  ;;  %v2038_v1 = vld [vmem:[#allocation2 + $0xf2] sm:$0xff] }
 0x20c   : > { %2733 = vmatmul.msk.f32.gmra.mxu1 %vm605_vm3, %v3776_v55  ;;  %4421 = vst [vmem:[#allocation32_spill] sm:$0xff] %v4009_v34 }
 0x20e   : > { %2776 = vmatmul.msk.f32.gmra.mxu2 %vm605_vm3, %v2037_v15  ;;  %v1094_v12 = vpop.f32.mrf.mxu0 }
 0x20f   : > { %2693 = vmatmul.msk.f32.gmra.mxu3 %vm605_vm3, %v4003_v19 }
 0x211   : > { %v1222_v18 = vpop.f32.mrf.mxu1 }
 0x212   : > { %v1002_v43 = vpop.f32.mrf.mxu3 }
 0x213   : > { %v4007_v41 = vadd.f32 %v1118_v5, %v1002_v43  ;;  %v2039_v5 = vld [vmem:[#allocation2 + $0xfa] sm:$0xff]  ;;  %v4020_v43 = vpop.f32.mrf.mxu2 }
 0x214   : > { %2734 = vmatmul.msk.f32.gmra.mxu1 %vm605_vm3, %v3794_v61  ;;  %4422 = vst [vmem:[#allocation33_spill] sm:$0xff] %v4020_v43  ;;  %v1077_v61 = vadd.f32 %v3932_v3, %v3874_v29  ;;  %v1080_v43 = vadd.f32 %v3945_v9, %v3881_v30 }
 0x216   : > { %2777 = vmatmul.msk.f32.gmra.mxu2 %vm605_vm3, %v2038_v1  ;;  %v1256_v1 = vadd.f32 %v1210_v16, %v1077_v61  ;;  %v1257_v3 = vadd.f32 %v1213_v28, %v1080_v43 }
 0x217   : > { %2746 = vmatmul.msk.f32.vlgmr.msra.gmra.mxu3 %vm605_vm3, %v3707_v27 }
 0x219   : > { %v1225_v55 = vpop.f32.mrf.mxu1 }
 0x21a   : > { %v4016_v15 = vpop.f32.mrf.mxu3 }
 0x21c   : > { %2735 = vmatmul.msk.f32.gmra.mxu1 %vm605_vm3, %v3719_v32  ;;  %v1097_v32 = vpop.f32.mrf.mxu0 }
 0x21d   : > { %v1098_v29 = vadd.f32 %v1097_v32, %v3928_v2 }
 0x21e   : > { %2778 = vmatmul.msk.f32.gmra.mxu2 %vm605_vm3, %v2039_v5 }
 0x21f   : > { %2747 = vmatmul.msk.f32.gmra.mxu3 %vm605_vm3, %v3721_v33 }
 0x221   : > { %v1228_v27 = vpop.f32.mrf.mxu1 }
 0x222   : > { %v1360_v34 = vpop.f32.mrf.mxu3 }
 0x223   : > { %v4027_v56 = vadd.f32 %v1360_v34, %v1256_v1  ;;  %v4040_v34 = vpop.f32.mrf.mxu2 }
 0x224   : > { %2736 = vmatmul.msk.f32.gmra.mxu1 %vm605_vm3, %v3735_v39  ;;  %v1083_v39 = vadd.f32 %v3959_v21, %v3890_v35  ;;  %v1100_v30 = vpop.f32.mrf.mxu0 }
 0x226   : > { %v1258_v2 = vadd.f32 %v1216_v37, %v1083_v39 }
 0x227   : > { %2748 = vmatmul.msk.f32.gmra.mxu3 %vm605_vm3, %v3737_v40  ;;  %v1101_v40 = vadd.f32 %v1100_v30, %v3938_v7 }
 0x229   : > { %v1231_v5 = vpop.f32.mrf.mxu1 }
 0x22a   : > { %v1263_v33 = vadd.f32 %v1231_v5, %v1098_v29  ;;  %v1363_v16 = vpop.f32.mrf.mxu3 }
 0x22b   : > { %v4036_v61 = vadd.f32 %v1363_v16, %v1257_v3  ;;  %v4055_v35 = vpop.f32.mrf.mxu2 }
 0x22c   : > { %2737 = vmatmul.msk.f32.gmra.mxu1 %vm605_vm3, %v3753_v47  ;;  %v1086_v47 = vadd.f32 %v3974_v36, %v3897_v42 }
 0x22f   : > { %2749 = vmatmul.msk.f32.gmra.mxu3 %vm605_vm3, %v3755_v48  ;;  %v1259_v48 = vadd.f32 %v1219_v52, %v1086_v47 }
 0x231   : > { %v1234_v9 = vpop.f32.mrf.mxu1 }
 0x232   : > { %v1264_v28 = vadd.f32 %v1234_v9, %v1101_v40  ;;  %v1366_v43 = vpop.f32.mrf.mxu3 }
 0x233   : > { %v4047_v1 = vadd.f32 %v1366_v43, %v1258_v2  ;;  %v4066_v36 = vpop.f32.mrf.mxu2 }
 0x234   : > { %2738 = vmatmul.msk.f32.gmra.mxu1 %vm605_vm3, %v3769_v53  ;;  %v1089_v53 = vadd.f32 %v3992_v50, %v3904_v45 }
 0x236   : > { %v1260_v42 = vadd.f32 %v1222_v18, %v1089_v53 }
 0x237   : > { %2750 = vmatmul.msk.f32.gmra.mxu3 %vm605_vm3, %v3771_v54 }
 0x239   : > { %v1237_v21 = vpop.f32.mrf.mxu1 }
 0x23a   : > { %v1265_v7 = vadd.f32 %v1237_v21, %v3949_v13  ;;  %v1369_v37 = vpop.f32.mrf.mxu3 }
 0x23b   : > { %v4058_v32 = vadd.f32 %v1369_v37, %v1259_v48  ;;  %v4079_v5 = vpop.f32.mrf.mxu2  ;;  %v1888_v37 = vld [vmem:[#allocation2 + $0xf1] sm:$0xff] }
 0x23c   : > { %2739 = vmatmul.msk.f32.gmra.mxu1 %vm605_vm3, %v3785_v59  ;;  %v1092_v59 = vadd.f32 %v1091_v8, %v3911_v51 }
 0x23e   : > { %v1261_v45 = vadd.f32 %v1225_v55, %v1092_v59 }
 0x23f   : > { %2751 = vmatmul.msk.f32.gmra.mxu3 %vm605_vm3, %v3787_v60 }
 0x241   : > { %v1240_v54 = vpop.f32.mrf.mxu1 }
 0x242   : > { %v1266_v52 = vadd.f32 %v1240_v54, %v3961_v24  ;;  %v1372_v29 = vpop.f32.mrf.mxu3  ;;  %v1095_v24 = vadd.f32 %v1094_v12, %v3918_v57 }
 0x243   : > { %v4069_v13 = vadd.f32 %v1372_v29, %v1260_v42 }
 0x244   : > { %2740 = vmatmul.msk.f32.gmra.mxu1 %vm605_vm3, %v3800_v62  ;;  %v1262_v62 = vadd.f32 %v1228_v27, %v1095_v24  ;;  %v1738_v27 = vld [vmem:[#allocation2 + $0xf0] sm:$0xff] }
 0x247   : > { %2752 = vmatmul.msk.f32.gmra.mxu3 %vm605_vm3, %v3802_v63 }
 0x249   : > { %v1243_v50 = vpop.f32.mrf.mxu1 }
 0x24a   : > { %v1267_v60 = vadd.f32 %v1243_v50, %v3970_v23  ;;  %v1375_v18 = vpop.f32.mrf.mxu3  ;;  %v4091_v23 = vpop.f32.mrf.mxu2 }
 0x24b   : > { %v4077_v3 = vadd.f32 %v1375_v18, %v1261_v45 }
 0x24c   : > { %2741 = vmatmul.msk.f32.gmra.mxu1 %vm605_vm3, %v3985_v46 }
 0x24f   : > { %2753 = vmatmul.msk.f32.gmra.mxu3 %vm605_vm3, %v3812_v4 }
 0x251   : > { %v1246_v51 = vpop.f32.mrf.mxu1 }
 0x252   : > { %v1268_v63 = vadd.f32 %v1246_v51, %v3981_v44  ;;  %v1378_v8 = vpop.f32.mrf.mxu3  ;;  %v4101_v44 = vpop.f32.mrf.mxu2 }
 0x253   : > { %v4087_v55 = vadd.f32 %v1378_v8, %v1262_v62 }
 0x254   : > { %2742 = vmatmul.msk.f32.gmra.mxu1 %vm605_vm3, %v4003_v19 }
 0x257   : > { %2754 = vmatmul.msk.f32.gmra.mxu3 %vm605_vm3, %v3822_v10  ;;  %v1739_v10 = vld [vmem:[#allocation2 + $0xf8] sm:$0xff] }
 0x259   : > { %v1249_v46 = vpop.f32.mrf.mxu1 }
 0x25a   : > { %v1269_v57 = vadd.f32 %v1249_v46, %v3998_v49  ;;  %v1381_v12 = vpop.f32.mrf.mxu3  ;;  %v4109_v49 = vpop.f32.mrf.mxu2 }
 0x25b   : > { %v4096_v4 = vadd.f32 %v1381_v12, %v1263_v33 }
 0x25c   : > { %2743 = vmatmul.msk.f32.gmra.mxu1 %vm605_vm3, %v1738_v27 }
 0x25f   : > { %2755 = vmatmul.msk.f32.gmra.mxu3 %vm605_vm3, %v3833_v38 }
 0x261   : > { %v1252_v19 = vpop.f32.mrf.mxu1 }
 0x262   : > { %v1270_v16 = vadd.f32 %v1252_v19, %v4007_v41  ;;  %v1384_v39 = vpop.f32.mrf.mxu3  ;;  %v4117_v41 = vpop.f32.mrf.mxu2 }
 0x263   : > { %v4104_v30 = vadd.f32 %v1384_v39, %v1264_v28  ;;  %v1657_v28 = vpop.f32.mrf.mxu0 }
 0x264   : > { %2744 = vmatmul.msk.f32.gmra.mxu1 %vm605_vm3, %v1739_v10 }
 0x267   : > { %2756 = vmatmul.msk.f32.gmra.mxu3 %vm605_vm3, %v3842_v17 }
 0x269   : > { %v1810_v9 = vpop.f32.mrf.mxu1 }
 0x26a   : > { %v1387_v33 = vpop.f32.mrf.mxu3  ;;  %v2110_v47 = vpop.f32.mrf.mxu2 }
 0x26b   : > { %v4111_v40 = vadd.f32 %v1387_v33, %v1265_v7  ;;  %v1660_v7 = vpop.f32.mrf.mxu0  ;;  %v1557_v33 = vadd.f32 %v3951_v14, %v4036_v61 }
 0x26f   : > { %2757 = vmatmul.msk.f32.gmra.mxu3 %vm605_vm3, %v3850_v20 }
 0x271   : > { %v1813_v48 = vpop.f32.mrf.mxu1 }
 0x272   : > { %v1390_v38 = vpop.f32.mrf.mxu3  ;;  %v2113_v53 = vpop.f32.mrf.mxu2 }
 0x273   : > { %v4115_v2 = vadd.f32 %v1390_v38, %v1266_v52  ;;  %v1663_v59 = vpop.f32.mrf.mxu0 }
 0x277   : > { %2758 = vmatmul.msk.f32.gmra.mxu3 %vm605_vm3, %v3858_v22  ;;  %v1074_v22 = vadd.f32 %v3921_v58, %v3888_v31 }
 0x279   : > { %v1816_v52 = vpop.f32.mrf.mxu1  ;;  %v1255_v29 = vadd.f32 %v3947_v11, %v1074_v22  ;;  %v1556_v11 = vadd.f32 %v3936_v6, %v4027_v56 }
 0x27a   : > { %v1393_v43 = vpop.f32.mrf.mxu3  ;;  %v2116_v50 = vpop.f32.mrf.mxu2 }
 0x27b   : > { %v4121_v17 = vadd.f32 %v1393_v43, %v1267_v60  ;;  %v1405_v45 = vadd.f32 %v4016_v15, %v1255_v29  ;;  %v1666_v31 = vpop.f32.mrf.mxu0  ;;  %v4143_v15 = vld [vmem:[%s4423_s7] ss:$0 sm:$0xff]  ;;  %v1706_v12 = vadd.f32 %v1660_v7, %v1556_v11  ;;  %s3116_s7 = scalar_lea.hbm %s4430_s24, 512 }
 0x27c   : > { %p3118_p0 = scmp.lt.s32.totalorder %s3116_s7, %s3112_s26 }
 0x27d   : > { %v1555_v18 = vadd.f32 %v3926_v0, %v1405_v45  ;;  %v1859_v19 = vadd.f32 %v1813_v48, %v1706_v12  ;;  %v1558_v48 = vadd.f32 %v3965_v26, %v4047_v1 }
 0x27e   : > { %p3119_p6 = por %p3118_p0, %p3117_p10 }
 0x27f   : > { %2759 = vmatmul.msk.f32.gmra.mxu3 %vm605_vm3, %v3866_v25  ;;  %v1889_v25 = vld [vmem:[#allocation2 + $0xf9] sm:$0xff]  ;;  %v1705_v51 = vadd.f32 %v1657_v28, %v1555_v18  ;;  %v1708_v61 = vadd.f32 %v1666_v31, %v1558_v48 }
 0x280   : > { %p3120_p2 = pnand %p3119_p6, %p3115_p5 }
 0x281   : > { %v1819_v62 = vpop.f32.mrf.mxu1  ;;  %v1858_v58 = vadd.f32 %v1810_v9, %v1705_v51  ;;  %v1707_v9 = vadd.f32 %v1663_v59, %v1557_v33 }
 0x282   : > { %v1396_v21 = vpop.f32.mrf.mxu3  ;;  %v2119_v46 = vpop.f32.mrf.mxu2  ;;  %v1861_v29 = vadd.f32 %v1819_v62, %v1708_v61  ;;  %v4425_v62 = vld [vmem:[#allocation31_spill] sm:$0xff] }
 0x283   : > { %v4125_v20 = vadd.f32 %v1396_v21, %v1268_v63  ;;  %v1669_v39 = vpop.f32.mrf.mxu0  ;;  %v1860_v43 = vadd.f32 %v1816_v52, %v1707_v9  ;;  %v4424_v52 = vld [vmem:[#allocation30_spill] sm:$0xff] }
 0x284   : > { %v1559_v45 = vadd.f32 %v4424_v52, %v4058_v32  ;;  %v1563_v52 = vadd.f32 %v4040_v34, %v4096_v4 }
 0x286   : > { %v1709_v51 = vadd.f32 %v1669_v39, %v1559_v45 }
 0x287   : > { %2760 = vmatmul.msk.f32.gmra.mxu3 %vm605_vm3, %v1888_v37 }
 0x289   : > { %v1822_v27 = vpop.f32.mrf.mxu1 }
 0x28a   : > { %v1399_v42 = vpop.f32.mrf.mxu3  ;;  %v2122_v38 = vpop.f32.mrf.mxu2 }
 0x28b   : > { %v4130_v54 = vadd.f32 %v1399_v42, %v1269_v57  ;;  %v1672_v42 = vpop.f32.mrf.mxu0 }
 0x28f   : > { %2761 = vmatmul.msk.f32.gmra.mxu3 %vm605_vm3, %v1889_v25 }
 0x291   : > { %v1825_v21 = vpop.f32.mrf.mxu1 }
 0x292   : > { %v1402_v60 = vpop.f32.mrf.mxu3 }
 0x293   : > { %v4136_v24 = vadd.f32 %v1402_v60, %v1270_v16  ;;  %v1675_v1 = vpop.f32.mrf.mxu0 }
 0x299   : > { %v1828_v18 = vpop.f32.mrf.mxu1 }
 0x29a   : > { %v1960_v63 = vpop.f32.mrf.mxu3 }
 0x29b   : > { %v2008_v8 = vadd.f32 %v1960_v63, %v1858_v58 }
 0x29d   : > { %v2158_v57 = vadd.f32 %v2110_v47, %v2008_v8  ;;  %v1560_v8 = vadd.f32 %v4425_v62, %v4069_v13 }
 0x29f   : > { %v2178_v0 = vadd.f32 %v4143_v15, %v2158_v57 }
 0x2a1   : > { %v2194_v16 = vmax.f32 %v2178_v0, 0.0  ;;  %v1831_v12 = vpop.f32.mrf.mxu1  ;;  %v1710_v0 = vadd.f32 %v1672_v42, %v1560_v8 }
 0x2a2   : > { %v1963_v10 = vpop.f32.mrf.mxu3 }
 0x2a3   : > { %v2009_v6 = vadd.f32 %v1963_v10, %v1859_v19  ;;  %2780 = vmatmul.msk.f32.vlgmr.msrb.gmra.mxu0 %vm605_vm3, %v2194_v16  ;;  %v1863_v16 = vadd.f32 %v1825_v21, %v1710_v0  ;;  %v4427_v21 = vld [vmem:[#allocation33_spill] sm:$0xff] }
 0x2a5   : > { %v2159_v56 = vadd.f32 %v2113_v53, %v2009_v6  ;;  %v2125_v53 = vpop.f32.mrf.mxu2 }
 0x2a7   : > { %v2179_v28 = vadd.f32 %v4143_v15, %v2159_v56 }
 0x2a9   : > { %v2195_v47 = vmax.f32 %v2179_v28, 0.0 }
 0x2aa   : > { %v1966_v7 = vpop.f32.mrf.mxu3 }
 0x2ab   : > { %v2010_v37 = vadd.f32 %v1966_v7, %v1860_v43  ;;  %2781 = vmatmul.msk.f32.gmra.mxu0 %vm605_vm3, %v2195_v47 }
 0x2ad   : > { %v2160_v14 = vadd.f32 %v2116_v50, %v2010_v37  ;;  %v1862_v50 = vadd.f32 %v1822_v27, %v1709_v51  ;;  %v2128_v63 = vpop.f32.mrf.mxu2  ;;  %v4426_v27 = vld [vmem:[#allocation32_spill] sm:$0xff]  ;;  %v1562_v37 = vadd.f32 %v4427_v21, %v4087_v55  ;;  %v1567_v21 = vadd.f32 %v4091_v23, %v4121_v17 }
 0x2ae   : > { %v1561_v33 = vadd.f32 %v4426_v27, %v4077_v3 }
 0x2af   : > { %v2180_v22 = vadd.f32 %v4143_v15, %v2160_v14 }
 0x2b0   : > { %v1711_v9 = vadd.f32 %v1675_v1, %v1561_v33 }
 0x2b1   : > { %v2196_v59 = vmax.f32 %v2180_v22, 0.0 }
 0x2b2   : > { %v1969_v25 = vpop.f32.mrf.mxu3  ;;  %v1864_v43 = vadd.f32 %v1828_v18, %v1711_v9 }
 0x2b3   : > { %v2011_v60 = vadd.f32 %v1969_v25, %v1861_v29  ;;  %2782 = vmatmul.msk.f32.gmra.mxu0 %vm605_vm3, %v2196_v59 }
 0x2b5   : > { %v2161_v26 = vadd.f32 %v2119_v46, %v2011_v60  ;;  %v1678_v46 = vpop.f32.mrf.mxu0  ;;  %v2131_v56 = vpop.f32.mrf.mxu2 }
 0x2b6   : > { %v1712_v61 = vadd.f32 %v1678_v46, %v1562_v37 }
 0x2b7   : > { %v2181_v58 = vadd.f32 %v4143_v15, %v2161_v26 }
 0x2b9   : > { %v2197_v31 = vmax.f32 %v2181_v58, 0.0 }
 0x2ba   : > { %v1972_v11 = vpop.f32.mrf.mxu3 }
 0x2bb   : > { %v2012_v57 = vadd.f32 %v1972_v11, %v1862_v50  ;;  %2783 = vmatmul.msk.f32.gmra.mxu0 %vm605_vm3, %v2197_v31  ;;  %v1564_v31 = vadd.f32 %v4055_v35, %v4104_v30 }
 0x2bd   : > { %v2162_v32 = vadd.f32 %v2122_v38, %v2012_v57  ;;  %v1834_v38 = vpop.f32.mrf.mxu1  ;;  %v1681_v7 = vpop.f32.mrf.mxu0 }
 0x2be   : > { %v2134_v14 = vpop.f32.mrf.mxu2  ;;  %v1713_v18 = vadd.f32 %v1681_v7, %v1563_v52 }
 0x2bf   : > { %v2182_v19 = vadd.f32 %v4143_v15, %v2162_v32 }
 0x2c0   : > { %v1866_v51 = vadd.f32 %v1834_v38, %v1713_v18 }
 0x2c1   : > { %v2198_v39 = vmax.f32 %v2182_v19, 0.0  ;;  %v1565_v19 = vadd.f32 %v4066_v36, %v4111_v40 }
 0x2c2   : > { %v1975_v10 = vpop.f32.mrf.mxu3 }
 0x2c3   : > { %v2013_v6 = vadd.f32 %v1975_v10, %v1863_v16  ;;  %2784 = vmatmul.msk.f32.gmra.mxu0 %vm605_vm3, %v2198_v39 }
 0x2c5   : > { %v2163_v13 = vadd.f32 %v2125_v53, %v2013_v6  ;;  %v1865_v53 = vadd.f32 %v1831_v12, %v1712_v61  ;;  %v1837_v59 = vpop.f32.mrf.mxu1  ;;  %v1684_v60 = vpop.f32.mrf.mxu0 }
 0x2c6   : > { %v2137_v1 = vpop.f32.mrf.mxu2  ;;  %v1714_v62 = vadd.f32 %v1684_v60, %v1564_v31 }
 0x2c7   : > { %v2183_v28 = vadd.f32 %v4143_v15, %v2163_v13 }
 0x2c8   : > { %v1867_v57 = vadd.f32 %v1837_v59, %v1714_v62 }
 0x2c9   : > { %v2199_v47 = vmax.f32 %v2183_v28, 0.0 }
 0x2ca   : > { %v1978_v48 = vpop.f32.mrf.mxu3 }
 0x2cb   : > { %v2014_v42 = vadd.f32 %v1978_v48, %v1864_v43  ;;  %2785 = vmatmul.msk.f32.gmra.mxu0 %vm605_vm3, %v2199_v47 }
 0x2cd   : > { %v2164_v3 = vadd.f32 %v2128_v63, %v2014_v42  ;;  %v1840_v11 = vpop.f32.mrf.mxu1  ;;  %v1687_v4 = vpop.f32.mrf.mxu0 }
 0x2ce   : > { %v2140_v12 = vpop.f32.mrf.mxu2  ;;  %v1715_v16 = vadd.f32 %v1687_v4, %v1565_v19  ;;  %v1570_v4 = vadd.f32 %v4117_v41, %v4136_v24 }
 0x2cf   : > { %v2184_v22 = vadd.f32 %v4143_v15, %v2164_v3 }
 0x2d0   : > { %v1868_v27 = vadd.f32 %v1840_v11, %v1715_v16  ;;  %v4208_v16 = vld [vmem:[%s4428_s28] ss:$0 sm:$0xff] }
 0x2d1   : > { %v2200_v29 = vmax.f32 %v2184_v22, 0.0 }
 0x2d2   : > { %v1981_v25 = vpop.f32.mrf.mxu3 }
 0x2d3   : > { %v2015_v45 = vadd.f32 %v1981_v25, %v1865_v53  ;;  %2786 = vmatmul.msk.f32.gmra.mxu0 %vm605_vm3, %v2200_v29  ;;  %v1568_v29 = vadd.f32 %v4101_v44, %v4125_v20 }
 0x2d5   : > { %v2165_v55 = vadd.f32 %v2131_v56, %v2015_v45  ;;  %v1843_v30 = vpop.f32.mrf.mxu1  ;;  %v1690_v10 = vpop.f32.mrf.mxu0  ;;  %v1566_v56 = vadd.f32 %v4079_v5, %v4115_v2 }
 0x2d6   : > { %v2143_v9 = vpop.f32.mrf.mxu2 }
 0x2d7   : > { %v2185_v26 = vadd.f32 %v4143_v15, %v2165_v55  ;;  %v1716_v40 = vadd.f32 %v1690_v10, %v1566_v56 }
 0x2d9   : > { %v2201_v58 = vmax.f32 %v2185_v26, 0.0  ;;  %v1869_v43 = vadd.f32 %v1843_v30, %v1716_v40  ;;  %v1569_v26 = vadd.f32 %v4109_v49, %v4130_v54  ;;  %v2213_v40 = vld [vmem:[%s3560_s27 + $0x10] sm:$0xff] }
 0x2da   : > { %v1984_v50 = vpop.f32.mrf.mxu3 }
 0x2db   : > { %v2016_v63 = vadd.f32 %v1984_v50, %v1866_v51  ;;  %2787 = vmatmul.msk.f32.gmra.mxu0 %vm605_vm3, %v2201_v58 }
 0x2dd   : > { %v2166_v34 = vadd.f32 %v2134_v14, %v2016_v63  ;;  %v1846_v38 = vpop.f32.mrf.mxu1  ;;  %v1693_v7 = vpop.f32.mrf.mxu0 }
 0x2de   : > { %v2146_v2 = vpop.f32.mrf.mxu2  ;;  %v1717_v42 = vadd.f32 %v1693_v7, %v1567_v21  ;;  %v2214_v7 = vld [vmem:[%s3560_s27 + $0x18] sm:$0xff] }
 0x2df   : > { %v2186_v8 = vadd.f32 %v4143_v15, %v2166_v34 }
 0x2e0   : > { %v1870_v14 = vadd.f32 %v1846_v38, %v1717_v42 }
 0x2e1   : > { %v2202_v32 = vmax.f32 %v2186_v8, 0.0 }
 0x2e2   : > { %v1987_v0 = vpop.f32.mrf.mxu3 }
 0x2e3   : > { %v2017_v46 = vadd.f32 %v1987_v0, %v1867_v57  ;;  %2788 = vmatmul.msk.f32.gmra.mxu0 %vm605_vm3, %v2202_v32 }
 0x2e5   : > { %v2167_v35 = vadd.f32 %v2137_v1, %v2017_v46  ;;  %v1849_v22 = vpop.f32.mrf.mxu1  ;;  %v1696_v25 = vpop.f32.mrf.mxu0 }
 0x2e6   : > { %v1718_v17 = vadd.f32 %v1696_v25, %v1568_v29  ;;  %v2149_v45 = vpop.f32.mrf.mxu2 }
 0x2e7   : > { %v2187_v39 = vadd.f32 %v4143_v15, %v2167_v35 }
 0x2e8   : > { %v1871_v60 = vadd.f32 %v1849_v22, %v1718_v17  ;;  %v2216_v22 = vld [vmem:[%s3560_s27 + $0x28] sm:$0xff] }
 0x2e9   : > { %v2203_v33 = vmax.f32 %v2187_v39, 0.0  ;;  %v2211_v39 = vld [vmem:[%s3560_s27] sm:$0xff] }
 0x2ea   : > { %v1990_v6 = vpop.f32.mrf.mxu3 }
 0x2eb   : > { %v2018_v13 = vadd.f32 %v1990_v6, %v1868_v27  ;;  %2789 = vmatmul.msk.f32.gmra.mxu0 %vm605_vm3, %v2203_v33 }
 0x2ed   : > { %v2168_v36 = vadd.f32 %v2140_v12, %v2018_v13  ;;  %v1699_v51 = vpop.f32.mrf.mxu0  ;;  %v1852_v44 = vpop.f32.mrf.mxu1 }
 0x2ee   : > { %v1719_v58 = vadd.f32 %v1699_v51, %v1569_v26  ;;  %v2152_v11 = vpop.f32.mrf.mxu2 }
 0x2ef   : > { %v2188_v28 = vadd.f32 %v4143_v15, %v2168_v36 }
 0x2f0   : > { %v1872_v31 = vadd.f32 %v1852_v44, %v1719_v58  ;;  %v2219_v44 = vld [vmem:[%s3560_s27 + $0x40] sm:$0xff] }
 0x2f1   : > { %v2204_v47 = vmax.f32 %v2188_v28, 0.0 }
 0x2f2   : > { %v1993_v48 = vpop.f32.mrf.mxu3 }
 0x2f3   : > { %v2019_v37 = vadd.f32 %v1993_v48, %v1869_v43  ;;  %2790 = vmatmul.msk.f32.gmra.mxu0 %vm605_vm3, %v2204_v47 }
 0x2f5   : > { %v2169_v5 = vadd.f32 %v2143_v9, %v2019_v37  ;;  %v1702_v54 = vpop.f32.mrf.mxu0  ;;  %v1855_v8 = vpop.f32.mrf.mxu1 }
 0x2f6   : > { %v1720_v57 = vadd.f32 %v1702_v54, %v1570_v4  ;;  %v2155_v35 = vpop.f32.mrf.mxu2 }
 0x2f7   : > { %v2189_v3 = vadd.f32 %v4143_v15, %v2169_v5 }
 0x2f8   : > { %v1873_v12 = vadd.f32 %v1855_v8, %v1720_v57 }
 0x2f9   : > { %v2205_v61 = vmax.f32 %v2189_v3, 0.0 }
 0x2fa   : > { %v1996_v53 = vpop.f32.mrf.mxu3 }
 0x2fb   : > { %v2020_v59 = vadd.f32 %v1996_v53, %v1870_v14  ;;  %2791 = vmatmul.msk.f32.gmra.mxu0 %vm605_vm3, %v2205_v61 }
 0x2fd   : > { %v2170_v23 = vadd.f32 %v2146_v2, %v2020_v59  ;;  %v2215_v2 = vld [vmem:[%s3560_s27 + $0x20] sm:$0xff] }
 0x2ff   : > { %v2190_v52 = vadd.f32 %v4143_v15, %v2170_v23  ;;  %v2217_v23 = vld [vmem:[%s3560_s27 + $0x30] sm:$0xff] }
 0x301   : > { %v2206_v55 = vmax.f32 %v2190_v52, 0.0 }
 0x302   : > { %v1999_v18 = vpop.f32.mrf.mxu3 }
 0x303   : > { %v2021_v1 = vadd.f32 %v1999_v18, %v1871_v60  ;;  %2792 = vmatmul.msk.f32.gmra.mxu0 %vm605_vm3, %v2206_v55  ;;  %v2218_v55 = vld [vmem:[%s3560_s27 + $0x38] sm:$0xff] }
 0x305   : > { %v2171_v20 = vadd.f32 %v2149_v45, %v2021_v1 }
 0x307   : > { %v2191_v50 = vadd.f32 %v4143_v15, %v2171_v20 }
 0x309   : > { %v2207_v63 = vmax.f32 %v2191_v50, 0.0 }
 0x30a   : > { %v2002_v34 = vpop.f32.mrf.mxu3 }
 0x30b   : > { %v2022_v62 = vadd.f32 %v2002_v34, %v1872_v31  ;;  %2793 = vmatmul.msk.f32.gmra.mxu0 %vm605_vm3, %v2207_v63  ;;  %v2220_v63 = vld [vmem:[%s3560_s27 + $0x48] sm:$0xff] }
 0x30d   : > { %v2172_v49 = vadd.f32 %v2152_v11, %v2022_v62 }
 0x30f   : > { %v2192_v32 = vadd.f32 %v4143_v15, %v2172_v49  ;;  %v2221_v49 = vld [vmem:[%s3560_s27 + $0x50] sm:$0xff] }
 0x311   : > { %v2208_v0 = vmax.f32 %v2192_v32, 0.0 }
 0x312   : > { %v2005_v19 = vpop.f32.mrf.mxu3 }
 0x313   : > { %v2023_v46 = vadd.f32 %v2005_v19, %v1873_v12  ;;  %2794 = vmatmul.msk.f32.gmra.mxu0 %vm605_vm3, %v2208_v0  ;;  %v2222_v12 = vld [vmem:[%s3560_s27 + $0x58] sm:$0xff] }
 0x315   : > { %v2173_v41 = vadd.f32 %v2155_v35, %v2023_v46 }
 0x317   : > { %v2193_v24 = vadd.f32 %v4143_v15, %v2173_v41  ;;  %v2212_v15 = vld [vmem:[%s3560_s27 + $0x8] sm:$0xff]  ;;  %v2223_v41 = vld [vmem:[%s3560_s27 + $0x60] sm:$0xff] }
 0x319   : > { %v2209_v30 = vmax.f32 %v2193_v24, 0.0 }
 0x31b   : > { %2795 = vmatmul.msk.f32.gmra.mxu0 %vm605_vm3, %v2209_v30 }
 0x320   : > { %v2299_v10 = vpop.f32.mrf.mxu0 }
 0x321   : > { %v2300_v27 = vadd.f32 %v4208_v16, %v2299_v10 }
 0x323   : > { %v2347_v33 = vadd.f32 %v2300_v27, %v2211_v39  ;;  %v2224_v27 = vld [vmem:[%s3560_s27 + $0x68] sm:$0xff] }
 0x325   : > { %v2363_v6 = vmax.f32 %v2347_v33, 0.0 }
 0x327   : > { %2380 = vst.msk [vmem:[%s4213_s17] sm:$0xff] %vm554_vm0, %v2363_v6 }
 0x328   : > { %v2302_v56 = vpop.f32.mrf.mxu0 }
 0x329   : > { %v2303_v13 = vadd.f32 %v4208_v16, %v2302_v56 }
 0x32b   : > { %v2348_v9 = vadd.f32 %v2303_v13, %v2212_v15  ;;  %v2225_v13 = vld [vmem:[%s3560_s27 + $0x70] sm:$0xff] }
 0x32d   : > { %v2364_v36 = vmax.f32 %v2348_v9, 0.0 }
 0x32f   : > { %2381 = vst.msk [vmem:[%s4213_s17 + $0x8] sm:$0xff] %vm554_vm0, %v2364_v36 }
 0x330   : > { %v2305_v28 = vpop.f32.mrf.mxu0 }
 0x331   : > { %v2306_v38 = vadd.f32 %v4208_v16, %v2305_v28 }
 0x333   : > { %v2349_v43 = vadd.f32 %v2306_v38, %v2213_v40  ;;  %v2226_v38 = vld [vmem:[%s3560_s27 + $0x78] sm:$0xff] }
 0x335   : > { %v2365_v47 = vmax.f32 %v2349_v43, 0.0 }
 0x337   : > { %2382 = vst.msk [vmem:[%s4213_s17 + $0x10] sm:$0xff] %vm554_vm0, %v2365_v47 }
 0x338   : > { %v2308_v48 = vpop.f32.mrf.mxu0 }
 0x339   : > { %v2309_v21 = vadd.f32 %v4208_v16, %v2308_v48 }
 0x33b   : > { %v2350_v37 = vadd.f32 %v2309_v21, %v2214_v7 }
 0x33d   : > { %v2366_v5 = vmax.f32 %v2350_v37, 0.0 }
 0x33f   : > { %2383 = vst.msk [vmem:[%s4213_s17 + $0x18] sm:$0xff] %vm554_vm0, %v2366_v5 }
 0x340   : > { %v2311_v42 = vpop.f32.mrf.mxu0 }
 0x341   : > { %v2312_v3 = vadd.f32 %v4208_v16, %v2311_v42 }
 0x343   : > { %v2351_v14 = vadd.f32 %v2312_v3, %v2215_v2 }
 0x345   : > { %v2367_v61 = vmax.f32 %v2351_v14, 0.0 }
 0x347   : > { %2384 = vst.msk [vmem:[%s4213_s17 + $0x20] sm:$0xff] %vm554_vm0, %v2367_v61 }
 0x348   : > { %v2314_v53 = vpop.f32.mrf.mxu0 }
 0x349   : > { %v2315_v29 = vadd.f32 %v4208_v16, %v2314_v53 }
 0x34b   : > { %v2352_v59 = vadd.f32 %v2315_v29, %v2216_v22 }
 0x34d   : > { %v2368_v25 = vmax.f32 %v2352_v59, 0.0 }
 0x34f   : > { %2385 = vst.msk [vmem:[%s4213_s17 + $0x28] sm:$0xff] %vm554_vm0, %v2368_v25 }
 0x350   : > { %v2317_v17 = vpop.f32.mrf.mxu0 }
 0x351   : > { %v2318_v52 = vadd.f32 %v4208_v16, %v2317_v17 }
 0x353   : > { %v2353_v45 = vadd.f32 %v2318_v52, %v2217_v23 }
 0x355   : > { %v2369_v60 = vmax.f32 %v2353_v45, 0.0 }
 0x357   : > { %2386 = vst.msk [vmem:[%s4213_s17 + $0x30] sm:$0xff] %vm554_vm0, %v2369_v60 }
 0x358   : > { %v2320_v18 = vpop.f32.mrf.mxu0 }
 0x359   : > { %v2321_v26 = vadd.f32 %v4208_v16, %v2320_v18 }
 0x35b   : > { %v2354_v1 = vadd.f32 %v2321_v26, %v2218_v55 }
 0x35d   : > { %v2370_v51 = vmax.f32 %v2354_v1, 0.0 }
 0x35f   : > { %2387 = vst.msk [vmem:[%s4213_s17 + $0x38] sm:$0xff] %vm554_vm0, %v2370_v51 }
 0x360   : > { %v2323_v20 = vpop.f32.mrf.mxu0 }
 0x361   : > { %v2324_v58 = vadd.f32 %v4208_v16, %v2323_v20 }
 0x363   : > { %v2355_v50 = vadd.f32 %v2324_v58, %v2219_v44 }
 0x365   : > { %v2371_v31 = vmax.f32 %v2355_v50, 0.0 }
 0x367   : > { %2388 = vst.msk [vmem:[%s4213_s17 + $0x40] sm:$0xff] %vm554_vm0, %v2371_v31 }
 0x368   : > { %v2326_v11 = vpop.f32.mrf.mxu0 }
 0x369   : > { %v2327_v34 = vadd.f32 %v4208_v16, %v2326_v11 }
 0x36b   : > { %v2356_v4 = vadd.f32 %v2327_v34, %v2220_v63 }
 0x36d   : > { %v2372_v62 = vmax.f32 %v2356_v4, 0.0 }
 0x36f   : > { %2389 = vst.msk [vmem:[%s4213_s17 + $0x48] sm:$0xff] %vm554_vm0, %v2372_v62 }
 0x370   : > { %v2329_v54 = vpop.f32.mrf.mxu0 }
 0x371   : > { %v2330_v8 = vadd.f32 %v4208_v16, %v2329_v54 }
 0x373   : > { %v2357_v57 = vadd.f32 %v2330_v8, %v2221_v49 }
 0x375   : > { %v2373_v32 = vmax.f32 %v2357_v57, 0.0 }
 0x377   : > { %2390 = vst.msk [vmem:[%s4213_s17 + $0x50] sm:$0xff] %vm554_vm0, %v2373_v32 }
 0x378   : > { %v2332_v0 = vpop.f32.mrf.mxu0 }
 0x379   : > { %v2333_v19 = vadd.f32 %v4208_v16, %v2332_v0 }
 0x37b   : > { %v2358_v46 = vadd.f32 %v2333_v19, %v2222_v12 }
 0x37d   : > { %v2374_v35 = vmax.f32 %v2358_v46, 0.0 }
 0x37f   : > { %2391 = vst.msk [vmem:[%s4213_s17 + $0x58] sm:$0xff] %vm554_vm0, %v2374_v35 }
 0x380   : > { %v2335_v24 = vpop.f32.mrf.mxu0 }
 0x381   : > { %v2336_v30 = vadd.f32 %v4208_v16, %v2335_v24 }
 0x383   : > { %v2359_v39 = vadd.f32 %v2336_v30, %v2223_v41 }
 0x385   : > { %v2375_v10 = vmax.f32 %v2359_v39, 0.0 }
 0x387   : > { %2392 = vst.msk [vmem:[%s4213_s17 + $0x60] sm:$0xff] %vm554_vm0, %v2375_v10 }
 0x388   : > { %v2338_v33 = vpop.f32.mrf.mxu0 }
 0x389   : > { %v2339_v6 = vadd.f32 %v4208_v16, %v2338_v33 }
 0x38b   : > { %v2360_v15 = vadd.f32 %v2339_v6, %v2224_v27 }
 0x38d   : > { %v2376_v56 = vmax.f32 %v2360_v15, 0.0 }
 0x38f   : > { %2393 = vst.msk [vmem:[%s4213_s17 + $0x68] sm:$0xff] %vm554_vm0, %v2376_v56 }
 0x390   : > { %v2341_v9 = vpop.f32.mrf.mxu0 }
 0x391   : > { %v2342_v36 = vadd.f32 %v4208_v16, %v2341_v9 }
 0x393   : > { %v2361_v40 = vadd.f32 %v2342_v36, %v2225_v13 }
 0x395   : > { %v2377_v28 = vmax.f32 %v2361_v40, 0.0 }
 0x397   : > { %2394 = vst.msk [vmem:[%s4213_s17 + $0x70] sm:$0xff] %vm554_vm0, %v2377_v28 }
 0x398   : > { %v2344_v43 = vpop.f32.mrf.mxu0 }
 0x399   : > { %v2345_v47 = vadd.f32 %v4208_v16, %v2344_v43 }
 0x39b   : > { %v2362_v7 = vadd.f32 %v2345_v47, %v2226_v38 }
 0x39d   : > { %v2378_v48 = vmax.f32 %v2362_v7, 0.0 }
 0x39f   : > { %2395 = vst.msk [vmem:[%s4213_s17 + $0x78] sm:$0xff] %vm554_vm0, %v2378_v48 }
 0x3a0   : > { %3123 = shalt.err (!%p3120_p2)
}
 0x3a1   : > { %s3262_s14 = smov 128   ;;  %s3263_s28 = smov 8  }
 0x3a2   : > { %2827 = dma.vmem_to_hbm [thread:$0]  (%p3410_p8), %s2413_s18, 2048, %s2415_s12, %s2397_s19, %s3262_s14, %s3262_s14, %s3263_s28  }
 0x3a3 PF: > { %s4432_s17 = sld [smem:[#allocation17_spill]]  ;;  %p2850_p12 = scmp.ge.s32.totalorder %s3254_s22, 2 }
 0x3a5   : > { %p2844_p1 = pnand %p2850_p12, %p3417_p9 }
 0x3a7   : > { %p2845_p7 = pneg %p2844_p1 }
 0x3a9   : > { %s2429_s5 = sand.u32 1, %s4432_s17  }
 0x3aa   : > { %s2430_s8 = scalar_lea.sflag [#allocation5], %s2429_s5 }
 0x3ab   : > { %3197 = dma.done.wait (%p2845_p7), %s2430_s8, 2048  }
 0x3ac   : > { %3199 = vsyncadd (%p2845_p7), %s2430_s8, 4294965248  ;;  %s29_s22 = sadd.s32 1, %s3254_s22   ;;  %s4435_s0 = smov %s3530_s30 }
 0x3ad   : > { %p4300_p11 = scmp.ge.s32.totalorder %s29_s22, 6   ;;  %s4436_s20 = sld [smem:[#allocation18_spill]] }
 0x3ae   : > { %s4437_s14 = sld [smem:[#allocation28_spill]]  ;;  %s4444_s30 = smov %s3206_s10 }
 0x3af   : > { %s4438_s1 = sld [smem:[#allocation19_spill]]  ;;  %s4445_s10 = smov %s3210_s11 }
 0x3b0   : > { %s4439_s17 = sld [smem:[#allocation29_spill]]  ;;  %s4446_s11 = smov %s4435_s0 }
 0x3b1   : > { %s4440_s18 = sld [smem:[#allocation22_spill]]  ;;  %s4447_s12 = smov %s3218_s13 }
 0x3b2   : > { %s4441_s19 = sld [smem:[#allocation23_spill]]  ;;  %s4449_s15 = smov %s3230_s16 }
 0x3b3   : > { %s4442_s21 = sld [smem:[#allocation24_spill]]  ;;  %s4448_s13 = smov %s4436_s20 }
 0x3b4   : > { %s4443_s23 = sld [smem:[#allocation25_spill]] }
 0x3b5   : > { %s4450_s16 = smov %s4438_s1 }
 0x3b6   :  { %28 = sbr.rel (!%p4300_p11) target bundleno = 24 (0x18), region = 143 }
 0x3b9   : > { %s4451_s20 = smov %s4442_s21 }
 0x3ba   : > { %s4452_s21 = smov %s4443_s23 }
 0x3bb   :  { %2436 = vsyncpa [#allocation4], 1 }
 0x3bc   :  { %2438 = vsyncpa [#allocation4 + $0x1], 1 }
 0x3bd   :  { %2439 = vsyncpa [#allocation7], 1 }
 0x3be   :  { %2441 = vsyncpa [#allocation7 + $0x1], 1 }
 0x3bf   :  { %2442 = vsyncpa [#allocation10], 1 }
 0x3c0   :  { %2443 = vsyncpa [#allocation5], 1 }
 0x3c1   :  { %2445 = vsyncpa [#allocation5 + $0x1], 1 }

</bundles_post_ra>
